<compile_context>
chip_gen: v6e
topology: v6e:2x2x1
jax: 0.10.0
libtpu: 0.0.40
codegen_flags: <defaults>
</compile_context>

<pallas_src>
import functools

import jax
import jax.numpy as jnp
from jax.experimental import pallas as pl
from jax.experimental.pallas import tpu as pltpu

LN_EPS_PROJ = 1e-5     # nn.LayerNorm default
LN_EPS_BERT = 1e-12    # BertConfig default layer_norm_eps
# 32 MiB scoped VMEM: safe on v7x (64 MiB physical); on v5e/v6e this could be
# raised toward ~100 MiB for larger resident blocks at production shapes.
VMEM_LIMIT = 32 * 1024 * 1024


def _layernorm(x, gamma, beta, eps):
    mu = jnp.mean(x, axis=-1, keepdims=True)
    var = jnp.mean((x - mu) ** 2, axis=-1, keepdims=True)
    return (x - mu) * jax.lax.rsqrt(var + eps) * gamma + beta


# ---------------------------------------------------------------------------
# Fused kernel: comb_proj/cont_proj + 2-layer GRU + BERT encoder layer + fc
# ---------------------------------------------------------------------------
def gruattn_kernel(emb_ref, cont_ref, mask_ref,
                   w_comb_ref, b_comb_ref, g_comb_ref, be_comb_ref,
                   w_cont_ref, b_cont_ref, g_cont_ref, be_cont_ref,
                   w_ih0_ref, b_ih0_ref, w_hh0_ref, b_hh0_ref,
                   w1c_ref, b1c_ref,
                   wq_ref, bq_ref, wk_ref, bk_ref, wv_ref, bv_ref,
                   wo_ref, bo_ref, g1_ref, be1_ref,
                   wi_ref, bi_ref, wf_ref, bf_ref, g2_ref, be2_ref,
                   wfc_ref, bfc_ref,
                   out_ref, gi_ref, ho_ref,
                   *, n_heads, seq_len, batch, batch_pad, hidden):
    S, B, Bp, H = seq_len, batch, batch_pad, hidden
    dh = H // n_heads
    scale = 1.0 / (dh ** 0.5)
    f32 = jnp.float32

    # ---- fused comb_proj / cont_proj (Linear + LayerNorm), time-major ----
    cate = jnp.dot(emb_ref[...], w_comb_ref[...],
                   preferred_element_type=f32) + b_comb_ref[...]
    cate = _layernorm(cate, g_comb_ref[...], be_comb_ref[...], LN_EPS_PROJ)
    # K=1 projection on the VPU (broadcast multiply), not the MXU.
    cprj = cont_ref[...] * w_cont_ref[...] + b_cont_ref[...]
    cprj = _layernorm(cprj, g_cont_ref[...], be_cont_ref[...], LN_EPS_PROJ)
    x0 = jnp.concatenate([cate, cprj], axis=1)             # (S*Bp, H), one concat

    # ---- GRU layer-0 input projection: ONE GEMM over all S*Bp rows ----
    gi_ref[...] = jnp.dot(x0, w_ih0_ref[...],
                          preferred_element_type=f32) + b_ih0_ref[...]

    # ---- loop-invariant weights/biases hoisted out of the recurrence ----
    w_hh0 = w_hh0_ref[...]                                  # (H, 3H)
    b_hh0 = b_hh0_ref[...]                                  # (1, 3H)
    w1c = w1c_ref[...]                                      # (2H, 4H) combined L1
    b1c = b1c_ref[...]                                      # (1, 4H)

    # ---- serial recurrence: 2 MXU matmuls per timestep, full-tile stores ----
    def body(t, carry):
        h1, h2 = carry
        row = pl.multiple_of(t * Bp, Bp)                    # tile-aligned slab
        gi = gi_ref[pl.ds(row, Bp), :]                      # (Bp, 3H)
        # layer 0: one (Bp,H)x(H,3H) dot, gates sliced from the 3H result
        gh0 = jnp.dot(h1, w_hh0, preferred_element_type=f32) + b_hh0
        r0 = jax.nn.sigmoid(gi[:, :H] + gh0[:, :H])
        z0 = jax.nn.sigmoid(gi[:, H:2 * H] + gh0[:, H:2 * H])
        n0 = jnp.tanh(gi[:, 2 * H:3 * H] + r0 * gh0[:, 2 * H:3 * H])
        h1n = (1.0 - z0) * n0 + z0 * h1
        # layer 1: one (Bp,2H)x(2H,4H) dot on [h1n | h2]; columns are
        # [r_pre | z_pre | n_input_pre | n_hidden_pre] so the n-gate keeps
        # the PyTorch r * (W_hn h + b_hn) structure.
        gates1 = jnp.dot(jnp.concatenate([h1n, h2], axis=1), w1c,
                         preferred_element_type=f32) + b1c
        r1 = jax.nn.sigmoid(gates1[:, :H])
        z1 = jax.nn.sigmoid(gates1[:, H:2 * H])
        n1 = jnp.tanh(gates1[:, 2 * H:3 * H] + r1 * gates1[:, 3 * H:4 * H])
        h2n = (1.0 - z1) * n1 + z1 * h2
        ho_ref[pl.ds(row, Bp), :] = h2n                     # unmasked full-tile store
        return (h1n, h2n)

    hz = jnp.zeros((Bp, H), f32)
    jax.lax.fori_loop(0, S, body, (hz, hz), unroll=True if S <= 16 else 8)

    # ---- BERT encoder layer + fc, whole batch in one step -------------------
    # Per-batch (S,H) slabs gathered from the time-major scratch with a single
    # strided ref read each (rows b, b+Bp, ..., b+(S-1)*Bp); no HBM transpose.
    x_bm = jnp.concatenate(
        [ho_ref[pl.ds(b, S, stride=Bp), :] for b in range(B)], axis=0)  # (B*S, H)
    amall = mask_ref[...]                                   # (B, S) additive mask

    # Q/K/V fused across heads and batch: three (B*S,H)x(H,H) GEMMs.
    q = jnp.dot(x_bm, wq_ref[...], preferred_element_type=f32) + bq_ref[...]
    k = jnp.dot(x_bm, wk_ref[...], preferred_element_type=f32) + bk_ref[...]
    v = jnp.dot(x_bm, wv_ref[...], preferred_element_type=f32) + bv_ref[...]

    ctx_rows = []
    for b in range(B):                                      # static loops (B, heads)
        r0_ = b * S
        am = amall[b:b + 1, :]                              # (1, S)
        heads = []
        for hi in range(n_heads):
            lo = hi * dh
            qh = q[r0_:r0_ + S, lo:lo + dh]
            kh = k[r0_:r0_ + S, lo:lo + dh]
            vh = v[r0_:r0_ + S, lo:lo + dh]
            s = jax.lax.dot_general(qh, kh, (((1,), (1,)), ((), ())),
                                    preferred_element_type=f32) * scale + am
            p = jax.nn.softmax(s, axis=-1)
            heads.append(jnp.dot(p, vh, preferred_element_type=f32))  # (S, dh)
        ctx_rows.append(jnp.concatenate(heads, axis=1))     # (S, H)
    ctx = jnp.concatenate(ctx_rows, axis=0)                 # (B*S, H)

    # Output projection + add&norm + FFN + add&norm, batch-flattened GEMMs.
    attn_out = jnp.dot(ctx, wo_ref[...], preferred_element_type=f32) + bo_ref[...]
    h1a = _layernorm(attn_out + x_bm, g1_ref[...], be1_ref[...], LN_EPS_BERT)
    # TODO(synk): HF 'gelu' is exact erf-GELU; tanh approximation used for
    # Mosaic-safe lowering (max abs diff ~1e-3).
    inter = jax.nn.gelu(
        jnp.dot(h1a, wi_ref[...], preferred_element_type=f32) + bi_ref[...],
        approximate=True)
    ffn = jnp.dot(inter, wf_ref[...], preferred_element_type=f32) + bf_ref[...]
    h2a = _layernorm(ffn + h1a, g2_ref[...], be2_ref[...], LN_EPS_BERT)

    # fc as (1,H) x (S,H)^T -> lane-dense (1,S) rows; single store of (B,S).
    logits = [jax.lax.dot_general(wfc_ref[...], h2a[b * S:(b + 1) * S, :],
                                  (((1,), (1,)), ((), ())),
                                  preferred_element_type=f32) + bfc_ref[...]
              for b in range(B)]
    out_ref[...] = jnp.concatenate(logits, axis=0)          # (B, S)


# ---------------------------------------------------------------------------
# Wrapper / glue
# ---------------------------------------------------------------------------
def gruattn_forward(params, test, question, tag, correct, mask, interaction,
                    elapsed):
    del correct  # target column; unused in forward
    B, S = interaction.shape
    H = params["hidden_dim"]
    nh = params["n_heads"]
    Bp = max(8, ((B + 7) // 8) * 8)                 # pad batch to sublane multiple

    # ---- embeddings, gathered TIME-MAJOR (transpose only the tiny indices) ----
    emb = jnp.concatenate([
        jnp.take(params["emb_interaction"], interaction.T, axis=0),
        jnp.take(params["emb_test"], test.T, axis=0),
        jnp.take(params["emb_question"], question.T, axis=0),
        jnp.take(params["emb_tag"], tag.T, axis=0)], axis=-1)       # (S,B,4*intd)
    cont = elapsed.T[..., None].astype(jnp.float32)                 # (S,B,1)
    if Bp != B:
        # Padded rows carry zero embeddings; they flow through the GRU (wasted
        # work at tiny B) but are never read by the attention / fc epilogue.
        pad = [(0, 0), (0, Bp - B), (0, 0)]
        emb = jnp.pad(emb, pad)
        cont = jnp.pad(cont, pad)
    emb2 = emb.reshape(S * Bp, -1)
    cont2 = cont.reshape(S * Bp, 1)

    # ---- GRU layer-1 combined weight (2H, 4H): [h1n|h2] @ w1c yields
    #      [r_pre | z_pre | n_input_pre | n_hidden_pre] (zero blocks keep the
    #      n-gate's hidden term separate so r1*(W_hn h + b_hn) is exact). ----
    zH = jnp.zeros((H, H), jnp.float32)
    w_ih1, w_hh1 = params["w_ih1"], params["w_hh1"]
    b_ih1, b_hh1 = params["b_ih1"], params["b_hh1"]
    w1c = jnp.concatenate([
        jnp.concatenate([w_ih1[:, :2 * H], w_ih1[:, 2 * H:], zH], axis=1),
        jnp.concatenate([w_hh1[:, :2 * H], zH, w_hh1[:, 2 * H:]], axis=1),
    ], axis=0)                                                       # (2H, 4H)
    b1c = jnp.concatenate([
        b_ih1[:, :2 * H] + b_hh1[:, :2 * H],
        b_ih1[:, 2 * H:],
        b_hh1[:, 2 * H:],
    ], axis=1)                                                       # (1, 4H)

    # ---- extended attention mask: (1 - mask) * -10000, shape (B, S) ----
    ext_mask = (1.0 - mask.astype(jnp.float32)) * -10000.0

    wfc_row = params["wfc"].reshape(1, H)

    args = [
        emb2, cont2, ext_mask,
        params["w_comb"], params["b_comb"], params["g_comb"], params["be_comb"],
        params["w_cont"], params["b_cont"], params["g_cont"], params["be_cont"],
        params["w_ih0"], params["b_ih0"], params["w_hh0"], params["b_hh0"],
        w1c, b1c,
        params["wq"], params["bq"], params["wk"], params["bk"],
        params["wv"], params["bv"], params["wo"], params["bo"],
        params["g1"], params["be1"], params["wi"], params["bi"],
        params["wf"], params["bf"], params["g2"], params["be2"],
        wfc_row, params["bfc"],
    ]

    out = pl.pallas_call(
        functools.partial(gruattn_kernel, n_heads=nh, seq_len=S, batch=B,
                          batch_pad=Bp, hidden=H),
        out_shape=jax.ShapeDtypeStruct((B, S), jnp.float32),
        in_specs=[pl.BlockSpec(memory_space=pltpu.MemorySpace.VMEM)] * len(args),
        out_specs=pl.BlockSpec(memory_space=pltpu.MemorySpace.VMEM),
        scratch_shapes=[pltpu.VMEM((S * Bp, 3 * H), jnp.float32),   # gi (hoisted L0 input proj)
                        pltpu.VMEM((S * Bp, H), jnp.float32)],      # ho (time-major GRU out)
        compiler_params=pltpu.CompilerParams(vmem_limit_bytes=VMEM_LIMIT),
    )(*args)
    return out                                                       # (B, S)


# ---------------------------------------------------------------------------
# Deterministic synthetic parameter init (shapes from GRUATTN.__init__);
# canonical layouts: weights stored (in, out) so kernels compute x @ W + b.
# ---------------------------------------------------------------------------
def init_params(key, hidden_dim=32, dim_div=2, n_heads=2,
                n_test=20, n_question=30, n_tag=10):
    H = hidden_dim
    intd = H // dim_div
    keys = iter(jax.random.split(key, 40))

    def nrm(shape, scale):
        return jax.random.normal(next(keys), shape, jnp.float32) * scale

    p = {"hidden_dim": H, "n_heads": n_heads}
    # embeddings
    p["emb_interaction"] = nrm((3, intd), 1.0)
    p["emb_test"] = nrm((n_test + 1, intd), 1.0)
    p["emb_question"] = nrm((n_question + 1, intd), 1.0)
    p["emb_tag"] = nrm((n_tag + 1, intd), 1.0)
    # comb_proj: Linear(4*intd, H//2) + LayerNorm(H//2)
    p["w_comb"] = nrm((4 * intd, H // 2), (4 * intd) ** -0.5)
    p["b_comb"] = nrm((1, H // 2), 0.01)
    p["g_comb"] = jnp.ones((1, H // 2), jnp.float32)
    p["be_comb"] = jnp.zeros((1, H // 2), jnp.float32)
    # cont_proj: Linear(1, H//2) + LayerNorm(H//2)
    p["w_cont"] = nrm((1, H // 2), 1.0)
    p["b_cont"] = nrm((1, H // 2), 0.01)
    p["g_cont"] = jnp.ones((1, H // 2), jnp.float32)
    p["be_cont"] = jnp.zeros((1, H // 2), jnp.float32)
    # GRU (2 layers); weights stored (in, 3H), gate order [r, z, n]
    sc = H ** -0.5
    for l in range(2):
        p[f"w_ih{l}"] = nrm((H, 3 * H), sc)
        p[f"w_hh{l}"] = nrm((H, 3 * H), sc)
        p[f"b_ih{l}"] = nrm((1, 3 * H), sc)
        p[f"b_hh{l}"] = nrm((1, 3 * H), sc)
    # BERT encoder layer (hidden=H, intermediate=H) + final fc
    for nm in ("q", "k", "v", "o", "i", "f"):
        p[f"w{nm}"] = nrm((H, H), sc)
        p[f"b{nm}"] = nrm((1, H), 0.01)
    p["g1"] = jnp.ones((1, H), jnp.float32)
    p["be1"] = jnp.zeros((1, H), jnp.float32)
    p["g2"] = jnp.ones((1, H), jnp.float32)
    p["be2"] = jnp.zeros((1, H), jnp.float32)
    p["wfc"] = nrm((H, 1), sc)
    p["bfc"] = nrm((1, 1), 0.01)
    return p


if __name__ == "__main__":
    key = jax.random.PRNGKey(0)
    pkey, dkey = jax.random.split(key)

    B, S = 2, 8
    n_test, n_question, n_tag = 20, 30, 10
    params = init_params(pkey, hidden_dim=32, dim_div=2, n_heads=2,
                         n_test=n_test, n_question=n_question, n_tag=n_tag)

    ks = jax.random.split(dkey, 6)
    test = jax.random.randint(ks[0], (B, S), 0, n_test + 1)
    question = jax.random.randint(ks[1], (B, S), 0, n_question + 1)
    tag = jax.random.randint(ks[2], (B, S), 0, n_tag + 1)
    correct = jax.random.randint(ks[3], (B, S), 0, 2)
    interaction = jax.random.randint(ks[4], (B, S), 0, 3)
    elapsed = jax.random.uniform(ks[5], (B, S), jnp.float32)
    # padding mask: last 2 positions masked out
    mask = jnp.concatenate([jnp.ones((B, S - 2), jnp.float32),
                            jnp.zeros((B, 2), jnp.float32)], axis=1)

    out = gruattn_forward(params, test, question, tag, correct, mask,
                          interaction, elapsed)
    jax.block_until_ready(out)
    assert out.shape == (B, S) and out.dtype == jnp.float32
    assert bool(jnp.all(jnp.isfinite(out)))
    print("KERNEL_OK")
</pallas_src>

<mosaic_0001>
module attributes {stable_mosaic.version = 11 : i64} {
  func.func @gruattn_kernel(%arg0: memref<64x64xf32, #tpu.memory_space<vmem>>, %arg1: memref<64x1xf32, #tpu.memory_space<vmem>>, %arg2: memref<2x8xf32, #tpu.memory_space<vmem>>, %arg3: memref<64x16xf32, #tpu.memory_space<vmem>>, %arg4: memref<1x16xf32, #tpu.memory_space<vmem>>, %arg5: memref<1x16xf32, #tpu.memory_space<vmem>>, %arg6: memref<1x16xf32, #tpu.memory_space<vmem>>, %arg7: memref<1x16xf32, #tpu.memory_space<vmem>>, %arg8: memref<1x16xf32, #tpu.memory_space<vmem>>, %arg9: memref<1x16xf32, #tpu.memory_space<vmem>>, %arg10: memref<1x16xf32, #tpu.memory_space<vmem>>, %arg11: memref<32x96xf32, #tpu.memory_space<vmem>>, %arg12: memref<1x96xf32, #tpu.memory_space<vmem>>, %arg13: memref<32x96xf32, #tpu.memory_space<vmem>>, %arg14: memref<1x96xf32, #tpu.memory_space<vmem>>, %arg15: memref<64x128xf32, #tpu.memory_space<vmem>>, %arg16: memref<1x128xf32, #tpu.memory_space<vmem>>, %arg17: memref<32x32xf32, #tpu.memory_space<vmem>>, %arg18: memref<1x32xf32, #tpu.memory_space<vmem>>, %arg19: memref<32x32xf32, #tpu.memory_space<vmem>>, %arg20: memref<1x32xf32, #tpu.memory_space<vmem>>, %arg21: memref<32x32xf32, #tpu.memory_space<vmem>>, %arg22: memref<1x32xf32, #tpu.memory_space<vmem>>, %arg23: memref<32x32xf32, #tpu.memory_space<vmem>>, %arg24: memref<1x32xf32, #tpu.memory_space<vmem>>, %arg25: memref<1x32xf32, #tpu.memory_space<vmem>>, %arg26: memref<1x32xf32, #tpu.memory_space<vmem>>, %arg27: memref<32x32xf32, #tpu.memory_space<vmem>>, %arg28: memref<1x32xf32, #tpu.memory_space<vmem>>, %arg29: memref<32x32xf32, #tpu.memory_space<vmem>>, %arg30: memref<1x32xf32, #tpu.memory_space<vmem>>, %arg31: memref<1x32xf32, #tpu.memory_space<vmem>>, %arg32: memref<1x32xf32, #tpu.memory_space<vmem>>, %arg33: memref<1x32xf32, #tpu.memory_space<vmem>>, %arg34: memref<1x1xf32, #tpu.memory_space<vmem>>, %arg35: memref<2x8xf32, #tpu.memory_space<vmem>>, %arg36: memref<64x96xf32, #tpu.memory_space<vmem>>, %arg37: memref<64x32xf32, #tpu.memory_space<vmem>>) attributes {dimension_semantics = [], scalar_prefetch = 0 : i64, scratch_operands = 2 : i64, tpu.core_type = #tpu.core_type<tc>} {
    %c0 = arith.constant 0 : index
    %c0_0 = arith.constant 0 : index
    %0 = vector.load %arg0[%c0, %c0_0] : memref<64x64xf32, #tpu.memory_space<vmem>>, vector<64x64xf32>
    %c0_1 = arith.constant 0 : index
    %c0_2 = arith.constant 0 : index
    %1 = vector.load %arg3[%c0_1, %c0_2] : memref<64x16xf32, #tpu.memory_space<vmem>>, vector<64x16xf32>
    %cst = arith.constant dense<0.000000e+00> : vector<64x16xf32>
    %2 = tpu.matmul %0, %1, %cst {dimension_numbers = #tpu.dot_dimension_numbers<[1], [0], [0], [1], [0, 0, 1, 1], [], []>} : vector<64x64xf32>, vector<64x16xf32>, vector<64x16xf32> -> vector<64x16xf32>
    %c0_3 = arith.constant 0 : index
    %c0_4 = arith.constant 0 : index
    %3 = vector.load %arg4[%c0_3, %c0_4] : memref<1x16xf32, #tpu.memory_space<vmem>>, vector<1x16xf32>
    %4 = vector.broadcast %3 : vector<1x16xf32> to vector<64x16xf32>
    %5 = arith.addf %2, %4 : vector<64x16xf32>
    %c0_5 = arith.constant 0 : index
    %c0_6 = arith.constant 0 : index
    %6 = vector.load %arg5[%c0_5, %c0_6] : memref<1x16xf32, #tpu.memory_space<vmem>>, vector<1x16xf32>
    %c0_7 = arith.constant 0 : index
    %c0_8 = arith.constant 0 : index
    %7 = vector.load %arg6[%c0_7, %c0_8] : memref<1x16xf32, #tpu.memory_space<vmem>>, vector<1x16xf32>
    %cst_9 = arith.constant dense<0.000000e+00> : vector<64xf32>
    %8 = vector.multi_reduction <add>, %5, %cst_9 [1] : vector<64x16xf32> to vector<64xf32>
    %9 = vector.shape_cast %8 : vector<64xf32> to vector<64x1xf32>
    %cst_10 = arith.constant 1.600000e+01 : f32
    %10 = vector.broadcast %cst_10 : f32 to vector<64x1xf32>
    %11 = arith.divf %9, %10 : vector<64x1xf32>
    %12 = vector.broadcast %11 : vector<64x1xf32> to vector<64x16xf32>
    %13 = arith.subf %5, %12 : vector<64x16xf32>
    %14 = arith.mulf %13, %13 : vector<64x16xf32>
    %cst_11 = arith.constant dense<0.000000e+00> : vector<64xf32>
    %15 = vector.multi_reduction <add>, %14, %cst_11 [1] : vector<64x16xf32> to vector<64xf32>
    %16 = vector.shape_cast %15 : vector<64xf32> to vector<64x1xf32>
    %cst_12 = arith.constant 1.600000e+01 : f32
    %17 = vector.broadcast %cst_12 : f32 to vector<64x1xf32>
    %18 = arith.divf %16, %17 : vector<64x1xf32>
    %19 = vector.broadcast %11 : vector<64x1xf32> to vector<64x16xf32>
    %20 = arith.subf %5, %19 : vector<64x16xf32>
    %cst_13 = arith.constant 9.99999974E-6 : f32
    %21 = vector.broadcast %cst_13 : f32 to vector<64x1xf32>
    %22 = arith.addf %18, %21 : vector<64x1xf32>
    %23 = math.rsqrt %22 : vector<64x1xf32>
    %24 = vector.broadcast %23 : vector<64x1xf32> to vector<64x16xf32>
    %25 = arith.mulf %20, %24 : vector<64x16xf32>
    %26 = vector.broadcast %6 : vector<1x16xf32> to vector<64x16xf32>
    %27 = arith.mulf %25, %26 : vector<64x16xf32>
    %28 = vector.broadcast %7 : vector<1x16xf32> to vector<64x16xf32>
    %29 = arith.addf %27, %28 : vector<64x16xf32>
    %c0_14 = arith.constant 0 : index
    %c0_15 = arith.constant 0 : index
    %30 = vector.load %arg1[%c0_14, %c0_15] : memref<64x1xf32, #tpu.memory_space<vmem>>, vector<64x1xf32>
    %c0_16 = arith.constant 0 : index
    %c0_17 = arith.constant 0 : index
    %31 = vector.load %arg7[%c0_16, %c0_17] : memref<1x16xf32, #tpu.memory_space<vmem>>, vector<1x16xf32>
    %32 = vector.broadcast %30 : vector<64x1xf32> to vector<64x16xf32>
    %33 = vector.broadcast %31 : vector<1x16xf32> to vector<64x16xf32>
    %34 = arith.mulf %32, %33 : vector<64x16xf32>
    %c0_18 = arith.constant 0 : index
    %c0_19 = arith.constant 0 : index
    %35 = vector.load %arg8[%c0_18, %c0_19] : memref<1x16xf32, #tpu.memory_space<vmem>>, vector<1x16xf32>
    %36 = vector.broadcast %35 : vector<1x16xf32> to vector<64x16xf32>
    %37 = arith.addf %34, %36 : vector<64x16xf32>
    %c0_20 = arith.constant 0 : index
    %c0_21 = arith.constant 0 : index
    %38 = vector.load %arg9[%c0_20, %c0_21] : memref<1x16xf32, #tpu.memory_space<vmem>>, vector<1x16xf32>
    %c0_22 = arith.constant 0 : index
    %c0_23 = arith.constant 0 : index
    %39 = vector.load %arg10[%c0_22, %c0_23] : memref<1x16xf32, #tpu.memory_space<vmem>>, vector<1x16xf32>
    %cst_24 = arith.constant dense<0.000000e+00> : vector<64xf32>
    %40 = vector.multi_reduction <add>, %37, %cst_24 [1] : vector<64x16xf32> to vector<64xf32>
    %41 = vector.shape_cast %40 : vector<64xf32> to vector<64x1xf32>
    %cst_25 = arith.constant 1.600000e+01 : f32
    %42 = vector.broadcast %cst_25 : f32 to vector<64x1xf32>
    %43 = arith.divf %41, %42 : vector<64x1xf32>
    %44 = vector.broadcast %43 : vector<64x1xf32> to vector<64x16xf32>
    %45 = arith.subf %37, %44 : vector<64x16xf32>
    %46 = arith.mulf %45, %45 : vector<64x16xf32>
    %cst_26 = arith.constant dense<0.000000e+00> : vector<64xf32>
    %47 = vector.multi_reduction <add>, %46, %cst_26 [1] : vector<64x16xf32> to vector<64xf32>
    %48 = vector.shape_cast %47 : vector<64xf32> to vector<64x1xf32>
    %cst_27 = arith.constant 1.600000e+01 : f32
    %49 = vector.broadcast %cst_27 : f32 to vector<64x1xf32>
    %50 = arith.divf %48, %49 : vector<64x1xf32>
    %51 = vector.broadcast %43 : vector<64x1xf32> to vector<64x16xf32>
    %52 = arith.subf %37, %51 : vector<64x16xf32>
    %cst_28 = arith.constant 9.99999974E-6 : f32
    %53 = vector.broadcast %cst_28 : f32 to vector<64x1xf32>
    %54 = arith.addf %50, %53 : vector<64x1xf32>
    %55 = math.rsqrt %54 : vector<64x1xf32>
    %56 = vector.broadcast %55 : vector<64x1xf32> to vector<64x16xf32>
    %57 = arith.mulf %52, %56 : vector<64x16xf32>
    %58 = vector.broadcast %38 : vector<1x16xf32> to vector<64x16xf32>
    %59 = arith.mulf %57, %58 : vector<64x16xf32>
    %60 = vector.broadcast %39 : vector<1x16xf32> to vector<64x16xf32>
    %61 = arith.addf %59, %60 : vector<64x16xf32>
    %62 = tpu.concatenate %29, %61 in 1 : vector<64x16xf32>, vector<64x16xf32> -> vector<64x32xf32>
    %c0_29 = arith.constant 0 : index
    %c0_30 = arith.constant 0 : index
    %63 = vector.load %arg11[%c0_29, %c0_30] : memref<32x96xf32, #tpu.memory_space<vmem>>, vector<32x96xf32>
    %cst_31 = arith.constant dense<0.000000e+00> : vector<64x96xf32>
    %64 = tpu.matmul %62, %63, %cst_31 {dimension_numbers = #tpu.dot_dimension_numbers<[1], [0], [0], [1], [0, 0, 1, 1], [], []>} : vector<64x32xf32>, vector<32x96xf32>, vector<64x96xf32> -> vector<64x96xf32>
    %c0_32 = arith.constant 0 : index
    %c0_33 = arith.constant 0 : index
    %65 = vector.load %arg12[%c0_32, %c0_33] : memref<1x96xf32, #tpu.memory_space<vmem>>, vector<1x96xf32>
    %66 = vector.broadcast %65 : vector<1x96xf32> to vector<64x96xf32>
    %67 = arith.addf %64, %66 : vector<64x96xf32>
    %c0_34 = arith.constant 0 : index
    %c0_35 = arith.constant 0 : index
    %68 = vector.load %arg36[%c0_34, %c0_35] : memref<64x96xf32, #tpu.memory_space<vmem>>, vector<64x96xf32>
    tpu.vector_store %arg36[%c0_34, %c0_35], %67 {strides = array<i32>} : memref<64x96xf32, #tpu.memory_space<vmem>>, vector<64x96xf32>,
    %c0_36 = arith.constant 0 : index
    %c0_37 = arith.constant 0 : index
    %69 = vector.load %arg13[%c0_36, %c0_37] : memref<32x96xf32, #tpu.memory_space<vmem>>, vector<32x96xf32>
    %c0_38 = arith.constant 0 : index
    %c0_39 = arith.constant 0 : index
    %70 = vector.load %arg14[%c0_38, %c0_39] : memref<1x96xf32, #tpu.memory_space<vmem>>, vector<1x96xf32>
    %c0_40 = arith.constant 0 : index
    %c0_41 = arith.constant 0 : index
    %71 = vector.load %arg15[%c0_40, %c0_41] : memref<64x128xf32, #tpu.memory_space<vmem>>, vector<64x128xf32>
    %c0_42 = arith.constant 0 : index
    %c0_43 = arith.constant 0 : index
    %72 = vector.load %arg16[%c0_42, %c0_43] : memref<1x128xf32, #tpu.memory_space<vmem>>, vector<1x128xf32>
    %cst_44 = arith.constant 0.000000e+00 : f32
    %73 = vector.broadcast %cst_44 : f32 to vector<8x32xf32>
    %c0_i32 = arith.constant 0 : i32
    %c8_i32 = arith.constant 8 : i32
    %74 = arith.muli %c0_i32, %c8_i32 : i32
    %75 = tpu.assume_multiple %74, 8 : i32
    %76 = arith.index_cast %75 : i32 to index
    %c0_45 = arith.constant 0 : index
    %77 = vector.load %arg36[%76, %c0_45] : memref<64x96xf32, #tpu.memory_space<vmem>>, vector<8x96xf32>
    %cst_46 = arith.constant dense<0.000000e+00> : vector<8x96xf32>
    %78 = tpu.matmul %73, %69, %cst_46 {dimension_numbers = #tpu.dot_dimension_numbers<[1], [0], [0], [1], [0, 0, 1, 1], [], []>} : vector<8x32xf32>, vector<32x96xf32>, vector<8x96xf32> -> vector<8x96xf32>
    %79 = vector.broadcast %70 : vector<1x96xf32> to vector<8x96xf32>
    %80 = arith.addf %78, %79 : vector<8x96xf32>
    %81 = vector.extract_strided_slice %77 {offsets = [0, 0], sizes = [8, 32], strides = [1, 1]} : vector<8x96xf32> to vector<8x32xf32>
    %82 = vector.extract_strided_slice %80 {offsets = [0, 0], sizes = [8, 32], strides = [1, 1]} : vector<8x96xf32> to vector<8x32xf32>
    %83 = arith.addf %81, %82 : vector<8x32xf32>
    %84 = arith.negf %83 : vector<8x32xf32>
    %85 = math.exp %84 : vector<8x32xf32>
    %cst_47 = arith.constant 1.000000e+00 : f32
    %86 = vector.broadcast %cst_47 : f32 to vector<8x32xf32>
    %87 = arith.addf %86, %85 : vector<8x32xf32>
    %88 = arith.divf %86, %87 : vector<8x32xf32>
    %89 = vector.extract_strided_slice %77 {offsets = [0, 32], sizes = [8, 32], strides = [1, 1]} : vector<8x96xf32> to vector<8x32xf32>
    %90 = vector.extract_strided_slice %80 {offsets = [0, 32], sizes = [8, 32], strides = [1, 1]} : vector<8x96xf32> to vector<8x32xf32>
    %91 = arith.addf %89, %90 : vector<8x32xf32>
    %92 = arith.negf %91 : vector<8x32xf32>
    %93 = math.exp %92 : vector<8x32xf32>
    %cst_48 = arith.constant 1.000000e+00 : f32
    %94 = vector.broadcast %cst_48 : f32 to vector<8x32xf32>
    %95 = arith.addf %94, %93 : vector<8x32xf32>
    %96 = arith.divf %94, %95 : vector<8x32xf32>
    %97 = vector.extract_strided_slice %77 {offsets = [0, 64], sizes = [8, 32], strides = [1, 1]} : vector<8x96xf32> to vector<8x32xf32>
    %98 = vector.extract_strided_slice %80 {offsets = [0, 64], sizes = [8, 32], strides = [1, 1]} : vector<8x96xf32> to vector<8x32xf32>
    %99 = arith.mulf %88, %98 : vector<8x32xf32>
    %100 = arith.addf %97, %99 : vector<8x32xf32>
    %101 = math.tanh %100 : vector<8x32xf32>
    %cst_49 = arith.constant 1.000000e+00 : f32
    %102 = vector.broadcast %cst_49 : f32 to vector<8x32xf32>
    %103 = arith.subf %102, %96 : vector<8x32xf32>
    %104 = arith.mulf %103, %101 : vector<8x32xf32>
    %105 = arith.mulf %96, %73 : vector<8x32xf32>
    %106 = arith.addf %104, %105 : vector<8x32xf32>
    %107 = tpu.concatenate %106, %73 in 1 : vector<8x32xf32>, vector<8x32xf32> -> vector<8x64xf32>
    %cst_50 = arith.constant dense<0.000000e+00> : vector<8x128xf32>
    %108 = tpu.matmul %107, %71, %cst_50 {dimension_numbers = #tpu.dot_dimension_numbers<[1], [0], [0], [1], [0, 0, 1, 1], [], []>} : vector<8x64xf32>, vector<64x128xf32>, vector<8x128xf32> -> vector<8x128xf32>
    %109 = vector.broadcast %72 : vector<1x128xf32> to vector<8x128xf32>
    %110 = arith.addf %108, %109 : vector<8x128xf32>
    %111 = vector.extract_strided_slice %110 {offsets = [0, 0], sizes = [8, 32], strides = [1, 1]} : vector<8x128xf32> to vector<8x32xf32>
    %112 = arith.negf %111 : vector<8x32xf32>
    %113 = math.exp %112 : vector<8x32xf32>
    %cst_51 = arith.constant 1.000000e+00 : f32
    %114 = vector.broadcast %cst_51 : f32 to vector<8x32xf32>
    %115 = arith.addf %114, %113 : vector<8x32xf32>
    %116 = arith.divf %114, %115 : vector<8x32xf32>
    %117 = vector.extract_strided_slice %110 {offsets = [0, 32], sizes = [8, 32], strides = [1, 1]} : vector<8x128xf32> to vector<8x32xf32>
    %118 = arith.negf %117 : vector<8x32xf32>
    %119 = math.exp %118 : vector<8x32xf32>
    %cst_52 = arith.constant 1.000000e+00 : f32
    %120 = vector.broadcast %cst_52 : f32 to vector<8x32xf32>
    %121 = arith.addf %120, %119 : vector<8x32xf32>
    %122 = arith.divf %120, %121 : vector<8x32xf32>
    %123 = vector.extract_strided_slice %110 {offsets = [0, 64], sizes = [8, 32], strides = [1, 1]} : vector<8x128xf32> to vector<8x32xf32>
    %124 = vector.extract_strided_slice %110 {offsets = [0, 96], sizes = [8, 32], strides = [1, 1]} : vector<8x128xf32> to vector<8x32xf32>
    %125 = arith.mulf %116, %124 : vector<8x32xf32>
    %126 = arith.addf %123, %125 : vector<8x32xf32>
    %127 = math.tanh %126 : vector<8x32xf32>
    %cst_53 = arith.constant 1.000000e+00 : f32
    %128 = vector.broadcast %cst_53 : f32 to vector<8x32xf32>
    %129 = arith.subf %128, %122 : vector<8x32xf32>
    %130 = arith.mulf %129, %127 : vector<8x32xf32>
    %131 = arith.mulf %122, %73 : vector<8x32xf32>
    %132 = arith.addf %130, %131 : vector<8x32xf32>
    %133 = arith.index_cast %75 : i32 to index
    %c0_54 = arith.constant 0 : index
    %134 = vector.load %arg37[%133, %c0_54] : memref<64x32xf32, #tpu.memory_space<vmem>>, vector<8x32xf32>
    tpu.vector_store %arg37[%133, %c0_54], %132 {strides = array<i32>} : memref<64x32xf32, #tpu.memory_space<vmem>>, vector<8x32xf32>,
    %c1_i32 = arith.constant 1 : i32
    %c8_i32_55 = arith.constant 8 : i32
    %135 = arith.muli %c1_i32, %c8_i32_55 : i32
    %136 = tpu.assume_multiple %135, 8 : i32
    %137 = arith.index_cast %136 : i32 to index
    %c0_56 = arith.constant 0 : index
    %138 = vector.load %arg36[%137, %c0_56] : memref<64x96xf32, #tpu.memory_space<vmem>>, vector<8x96xf32>
    %cst_57 = arith.constant dense<0.000000e+00> : vector<8x96xf32>
    %139 = tpu.matmul %106, %69, %cst_57 {dimension_numbers = #tpu.dot_dimension_numbers<[1], [0], [0], [1], [0, 0, 1, 1], [], []>} : vector<8x32xf32>, vector<32x96xf32>, vector<8x96xf32> -> vector<8x96xf32>
    %140 = vector.broadcast %70 : vector<1x96xf32> to vector<8x96xf32>
    %141 = arith.addf %139, %140 : vector<8x96xf32>
    %142 = vector.extract_strided_slice %138 {offsets = [0, 0], sizes = [8, 32], strides = [1, 1]} : vector<8x96xf32> to vector<8x32xf32>
    %143 = vector.extract_strided_slice %141 {offsets = [0, 0], sizes = [8, 32], strides = [1, 1]} : vector<8x96xf32> to vector<8x32xf32>
    %144 = arith.addf %142, %143 : vector<8x32xf32>
    %145 = arith.negf %144 : vector<8x32xf32>
    %146 = math.exp %145 : vector<8x32xf32>
    %cst_58 = arith.constant 1.000000e+00 : f32
    %147 = vector.broadcast %cst_58 : f32 to vector<8x32xf32>
    %148 = arith.addf %147, %146 : vector<8x32xf32>
    %149 = arith.divf %147, %148 : vector<8x32xf32>
    %150 = vector.extract_strided_slice %138 {offsets = [0, 32], sizes = [8, 32], strides = [1, 1]} : vector<8x96xf32> to vector<8x32xf32>
    %151 = vector.extract_strided_slice %141 {offsets = [0, 32], sizes = [8, 32], strides = [1, 1]} : vector<8x96xf32> to vector<8x32xf32>
    %152 = arith.addf %150, %151 : vector<8x32xf32>
    %153 = arith.negf %152 : vector<8x32xf32>
    %154 = math.exp %153 : vector<8x32xf32>
    %cst_59 = arith.constant 1.000000e+00 : f32
    %155 = vector.broadcast %cst_59 : f32 to vector<8x32xf32>
    %156 = arith.addf %155, %154 : vector<8x32xf32>
    %157 = arith.divf %155, %156 : vector<8x32xf32>
    %158 = vector.extract_strided_slice %138 {offsets = [0, 64], sizes = [8, 32], strides = [1, 1]} : vector<8x96xf32> to vector<8x32xf32>
    %159 = vector.extract_strided_slice %141 {offsets = [0, 64], sizes = [8, 32], strides = [1, 1]} : vector<8x96xf32> to vector<8x32xf32>
    %160 = arith.mulf %149, %159 : vector<8x32xf32>
    %161 = arith.addf %158, %160 : vector<8x32xf32>
    %162 = math.tanh %161 : vector<8x32xf32>
    %cst_60 = arith.constant 1.000000e+00 : f32
    %163 = vector.broadcast %cst_60 : f32 to vector<8x32xf32>
    %164 = arith.subf %163, %157 : vector<8x32xf32>
    %165 = arith.mulf %164, %162 : vector<8x32xf32>
    %166 = arith.mulf %157, %106 : vector<8x32xf32>
    %167 = arith.addf %165, %166 : vector<8x32xf32>
    %168 = tpu.concatenate %167, %132 in 1 : vector<8x32xf32>, vector<8x32xf32> -> vector<8x64xf32>
    %cst_61 = arith.constant dense<0.000000e+00> : vector<8x128xf32>
    %169 = tpu.matmul %168, %71, %cst_61 {dimension_numbers = #tpu.dot_dimension_numbers<[1], [0], [0], [1], [0, 0, 1, 1], [], []>} : vector<8x64xf32>, vector<64x128xf32>, vector<8x128xf32> -> vector<8x128xf32>
    %170 = vector.broadcast %72 : vector<1x128xf32> to vector<8x128xf32>
    %171 = arith.addf %169, %170 : vector<8x128xf32>
    %172 = vector.extract_strided_slice %171 {offsets = [0, 0], sizes = [8, 32], strides = [1, 1]} : vector<8x128xf32> to vector<8x32xf32>
    %173 = arith.negf %172 : vector<8x32xf32>
    %174 = math.exp %173 : vector<8x32xf32>
    %cst_62 = arith.constant 1.000000e+00 : f32
    %175 = vector.broadcast %cst_62 : f32 to vector<8x32xf32>
    %176 = arith.addf %175, %174 : vector<8x32xf32>
    %177 = arith.divf %175, %176 : vector<8x32xf32>
    %178 = vector.extract_strided_slice %171 {offsets = [0, 32], sizes = [8, 32], strides = [1, 1]} : vector<8x128xf32> to vector<8x32xf32>
    %179 = arith.negf %178 : vector<8x32xf32>
    %180 = math.exp %179 : vector<8x32xf32>
    %cst_63 = arith.constant 1.000000e+00 : f32
    %181 = vector.broadcast %cst_63 : f32 to vector<8x32xf32>
    %182 = arith.addf %181, %180 : vector<8x32xf32>
    %183 = arith.divf %181, %182 : vector<8x32xf32>
    %184 = vector.extract_strided_slice %171 {offsets = [0, 64], sizes = [8, 32], strides = [1, 1]} : vector<8x128xf32> to vector<8x32xf32>
    %185 = vector.extract_strided_slice %171 {offsets = [0, 96], sizes = [8, 32], strides = [1, 1]} : vector<8x128xf32> to vector<8x32xf32>
    %186 = arith.mulf %177, %185 : vector<8x32xf32>
    %187 = arith.addf %184, %186 : vector<8x32xf32>
    %188 = math.tanh %187 : vector<8x32xf32>
    %cst_64 = arith.constant 1.000000e+00 : f32
    %189 = vector.broadcast %cst_64 : f32 to vector<8x32xf32>
    %190 = arith.subf %189, %183 : vector<8x32xf32>
    %191 = arith.mulf %190, %188 : vector<8x32xf32>
    %192 = arith.mulf %183, %132 : vector<8x32xf32>
    %193 = arith.addf %191, %192 : vector<8x32xf32>
    %194 = arith.index_cast %136 : i32 to index
    %c0_65 = arith.constant 0 : index
    %195 = vector.load %arg37[%194, %c0_65] : memref<64x32xf32, #tpu.memory_space<vmem>>, vector<8x32xf32>
    tpu.vector_store %arg37[%194, %c0_65], %193 {strides = array<i32>} : memref<64x32xf32, #tpu.memory_space<vmem>>, vector<8x32xf32>,
    %c2_i32 = arith.constant 2 : i32
    %c8_i32_66 = arith.constant 8 : i32
    %196 = arith.muli %c2_i32, %c8_i32_66 : i32
    %197 = tpu.assume_multiple %196, 8 : i32
    %198 = arith.index_cast %197 : i32 to index
    %c0_67 = arith.constant 0 : index
    %199 = vector.load %arg36[%198, %c0_67] : memref<64x96xf32, #tpu.memory_space<vmem>>, vector<8x96xf32>
    %cst_68 = arith.constant dense<0.000000e+00> : vector<8x96xf32>
    %200 = tpu.matmul %167, %69, %cst_68 {dimension_numbers = #tpu.dot_dimension_numbers<[1], [0], [0], [1], [0, 0, 1, 1], [], []>} : vector<8x32xf32>, vector<32x96xf32>, vector<8x96xf32> -> vector<8x96xf32>
    %201 = vector.broadcast %70 : vector<1x96xf32> to vector<8x96xf32>
    %202 = arith.addf %200, %201 : vector<8x96xf32>
    %203 = vector.extract_strided_slice %199 {offsets = [0, 0], sizes = [8, 32], strides = [1, 1]} : vector<8x96xf32> to vector<8x32xf32>
    %204 = vector.extract_strided_slice %202 {offsets = [0, 0], sizes = [8, 32], strides = [1, 1]} : vector<8x96xf32> to vector<8x32xf32>
    %205 = arith.addf %203, %204 : vector<8x32xf32>
    %206 = arith.negf %205 : vector<8x32xf32>
    %207 = math.exp %206 : vector<8x32xf32>
    %cst_69 = arith.constant 1.000000e+00 : f32
    %208 = vector.broadcast %cst_69 : f32 to vector<8x32xf32>
    %209 = arith.addf %208, %207 : vector<8x32xf32>
    %210 = arith.divf %208, %209 : vector<8x32xf32>
    %211 = vector.extract_strided_slice %199 {offsets = [0, 32], sizes = [8, 32], strides = [1, 1]} : vector<8x96xf32> to vector<8x32xf32>
    %212 = vector.extract_strided_slice %202 {offsets = [0, 32], sizes = [8, 32], strides = [1, 1]} : vector<8x96xf32> to vector<8x32xf32>
    %213 = arith.addf %211, %212 : vector<8x32xf32>
    %214 = arith.negf %213 : vector<8x32xf32>
    %215 = math.exp %214 : vector<8x32xf32>
    %cst_70 = arith.constant 1.000000e+00 : f32
    %216 = vector.broadcast %cst_70 : f32 to vector<8x32xf32>
    %217 = arith.addf %216, %215 : vector<8x32xf32>
    %218 = arith.divf %216, %217 : vector<8x32xf32>
    %219 = vector.extract_strided_slice %199 {offsets = [0, 64], sizes = [8, 32], strides = [1, 1]} : vector<8x96xf32> to vector<8x32xf32>
    %220 = vector.extract_strided_slice %202 {offsets = [0, 64], sizes = [8, 32], strides = [1, 1]} : vector<8x96xf32> to vector<8x32xf32>
    %221 = arith.mulf %210, %220 : vector<8x32xf32>
    %222 = arith.addf %219, %221 : vector<8x32xf32>
    %223 = math.tanh %222 : vector<8x32xf32>
    %cst_71 = arith.constant 1.000000e+00 : f32
    %224 = vector.broadcast %cst_71 : f32 to vector<8x32xf32>
    %225 = arith.subf %224, %218 : vector<8x32xf32>
    %226 = arith.mulf %225, %223 : vector<8x32xf32>
    %227 = arith.mulf %218, %167 : vector<8x32xf32>
    %228 = arith.addf %226, %227 : vector<8x32xf32>
    %229 = tpu.concatenate %228, %193 in 1 : vector<8x32xf32>, vector<8x32xf32> -> vector<8x64xf32>
    %cst_72 = arith.constant dense<0.000000e+00> : vector<8x128xf32>
    %230 = tpu.matmul %229, %71, %cst_72 {dimension_numbers = #tpu.dot_dimension_numbers<[1], [0], [0], [1], [0, 0, 1, 1], [], []>} : vector<8x64xf32>, vector<64x128xf32>, vector<8x128xf32> -> vector<8x128xf32>
    %231 = vector.broadcast %72 : vector<1x128xf32> to vector<8x128xf32>
    %232 = arith.addf %230, %231 : vector<8x128xf32>
    %233 = vector.extract_strided_slice %232 {offsets = [0, 0], sizes = [8, 32], strides = [1, 1]} : vector<8x128xf32> to vector<8x32xf32>
    %234 = arith.negf %233 : vector<8x32xf32>
    %235 = math.exp %234 : vector<8x32xf32>
    %cst_73 = arith.constant 1.000000e+00 : f32
    %236 = vector.broadcast %cst_73 : f32 to vector<8x32xf32>
    %237 = arith.addf %236, %235 : vector<8x32xf32>
    %238 = arith.divf %236, %237 : vector<8x32xf32>
    %239 = vector.extract_strided_slice %232 {offsets = [0, 32], sizes = [8, 32], strides = [1, 1]} : vector<8x128xf32> to vector<8x32xf32>
    %240 = arith.negf %239 : vector<8x32xf32>
    %241 = math.exp %240 : vector<8x32xf32>
    %cst_74 = arith.constant 1.000000e+00 : f32
    %242 = vector.broadcast %cst_74 : f32 to vector<8x32xf32>
    %243 = arith.addf %242, %241 : vector<8x32xf32>
    %244 = arith.divf %242, %243 : vector<8x32xf32>
    %245 = vector.extract_strided_slice %232 {offsets = [0, 64], sizes = [8, 32], strides = [1, 1]} : vector<8x128xf32> to vector<8x32xf32>
    %246 = vector.extract_strided_slice %232 {offsets = [0, 96], sizes = [8, 32], strides = [1, 1]} : vector<8x128xf32> to vector<8x32xf32>
    %247 = arith.mulf %238, %246 : vector<8x32xf32>
    %248 = arith.addf %245, %247 : vector<8x32xf32>
    %249 = math.tanh %248 : vector<8x32xf32>
    %cst_75 = arith.constant 1.000000e+00 : f32
    %250 = vector.broadcast %cst_75 : f32 to vector<8x32xf32>
    %251 = arith.subf %250, %244 : vector<8x32xf32>
    %252 = arith.mulf %251, %249 : vector<8x32xf32>
    %253 = arith.mulf %244, %193 : vector<8x32xf32>
    %254 = arith.addf %252, %253 : vector<8x32xf32>
    %255 = arith.index_cast %197 : i32 to index
    %c0_76 = arith.constant 0 : index
    %256 = vector.load %arg37[%255, %c0_76] : memref<64x32xf32, #tpu.memory_space<vmem>>, vector<8x32xf32>
    tpu.vector_store %arg37[%255, %c0_76], %254 {strides = array<i32>} : memref<64x32xf32, #tpu.memory_space<vmem>>, vector<8x32xf32>,
    %c3_i32 = arith.constant 3 : i32
    %c8_i32_77 = arith.constant 8 : i32
    %257 = arith.muli %c3_i32, %c8_i32_77 : i32
    %258 = tpu.assume_multiple %257, 8 : i32
    %259 = arith.index_cast %258 : i32 to index
    %c0_78 = arith.constant 0 : index
    %260 = vector.load %arg36[%259, %c0_78] : memref<64x96xf32, #tpu.memory_space<vmem>>, vector<8x96xf32>
    %cst_79 = arith.constant dense<0.000000e+00> : vector<8x96xf32>
    %261 = tpu.matmul %228, %69, %cst_79 {dimension_numbers = #tpu.dot_dimension_numbers<[1], [0], [0], [1], [0, 0, 1, 1], [], []>} : vector<8x32xf32>, vector<32x96xf32>, vector<8x96xf32> -> vector<8x96xf32>
    %262 = vector.broadcast %70 : vector<1x96xf32> to vector<8x96xf32>
    %263 = arith.addf %261, %262 : vector<8x96xf32>
    %264 = vector.extract_strided_slice %260 {offsets = [0, 0], sizes = [8, 32], strides = [1, 1]} : vector<8x96xf32> to vector<8x32xf32>
    %265 = vector.extract_strided_slice %263 {offsets = [0, 0], sizes = [8, 32], strides = [1, 1]} : vector<8x96xf32> to vector<8x32xf32>
    %266 = arith.addf %264, %265 : vector<8x32xf32>
    %267 = arith.negf %266 : vector<8x32xf32>
    %268 = math.exp %267 : vector<8x32xf32>
    %cst_80 = arith.constant 1.000000e+00 : f32
    %269 = vector.broadcast %cst_80 : f32 to vector<8x32xf32>
    %270 = arith.addf %269, %268 : vector<8x32xf32>
    %271 = arith.divf %269, %270 : vector<8x32xf32>
    %272 = vector.extract_strided_slice %260 {offsets = [0, 32], sizes = [8, 32], strides = [1, 1]} : vector<8x96xf32> to vector<8x32xf32>
    %273 = vector.extract_strided_slice %263 {offsets = [0, 32], sizes = [8, 32], strides = [1, 1]} : vector<8x96xf32> to vector<8x32xf32>
    %274 = arith.addf %272, %273 : vector<8x32xf32>
    %275 = arith.negf %274 : vector<8x32xf32>
    %276 = math.exp %275 : vector<8x32xf32>
    %cst_81 = arith.constant 1.000000e+00 : f32
    %277 = vector.broadcast %cst_81 : f32 to vector<8x32xf32>
    %278 = arith.addf %277, %276 : vector<8x32xf32>
    %279 = arith.divf %277, %278 : vector<8x32xf32>
    %280 = vector.extract_strided_slice %260 {offsets = [0, 64], sizes = [8, 32], strides = [1, 1]} : vector<8x96xf32> to vector<8x32xf32>
    %281 = vector.extract_strided_slice %263 {offsets = [0, 64], sizes = [8, 32], strides = [1, 1]} : vector<8x96xf32> to vector<8x32xf32>
    %282 = arith.mulf %271, %281 : vector<8x32xf32>
    %283 = arith.addf %280, %282 : vector<8x32xf32>
    %284 = math.tanh %283 : vector<8x32xf32>
    %cst_82 = arith.constant 1.000000e+00 : f32
    %285 = vector.broadcast %cst_82 : f32 to vector<8x32xf32>
    %286 = arith.subf %285, %279 : vector<8x32xf32>
    %287 = arith.mulf %286, %284 : vector<8x32xf32>
    %288 = arith.mulf %279, %228 : vector<8x32xf32>
    %289 = arith.addf %287, %288 : vector<8x32xf32>
    %290 = tpu.concatenate %289, %254 in 1 : vector<8x32xf32>, vector<8x32xf32> -> vector<8x64xf32>
    %cst_83 = arith.constant dense<0.000000e+00> : vector<8x128xf32>
    %291 = tpu.matmul %290, %71, %cst_83 {dimension_numbers = #tpu.dot_dimension_numbers<[1], [0], [0], [1], [0, 0, 1, 1], [], []>} : vector<8x64xf32>, vector<64x128xf32>, vector<8x128xf32> -> vector<8x128xf32>
    %292 = vector.broadcast %72 : vector<1x128xf32> to vector<8x128xf32>
    %293 = arith.addf %291, %292 : vector<8x128xf32>
    %294 = vector.extract_strided_slice %293 {offsets = [0, 0], sizes = [8, 32], strides = [1, 1]} : vector<8x128xf32> to vector<8x32xf32>
    %295 = arith.negf %294 : vector<8x32xf32>
    %296 = math.exp %295 : vector<8x32xf32>
    %cst_84 = arith.constant 1.000000e+00 : f32
    %297 = vector.broadcast %cst_84 : f32 to vector<8x32xf32>
    %298 = arith.addf %297, %296 : vector<8x32xf32>
    %299 = arith.divf %297, %298 : vector<8x32xf32>
    %300 = vector.extract_strided_slice %293 {offsets = [0, 32], sizes = [8, 32], strides = [1, 1]} : vector<8x128xf32> to vector<8x32xf32>
    %301 = arith.negf %300 : vector<8x32xf32>
    %302 = math.exp %301 : vector<8x32xf32>
    %cst_85 = arith.constant 1.000000e+00 : f32
    %303 = vector.broadcast %cst_85 : f32 to vector<8x32xf32>
    %304 = arith.addf %303, %302 : vector<8x32xf32>
    %305 = arith.divf %303, %304 : vector<8x32xf32>
    %306 = vector.extract_strided_slice %293 {offsets = [0, 64], sizes = [8, 32], strides = [1, 1]} : vector<8x128xf32> to vector<8x32xf32>
    %307 = vector.extract_strided_slice %293 {offsets = [0, 96], sizes = [8, 32], strides = [1, 1]} : vector<8x128xf32> to vector<8x32xf32>
    %308 = arith.mulf %299, %307 : vector<8x32xf32>
    %309 = arith.addf %306, %308 : vector<8x32xf32>
    %310 = math.tanh %309 : vector<8x32xf32>
    %cst_86 = arith.constant 1.000000e+00 : f32
    %311 = vector.broadcast %cst_86 : f32 to vector<8x32xf32>
    %312 = arith.subf %311, %305 : vector<8x32xf32>
    %313 = arith.mulf %312, %310 : vector<8x32xf32>
    %314 = arith.mulf %305, %254 : vector<8x32xf32>
    %315 = arith.addf %313, %314 : vector<8x32xf32>
    %316 = arith.index_cast %258 : i32 to index
    %c0_87 = arith.constant 0 : index
    %317 = vector.load %arg37[%316, %c0_87] : memref<64x32xf32, #tpu.memory_space<vmem>>, vector<8x32xf32>
    tpu.vector_store %arg37[%316, %c0_87], %315 {strides = array<i32>} : memref<64x32xf32, #tpu.memory_space<vmem>>, vector<8x32xf32>,
    %c4_i32 = arith.constant 4 : i32
    %c8_i32_88 = arith.constant 8 : i32
    %318 = arith.muli %c4_i32, %c8_i32_88 : i32
    %319 = tpu.assume_multiple %318, 8 : i32
    %320 = arith.index_cast %319 : i32 to index
    %c0_89 = arith.constant 0 : index
    %321 = vector.load %arg36[%320, %c0_89] : memref<64x96xf32, #tpu.memory_space<vmem>>, vector<8x96xf32>
    %cst_90 = arith.constant dense<0.000000e+00> : vector<8x96xf32>
    %322 = tpu.matmul %289, %69, %cst_90 {dimension_numbers = #tpu.dot_dimension_numbers<[1], [0], [0], [1], [0, 0, 1, 1], [], []>} : vector<8x32xf32>, vector<32x96xf32>, vector<8x96xf32> -> vector<8x96xf32>
    %323 = vector.broadcast %70 : vector<1x96xf32> to vector<8x96xf32>
    %324 = arith.addf %322, %323 : vector<8x96xf32>
    %325 = vector.extract_strided_slice %321 {offsets = [0, 0], sizes = [8, 32], strides = [1, 1]} : vector<8x96xf32> to vector<8x32xf32>
    %326 = vector.extract_strided_slice %324 {offsets = [0, 0], sizes = [8, 32], strides = [1, 1]} : vector<8x96xf32> to vector<8x32xf32>
    %327 = arith.addf %325, %326 : vector<8x32xf32>
    %328 = arith.negf %327 : vector<8x32xf32>
    %329 = math.exp %328 : vector<8x32xf32>
    %cst_91 = arith.constant 1.000000e+00 : f32
    %330 = vector.broadcast %cst_91 : f32 to vector<8x32xf32>
    %331 = arith.addf %330, %329 : vector<8x32xf32>
    %332 = arith.divf %330, %331 : vector<8x32xf32>
    %333 = vector.extract_strided_slice %321 {offsets = [0, 32], sizes = [8, 32], strides = [1, 1]} : vector<8x96xf32> to vector<8x32xf32>
    %334 = vector.extract_strided_slice %324 {offsets = [0, 32], sizes = [8, 32], strides = [1, 1]} : vector<8x96xf32> to vector<8x32xf32>
    %335 = arith.addf %333, %334 : vector<8x32xf32>
    %336 = arith.negf %335 : vector<8x32xf32>
    %337 = math.exp %336 : vector<8x32xf32>
    %cst_92 = arith.constant 1.000000e+00 : f32
    %338 = vector.broadcast %cst_92 : f32 to vector<8x32xf32>
    %339 = arith.addf %338, %337 : vector<8x32xf32>
    %340 = arith.divf %338, %339 : vector<8x32xf32>
    %341 = vector.extract_strided_slice %321 {offsets = [0, 64], sizes = [8, 32], strides = [1, 1]} : vector<8x96xf32> to vector<8x32xf32>
    %342 = vector.extract_strided_slice %324 {offsets = [0, 64], sizes = [8, 32], strides = [1, 1]} : vector<8x96xf32> to vector<8x32xf32>
    %343 = arith.mulf %332, %342 : vector<8x32xf32>
    %344 = arith.addf %341, %343 : vector<8x32xf32>
    %345 = math.tanh %344 : vector<8x32xf32>
    %cst_93 = arith.constant 1.000000e+00 : f32
    %346 = vector.broadcast %cst_93 : f32 to vector<8x32xf32>
    %347 = arith.subf %346, %340 : vector<8x32xf32>
    %348 = arith.mulf %347, %345 : vector<8x32xf32>
    %349 = arith.mulf %340, %289 : vector<8x32xf32>
    %350 = arith.addf %348, %349 : vector<8x32xf32>
    %351 = tpu.concatenate %350, %315 in 1 : vector<8x32xf32>, vector<8x32xf32> -> vector<8x64xf32>
    %cst_94 = arith.constant dense<0.000000e+00> : vector<8x128xf32>
    %352 = tpu.matmul %351, %71, %cst_94 {dimension_numbers = #tpu.dot_dimension_numbers<[1], [0], [0], [1], [0, 0, 1, 1], [], []>} : vector<8x64xf32>, vector<64x128xf32>, vector<8x128xf32> -> vector<8x128xf32>
    %353 = vector.broadcast %72 : vector<1x128xf32> to vector<8x128xf32>
    %354 = arith.addf %352, %353 : vector<8x128xf32>
    %355 = vector.extract_strided_slice %354 {offsets = [0, 0], sizes = [8, 32], strides = [1, 1]} : vector<8x128xf32> to vector<8x32xf32>
    %356 = arith.negf %355 : vector<8x32xf32>
    %357 = math.exp %356 : vector<8x32xf32>
    %cst_95 = arith.constant 1.000000e+00 : f32
    %358 = vector.broadcast %cst_95 : f32 to vector<8x32xf32>
    %359 = arith.addf %358, %357 : vector<8x32xf32>
    %360 = arith.divf %358, %359 : vector<8x32xf32>
    %361 = vector.extract_strided_slice %354 {offsets = [0, 32], sizes = [8, 32], strides = [1, 1]} : vector<8x128xf32> to vector<8x32xf32>
    %362 = arith.negf %361 : vector<8x32xf32>
    %363 = math.exp %362 : vector<8x32xf32>
    %cst_96 = arith.constant 1.000000e+00 : f32
    %364 = vector.broadcast %cst_96 : f32 to vector<8x32xf32>
    %365 = arith.addf %364, %363 : vector<8x32xf32>
    %366 = arith.divf %364, %365 : vector<8x32xf32>
    %367 = vector.extract_strided_slice %354 {offsets = [0, 64], sizes = [8, 32], strides = [1, 1]} : vector<8x128xf32> to vector<8x32xf32>
    %368 = vector.extract_strided_slice %354 {offsets = [0, 96], sizes = [8, 32], strides = [1, 1]} : vector<8x128xf32> to vector<8x32xf32>
    %369 = arith.mulf %360, %368 : vector<8x32xf32>
    %370 = arith.addf %367, %369 : vector<8x32xf32>
    %371 = math.tanh %370 : vector<8x32xf32>
    %cst_97 = arith.constant 1.000000e+00 : f32
    %372 = vector.broadcast %cst_97 : f32 to vector<8x32xf32>
    %373 = arith.subf %372, %366 : vector<8x32xf32>
    %374 = arith.mulf %373, %371 : vector<8x32xf32>
    %375 = arith.mulf %366, %315 : vector<8x32xf32>
    %376 = arith.addf %374, %375 : vector<8x32xf32>
    %377 = arith.index_cast %319 : i32 to index
    %c0_98 = arith.constant 0 : index
    %378 = vector.load %arg37[%377, %c0_98] : memref<64x32xf32, #tpu.memory_space<vmem>>, vector<8x32xf32>
    tpu.vector_store %arg37[%377, %c0_98], %376 {strides = array<i32>} : memref<64x32xf32, #tpu.memory_space<vmem>>, vector<8x32xf32>,
    %c5_i32 = arith.constant 5 : i32
    %c8_i32_99 = arith.constant 8 : i32
    %379 = arith.muli %c5_i32, %c8_i32_99 : i32
    %380 = tpu.assume_multiple %379, 8 : i32
    %381 = arith.index_cast %380 : i32 to index
    %c0_100 = arith.constant 0 : index
    %382 = vector.load %arg36[%381, %c0_100] : memref<64x96xf32, #tpu.memory_space<vmem>>, vector<8x96xf32>
    %cst_101 = arith.constant dense<0.000000e+00> : vector<8x96xf32>
    %383 = tpu.matmul %350, %69, %cst_101 {dimension_numbers = #tpu.dot_dimension_numbers<[1], [0], [0], [1], [0, 0, 1, 1], [], []>} : vector<8x32xf32>, vector<32x96xf32>, vector<8x96xf32> -> vector<8x96xf32>
    %384 = vector.broadcast %70 : vector<1x96xf32> to vector<8x96xf32>
    %385 = arith.addf %383, %384 : vector<8x96xf32>
    %386 = vector.extract_strided_slice %382 {offsets = [0, 0], sizes = [8, 32], strides = [1, 1]} : vector<8x96xf32> to vector<8x32xf32>
    %387 = vector.extract_strided_slice %385 {offsets = [0, 0], sizes = [8, 32], strides = [1, 1]} : vector<8x96xf32> to vector<8x32xf32>
    %388 = arith.addf %386, %387 : vector<8x32xf32>
    %389 = arith.negf %388 : vector<8x32xf32>
    %390 = math.exp %389 : vector<8x32xf32>
    %cst_102 = arith.constant 1.000000e+00 : f32
    %391 = vector.broadcast %cst_102 : f32 to vector<8x32xf32>
    %392 = arith.addf %391, %390 : vector<8x32xf32>
    %393 = arith.divf %391, %392 : vector<8x32xf32>
    %394 = vector.extract_strided_slice %382 {offsets = [0, 32], sizes = [8, 32], strides = [1, 1]} : vector<8x96xf32> to vector<8x32xf32>
    %395 = vector.extract_strided_slice %385 {offsets = [0, 32], sizes = [8, 32], strides = [1, 1]} : vector<8x96xf32> to vector<8x32xf32>
    %396 = arith.addf %394, %395 : vector<8x32xf32>
    %397 = arith.negf %396 : vector<8x32xf32>
    %398 = math.exp %397 : vector<8x32xf32>
    %cst_103 = arith.constant 1.000000e+00 : f32
    %399 = vector.broadcast %cst_103 : f32 to vector<8x32xf32>
    %400 = arith.addf %399, %398 : vector<8x32xf32>
    %401 = arith.divf %399, %400 : vector<8x32xf32>
    %402 = vector.extract_strided_slice %382 {offsets = [0, 64], sizes = [8, 32], strides = [1, 1]} : vector<8x96xf32> to vector<8x32xf32>
    %403 = vector.extract_strided_slice %385 {offsets = [0, 64], sizes = [8, 32], strides = [1, 1]} : vector<8x96xf32> to vector<8x32xf32>
    %404 = arith.mulf %393, %403 : vector<8x32xf32>
    %405 = arith.addf %402, %404 : vector<8x32xf32>
    %406 = math.tanh %405 : vector<8x32xf32>
    %cst_104 = arith.constant 1.000000e+00 : f32
    %407 = vector.broadcast %cst_104 : f32 to vector<8x32xf32>
    %408 = arith.subf %407, %401 : vector<8x32xf32>
    %409 = arith.mulf %408, %406 : vector<8x32xf32>
    %410 = arith.mulf %401, %350 : vector<8x32xf32>
    %411 = arith.addf %409, %410 : vector<8x32xf32>
    %412 = tpu.concatenate %411, %376 in 1 : vector<8x32xf32>, vector<8x32xf32> -> vector<8x64xf32>
    %cst_105 = arith.constant dense<0.000000e+00> : vector<8x128xf32>
    %413 = tpu.matmul %412, %71, %cst_105 {dimension_numbers = #tpu.dot_dimension_numbers<[1], [0], [0], [1], [0, 0, 1, 1], [], []>} : vector<8x64xf32>, vector<64x128xf32>, vector<8x128xf32> -> vector<8x128xf32>
    %414 = vector.broadcast %72 : vector<1x128xf32> to vector<8x128xf32>
    %415 = arith.addf %413, %414 : vector<8x128xf32>
    %416 = vector.extract_strided_slice %415 {offsets = [0, 0], sizes = [8, 32], strides = [1, 1]} : vector<8x128xf32> to vector<8x32xf32>
    %417 = arith.negf %416 : vector<8x32xf32>
    %418 = math.exp %417 : vector<8x32xf32>
    %cst_106 = arith.constant 1.000000e+00 : f32
    %419 = vector.broadcast %cst_106 : f32 to vector<8x32xf32>
    %420 = arith.addf %419, %418 : vector<8x32xf32>
    %421 = arith.divf %419, %420 : vector<8x32xf32>
    %422 = vector.extract_strided_slice %415 {offsets = [0, 32], sizes = [8, 32], strides = [1, 1]} : vector<8x128xf32> to vector<8x32xf32>
    %423 = arith.negf %422 : vector<8x32xf32>
    %424 = math.exp %423 : vector<8x32xf32>
    %cst_107 = arith.constant 1.000000e+00 : f32
    %425 = vector.broadcast %cst_107 : f32 to vector<8x32xf32>
    %426 = arith.addf %425, %424 : vector<8x32xf32>
    %427 = arith.divf %425, %426 : vector<8x32xf32>
    %428 = vector.extract_strided_slice %415 {offsets = [0, 64], sizes = [8, 32], strides = [1, 1]} : vector<8x128xf32> to vector<8x32xf32>
    %429 = vector.extract_strided_slice %415 {offsets = [0, 96], sizes = [8, 32], strides = [1, 1]} : vector<8x128xf32> to vector<8x32xf32>
    %430 = arith.mulf %421, %429 : vector<8x32xf32>
    %431 = arith.addf %428, %430 : vector<8x32xf32>
    %432 = math.tanh %431 : vector<8x32xf32>
    %cst_108 = arith.constant 1.000000e+00 : f32
    %433 = vector.broadcast %cst_108 : f32 to vector<8x32xf32>
    %434 = arith.subf %433, %427 : vector<8x32xf32>
    %435 = arith.mulf %434, %432 : vector<8x32xf32>
    %436 = arith.mulf %427, %376 : vector<8x32xf32>
    %437 = arith.addf %435, %436 : vector<8x32xf32>
    %438 = arith.index_cast %380 : i32 to index
    %c0_109 = arith.constant 0 : index
    %439 = vector.load %arg37[%438, %c0_109] : memref<64x32xf32, #tpu.memory_space<vmem>>, vector<8x32xf32>
    tpu.vector_store %arg37[%438, %c0_109], %437 {strides = array<i32>} : memref<64x32xf32, #tpu.memory_space<vmem>>, vector<8x32xf32>,
    %c6_i32 = arith.constant 6 : i32
    %c8_i32_110 = arith.constant 8 : i32
    %440 = arith.muli %c6_i32, %c8_i32_110 : i32
    %441 = tpu.assume_multiple %440, 8 : i32
    %442 = arith.index_cast %441 : i32 to index
    %c0_111 = arith.constant 0 : index
    %443 = vector.load %arg36[%442, %c0_111] : memref<64x96xf32, #tpu.memory_space<vmem>>, vector<8x96xf32>
    %cst_112 = arith.constant dense<0.000000e+00> : vector<8x96xf32>
    %444 = tpu.matmul %411, %69, %cst_112 {dimension_numbers = #tpu.dot_dimension_numbers<[1], [0], [0], [1], [0, 0, 1, 1], [], []>} : vector<8x32xf32>, vector<32x96xf32>, vector<8x96xf32> -> vector<8x96xf32>
    %445 = vector.broadcast %70 : vector<1x96xf32> to vector<8x96xf32>
    %446 = arith.addf %444, %445 : vector<8x96xf32>
    %447 = vector.extract_strided_slice %443 {offsets = [0, 0], sizes = [8, 32], strides = [1, 1]} : vector<8x96xf32> to vector<8x32xf32>
    %448 = vector.extract_strided_slice %446 {offsets = [0, 0], sizes = [8, 32], strides = [1, 1]} : vector<8x96xf32> to vector<8x32xf32>
    %449 = arith.addf %447, %448 : vector<8x32xf32>
    %450 = arith.negf %449 : vector<8x32xf32>
    %451 = math.exp %450 : vector<8x32xf32>
    %cst_113 = arith.constant 1.000000e+00 : f32
    %452 = vector.broadcast %cst_113 : f32 to vector<8x32xf32>
    %453 = arith.addf %452, %451 : vector<8x32xf32>
    %454 = arith.divf %452, %453 : vector<8x32xf32>
    %455 = vector.extract_strided_slice %443 {offsets = [0, 32], sizes = [8, 32], strides = [1, 1]} : vector<8x96xf32> to vector<8x32xf32>
    %456 = vector.extract_strided_slice %446 {offsets = [0, 32], sizes = [8, 32], strides = [1, 1]} : vector<8x96xf32> to vector<8x32xf32>
    %457 = arith.addf %455, %456 : vector<8x32xf32>
    %458 = arith.negf %457 : vector<8x32xf32>
    %459 = math.exp %458 : vector<8x32xf32>
    %cst_114 = arith.constant 1.000000e+00 : f32
    %460 = vector.broadcast %cst_114 : f32 to vector<8x32xf32>
    %461 = arith.addf %460, %459 : vector<8x32xf32>
    %462 = arith.divf %460, %461 : vector<8x32xf32>
    %463 = vector.extract_strided_slice %443 {offsets = [0, 64], sizes = [8, 32], strides = [1, 1]} : vector<8x96xf32> to vector<8x32xf32>
    %464 = vector.extract_strided_slice %446 {offsets = [0, 64], sizes = [8, 32], strides = [1, 1]} : vector<8x96xf32> to vector<8x32xf32>
    %465 = arith.mulf %454, %464 : vector<8x32xf32>
    %466 = arith.addf %463, %465 : vector<8x32xf32>
    %467 = math.tanh %466 : vector<8x32xf32>
    %cst_115 = arith.constant 1.000000e+00 : f32
    %468 = vector.broadcast %cst_115 : f32 to vector<8x32xf32>
    %469 = arith.subf %468, %462 : vector<8x32xf32>
    %470 = arith.mulf %469, %467 : vector<8x32xf32>
    %471 = arith.mulf %462, %411 : vector<8x32xf32>
    %472 = arith.addf %470, %471 : vector<8x32xf32>
    %473 = tpu.concatenate %472, %437 in 1 : vector<8x32xf32>, vector<8x32xf32> -> vector<8x64xf32>
    %cst_116 = arith.constant dense<0.000000e+00> : vector<8x128xf32>
    %474 = tpu.matmul %473, %71, %cst_116 {dimension_numbers = #tpu.dot_dimension_numbers<[1], [0], [0], [1], [0, 0, 1, 1], [], []>} : vector<8x64xf32>, vector<64x128xf32>, vector<8x128xf32> -> vector<8x128xf32>
    %475 = vector.broadcast %72 : vector<1x128xf32> to vector<8x128xf32>
    %476 = arith.addf %474, %475 : vector<8x128xf32>
    %477 = vector.extract_strided_slice %476 {offsets = [0, 0], sizes = [8, 32], strides = [1, 1]} : vector<8x128xf32> to vector<8x32xf32>
    %478 = arith.negf %477 : vector<8x32xf32>
    %479 = math.exp %478 : vector<8x32xf32>
    %cst_117 = arith.constant 1.000000e+00 : f32
    %480 = vector.broadcast %cst_117 : f32 to vector<8x32xf32>
    %481 = arith.addf %480, %479 : vector<8x32xf32>
    %482 = arith.divf %480, %481 : vector<8x32xf32>
    %483 = vector.extract_strided_slice %476 {offsets = [0, 32], sizes = [8, 32], strides = [1, 1]} : vector<8x128xf32> to vector<8x32xf32>
    %484 = arith.negf %483 : vector<8x32xf32>
    %485 = math.exp %484 : vector<8x32xf32>
    %cst_118 = arith.constant 1.000000e+00 : f32
    %486 = vector.broadcast %cst_118 : f32 to vector<8x32xf32>
    %487 = arith.addf %486, %485 : vector<8x32xf32>
    %488 = arith.divf %486, %487 : vector<8x32xf32>
    %489 = vector.extract_strided_slice %476 {offsets = [0, 64], sizes = [8, 32], strides = [1, 1]} : vector<8x128xf32> to vector<8x32xf32>
    %490 = vector.extract_strided_slice %476 {offsets = [0, 96], sizes = [8, 32], strides = [1, 1]} : vector<8x128xf32> to vector<8x32xf32>
    %491 = arith.mulf %482, %490 : vector<8x32xf32>
    %492 = arith.addf %489, %491 : vector<8x32xf32>
    %493 = math.tanh %492 : vector<8x32xf32>
    %cst_119 = arith.constant 1.000000e+00 : f32
    %494 = vector.broadcast %cst_119 : f32 to vector<8x32xf32>
    %495 = arith.subf %494, %488 : vector<8x32xf32>
    %496 = arith.mulf %495, %493 : vector<8x32xf32>
    %497 = arith.mulf %488, %437 : vector<8x32xf32>
    %498 = arith.addf %496, %497 : vector<8x32xf32>
    %499 = arith.index_cast %441 : i32 to index
    %c0_120 = arith.constant 0 : index
    %500 = vector.load %arg37[%499, %c0_120] : memref<64x32xf32, #tpu.memory_space<vmem>>, vector<8x32xf32>
    tpu.vector_store %arg37[%499, %c0_120], %498 {strides = array<i32>} : memref<64x32xf32, #tpu.memory_space<vmem>>, vector<8x32xf32>,
    %c7_i32 = arith.constant 7 : i32
    %c8_i32_121 = arith.constant 8 : i32
    %501 = arith.muli %c7_i32, %c8_i32_121 : i32
    %502 = tpu.assume_multiple %501, 8 : i32
    %503 = arith.index_cast %502 : i32 to index
    %c0_122 = arith.constant 0 : index
    %504 = vector.load %arg36[%503, %c0_122] : memref<64x96xf32, #tpu.memory_space<vmem>>, vector<8x96xf32>
    %cst_123 = arith.constant dense<0.000000e+00> : vector<8x96xf32>
    %505 = tpu.matmul %472, %69, %cst_123 {dimension_numbers = #tpu.dot_dimension_numbers<[1], [0], [0], [1], [0, 0, 1, 1], [], []>} : vector<8x32xf32>, vector<32x96xf32>, vector<8x96xf32> -> vector<8x96xf32>
    %506 = vector.broadcast %70 : vector<1x96xf32> to vector<8x96xf32>
    %507 = arith.addf %505, %506 : vector<8x96xf32>
    %508 = vector.extract_strided_slice %504 {offsets = [0, 0], sizes = [8, 32], strides = [1, 1]} : vector<8x96xf32> to vector<8x32xf32>
    %509 = vector.extract_strided_slice %507 {offsets = [0, 0], sizes = [8, 32], strides = [1, 1]} : vector<8x96xf32> to vector<8x32xf32>
    %510 = arith.addf %508, %509 : vector<8x32xf32>
    %511 = arith.negf %510 : vector<8x32xf32>
    %512 = math.exp %511 : vector<8x32xf32>
    %cst_124 = arith.constant 1.000000e+00 : f32
    %513 = vector.broadcast %cst_124 : f32 to vector<8x32xf32>
    %514 = arith.addf %513, %512 : vector<8x32xf32>
    %515 = arith.divf %513, %514 : vector<8x32xf32>
    %516 = vector.extract_strided_slice %504 {offsets = [0, 32], sizes = [8, 32], strides = [1, 1]} : vector<8x96xf32> to vector<8x32xf32>
    %517 = vector.extract_strided_slice %507 {offsets = [0, 32], sizes = [8, 32], strides = [1, 1]} : vector<8x96xf32> to vector<8x32xf32>
    %518 = arith.addf %516, %517 : vector<8x32xf32>
    %519 = arith.negf %518 : vector<8x32xf32>
    %520 = math.exp %519 : vector<8x32xf32>
    %cst_125 = arith.constant 1.000000e+00 : f32
    %521 = vector.broadcast %cst_125 : f32 to vector<8x32xf32>
    %522 = arith.addf %521, %520 : vector<8x32xf32>
    %523 = arith.divf %521, %522 : vector<8x32xf32>
    %524 = vector.extract_strided_slice %504 {offsets = [0, 64], sizes = [8, 32], strides = [1, 1]} : vector<8x96xf32> to vector<8x32xf32>
    %525 = vector.extract_strided_slice %507 {offsets = [0, 64], sizes = [8, 32], strides = [1, 1]} : vector<8x96xf32> to vector<8x32xf32>
    %526 = arith.mulf %515, %525 : vector<8x32xf32>
    %527 = arith.addf %524, %526 : vector<8x32xf32>
    %528 = math.tanh %527 : vector<8x32xf32>
    %cst_126 = arith.constant 1.000000e+00 : f32
    %529 = vector.broadcast %cst_126 : f32 to vector<8x32xf32>
    %530 = arith.subf %529, %523 : vector<8x32xf32>
    %531 = arith.mulf %530, %528 : vector<8x32xf32>
    %532 = arith.mulf %523, %472 : vector<8x32xf32>
    %533 = arith.addf %531, %532 : vector<8x32xf32>
    %534 = tpu.concatenate %533, %498 in 1 : vector<8x32xf32>, vector<8x32xf32> -> vector<8x64xf32>
    %cst_127 = arith.constant dense<0.000000e+00> : vector<8x128xf32>
    %535 = tpu.matmul %534, %71, %cst_127 {dimension_numbers = #tpu.dot_dimension_numbers<[1], [0], [0], [1], [0, 0, 1, 1], [], []>} : vector<8x64xf32>, vector<64x128xf32>, vector<8x128xf32> -> vector<8x128xf32>
    %536 = vector.broadcast %72 : vector<1x128xf32> to vector<8x128xf32>
    %537 = arith.addf %535, %536 : vector<8x128xf32>
    %538 = vector.extract_strided_slice %537 {offsets = [0, 0], sizes = [8, 32], strides = [1, 1]} : vector<8x128xf32> to vector<8x32xf32>
    %539 = arith.negf %538 : vector<8x32xf32>
    %540 = math.exp %539 : vector<8x32xf32>
    %cst_128 = arith.constant 1.000000e+00 : f32
    %541 = vector.broadcast %cst_128 : f32 to vector<8x32xf32>
    %542 = arith.addf %541, %540 : vector<8x32xf32>
    %543 = arith.divf %541, %542 : vector<8x32xf32>
    %544 = vector.extract_strided_slice %537 {offsets = [0, 32], sizes = [8, 32], strides = [1, 1]} : vector<8x128xf32> to vector<8x32xf32>
    %545 = arith.negf %544 : vector<8x32xf32>
    %546 = math.exp %545 : vector<8x32xf32>
    %cst_129 = arith.constant 1.000000e+00 : f32
    %547 = vector.broadcast %cst_129 : f32 to vector<8x32xf32>
    %548 = arith.addf %547, %546 : vector<8x32xf32>
    %549 = arith.divf %547, %548 : vector<8x32xf32>
    %550 = vector.extract_strided_slice %537 {offsets = [0, 64], sizes = [8, 32], strides = [1, 1]} : vector<8x128xf32> to vector<8x32xf32>
    %551 = vector.extract_strided_slice %537 {offsets = [0, 96], sizes = [8, 32], strides = [1, 1]} : vector<8x128xf32> to vector<8x32xf32>
    %552 = arith.mulf %543, %551 : vector<8x32xf32>
    %553 = arith.addf %550, %552 : vector<8x32xf32>
    %554 = math.tanh %553 : vector<8x32xf32>
    %cst_130 = arith.constant 1.000000e+00 : f32
    %555 = vector.broadcast %cst_130 : f32 to vector<8x32xf32>
    %556 = arith.subf %555, %549 : vector<8x32xf32>
    %557 = arith.mulf %556, %554 : vector<8x32xf32>
    %558 = arith.mulf %549, %498 : vector<8x32xf32>
    %559 = arith.addf %557, %558 : vector<8x32xf32>
    %560 = arith.index_cast %502 : i32 to index
    %c0_131 = arith.constant 0 : index
    %561 = vector.load %arg37[%560, %c0_131] : memref<64x32xf32, #tpu.memory_space<vmem>>, vector<8x32xf32>
    tpu.vector_store %arg37[%560, %c0_131], %559 {strides = array<i32>} : memref<64x32xf32, #tpu.memory_space<vmem>>, vector<8x32xf32>,
    %c8_i32_132 = arith.constant 8 : i32
    %c0_133 = arith.constant 0 : index
    %c0_134 = arith.constant 0 : index
    %562 = tpu.strided_load %arg37[%c0_133, %c0_134] {strides = array<i32: 8, 1>} : memref<64x32xf32, #tpu.memory_space<vmem>>, vector<8x32xf32>
    %c1 = arith.constant 1 : index
    %c0_135 = arith.constant 0 : index
    %563 = tpu.strided_load %arg37[%c1, %c0_135] {strides = array<i32: 8, 1>} : memref<64x32xf32, #tpu.memory_space<vmem>>, vector<8x32xf32>
    %564 = tpu.concatenate %562, %563 in 0 : vector<8x32xf32>, vector<8x32xf32> -> vector<16x32xf32>
    %c0_136 = arith.constant 0 : index
    %c0_137 = arith.constant 0 : index
    %565 = vector.load %arg2[%c0_136, %c0_137] : memref<2x8xf32, #tpu.memory_space<vmem>>, vector<2x8xf32>
    %c0_138 = arith.constant 0 : index
    %c0_139 = arith.constant 0 : index
    %566 = vector.load %arg17[%c0_138, %c0_139] : memref<32x32xf32, #tpu.memory_space<vmem>>, vector<32x32xf32>
    %cst_140 = arith.constant dense<0.000000e+00> : vector<16x32xf32>
    %567 = tpu.matmul %564, %566, %cst_140 {dimension_numbers = #tpu.dot_dimension_numbers<[1], [0], [0], [1], [0, 0, 1, 1], [], []>} : vector<16x32xf32>, vector<32x32xf32>, vector<16x32xf32> -> vector<16x32xf32>
    %c0_141 = arith.constant 0 : index
    %c0_142 = arith.constant 0 : index
    %568 = vector.load %arg18[%c0_141, %c0_142] : memref<1x32xf32, #tpu.memory_space<vmem>>, vector<1x32xf32>
    %569 = vector.broadcast %568 : vector<1x32xf32> to vector<16x32xf32>
    %570 = arith.addf %567, %569 : vector<16x32xf32>
    %c0_143 = arith.constant 0 : index
    %c0_144 = arith.constant 0 : index
    %571 = vector.load %arg19[%c0_143, %c0_144] : memref<32x32xf32, #tpu.memory_space<vmem>>, vector<32x32xf32>
    %cst_145 = arith.constant dense<0.000000e+00> : vector<16x32xf32>
    %572 = tpu.matmul %564, %571, %cst_145 {dimension_numbers = #tpu.dot_dimension_numbers<[1], [0], [0], [1], [0, 0, 1, 1], [], []>} : vector<16x32xf32>, vector<32x32xf32>, vector<16x32xf32> -> vector<16x32xf32>
    %c0_146 = arith.constant 0 : index
    %c0_147 = arith.constant 0 : index
    %573 = vector.load %arg20[%c0_146, %c0_147] : memref<1x32xf32, #tpu.memory_space<vmem>>, vector<1x32xf32>
    %574 = vector.broadcast %573 : vector<1x32xf32> to vector<16x32xf32>
    %575 = arith.addf %572, %574 : vector<16x32xf32>
    %c0_148 = arith.constant 0 : index
    %c0_149 = arith.constant 0 : index
    %576 = vector.load %arg21[%c0_148, %c0_149] : memref<32x32xf32, #tpu.memory_space<vmem>>, vector<32x32xf32>
    %cst_150 = arith.constant dense<0.000000e+00> : vector<16x32xf32>
    %577 = tpu.matmul %564, %576, %cst_150 {dimension_numbers = #tpu.dot_dimension_numbers<[1], [0], [0], [1], [0, 0, 1, 1], [], []>} : vector<16x32xf32>, vector<32x32xf32>, vector<16x32xf32> -> vector<16x32xf32>
    %c0_151 = arith.constant 0 : index
    %c0_152 = arith.constant 0 : index
    %578 = vector.load %arg22[%c0_151, %c0_152] : memref<1x32xf32, #tpu.memory_space<vmem>>, vector<1x32xf32>
    %579 = vector.broadcast %578 : vector<1x32xf32> to vector<16x32xf32>
    %580 = arith.addf %577, %579 : vector<16x32xf32>
    %581 = vector.extract_strided_slice %565 {offsets = [0, 0], sizes = [1, 8], strides = [1, 1]} : vector<2x8xf32> to vector<1x8xf32>
    %582 = vector.extract_strided_slice %570 {offsets = [0, 0], sizes = [8, 16], strides = [1, 1]} : vector<16x32xf32> to vector<8x16xf32>
    %583 = vector.extract_strided_slice %575 {offsets = [0, 0], sizes = [8, 16], strides = [1, 1]} : vector<16x32xf32> to vector<8x16xf32>
    %584 = vector.extract_strided_slice %580 {offsets = [0, 0], sizes = [8, 16], strides = [1, 1]} : vector<16x32xf32> to vector<8x16xf32>
    %cst_153 = arith.constant dense<0.000000e+00> : vector<8x8xf32>
    %585 = tpu.matmul %582, %583, %cst_153 {dimension_numbers = #tpu.dot_dimension_numbers<[1], [1], [0], [0], [0, 0, 1, 0], [], []>} : vector<8x16xf32>, vector<8x16xf32>, vector<8x8xf32> -> vector<8x8xf32>
    %cst_154 = arith.constant 2.500000e-01 : f32
    %586 = vector.broadcast %cst_154 : f32 to vector<8x8xf32>
    %587 = arith.mulf %585, %586 : vector<8x8xf32>
    %588 = vector.broadcast %581 : vector<1x8xf32> to vector<8x8xf32>
    %589 = arith.addf %587, %588 : vector<8x8xf32>
    %cst_155 = arith.constant dense<0xFF800000> : vector<8xf32>
    %590 = vector.multi_reduction <maximumf>, %589, %cst_155 [1] : vector<8x8xf32> to vector<8xf32>
    %cst_156 = arith.constant 0xFF800000 : f32
    %591 = vector.broadcast %cst_156 : f32 to vector<8xf32>
    %592 = arith.maximumf %591, %590 : vector<8xf32>
    %593 = vector.shape_cast %592 : vector<8xf32> to vector<8x1xf32>
    %594 = vector.broadcast %593 : vector<8x1xf32> to vector<8x8xf32>
    %595 = arith.subf %589, %594 : vector<8x8xf32>
    %596 = math.exp %595 : vector<8x8xf32>
    %cst_157 = arith.constant dense<0.000000e+00> : vector<8xf32>
    %597 = vector.multi_reduction <add>, %596, %cst_157 [1] : vector<8x8xf32> to vector<8xf32>
    %598 = vector.shape_cast %597 : vector<8xf32> to vector<8x1xf32>
    %599 = vector.broadcast %598 : vector<8x1xf32> to vector<8x8xf32>
    %600 = arith.divf %596, %599 : vector<8x8xf32>
    %cst_158 = arith.constant dense<0.000000e+00> : vector<8x16xf32>
    %601 = tpu.matmul %600, %584, %cst_158 {dimension_numbers = #tpu.dot_dimension_numbers<[1], [0], [0], [1], [0, 0, 1, 1], [], []>} : vector<8x8xf32>, vector<8x16xf32>, vector<8x16xf32> -> vector<8x16xf32>
    %602 = vector.extract_strided_slice %570 {offsets = [0, 16], sizes = [8, 16], strides = [1, 1]} : vector<16x32xf32> to vector<8x16xf32>
    %603 = vector.extract_strided_slice %575 {offsets = [0, 16], sizes = [8, 16], strides = [1, 1]} : vector<16x32xf32> to vector<8x16xf32>
    %604 = vector.extract_strided_slice %580 {offsets = [0, 16], sizes = [8, 16], strides = [1, 1]} : vector<16x32xf32> to vector<8x16xf32>
    %cst_159 = arith.constant dense<0.000000e+00> : vector<8x8xf32>
    %605 = tpu.matmul %602, %603, %cst_159 {dimension_numbers = #tpu.dot_dimension_numbers<[1], [1], [0], [0], [0, 0, 1, 0], [], []>} : vector<8x16xf32>, vector<8x16xf32>, vector<8x8xf32> -> vector<8x8xf32>
    %cst_160 = arith.constant 2.500000e-01 : f32
    %606 = vector.broadcast %cst_160 : f32 to vector<8x8xf32>
    %607 = arith.mulf %605, %606 : vector<8x8xf32>
    %608 = vector.broadcast %581 : vector<1x8xf32> to vector<8x8xf32>
    %609 = arith.addf %607, %608 : vector<8x8xf32>
    %cst_161 = arith.constant dense<0xFF800000> : vector<8xf32>
    %610 = vector.multi_reduction <maximumf>, %609, %cst_161 [1] : vector<8x8xf32> to vector<8xf32>
    %cst_162 = arith.constant 0xFF800000 : f32
    %611 = vector.broadcast %cst_162 : f32 to vector<8xf32>
    %612 = arith.maximumf %611, %610 : vector<8xf32>
    %613 = vector.shape_cast %612 : vector<8xf32> to vector<8x1xf32>
    %614 = vector.broadcast %613 : vector<8x1xf32> to vector<8x8xf32>
    %615 = arith.subf %609, %614 : vector<8x8xf32>
    %616 = math.exp %615 : vector<8x8xf32>
    %cst_163 = arith.constant dense<0.000000e+00> : vector<8xf32>
    %617 = vector.multi_reduction <add>, %616, %cst_163 [1] : vector<8x8xf32> to vector<8xf32>
    %618 = vector.shape_cast %617 : vector<8xf32> to vector<8x1xf32>
    %619 = vector.broadcast %618 : vector<8x1xf32> to vector<8x8xf32>
    %620 = arith.divf %616, %619 : vector<8x8xf32>
    %cst_164 = arith.constant dense<0.000000e+00> : vector<8x16xf32>
    %621 = tpu.matmul %620, %604, %cst_164 {dimension_numbers = #tpu.dot_dimension_numbers<[1], [0], [0], [1], [0, 0, 1, 1], [], []>} : vector<8x8xf32>, vector<8x16xf32>, vector<8x16xf32> -> vector<8x16xf32>
    %622 = tpu.concatenate %601, %621 in 1 : vector<8x16xf32>, vector<8x16xf32> -> vector<8x32xf32>
    %623 = vector.extract_strided_slice %565 {offsets = [1, 0], sizes = [1, 8], strides = [1, 1]} : vector<2x8xf32> to vector<1x8xf32>
    %624 = vector.extract_strided_slice %570 {offsets = [8, 0], sizes = [8, 16], strides = [1, 1]} : vector<16x32xf32> to vector<8x16xf32>
    %625 = vector.extract_strided_slice %575 {offsets = [8, 0], sizes = [8, 16], strides = [1, 1]} : vector<16x32xf32> to vector<8x16xf32>
    %626 = vector.extract_strided_slice %580 {offsets = [8, 0], sizes = [8, 16], strides = [1, 1]} : vector<16x32xf32> to vector<8x16xf32>
    %cst_165 = arith.constant dense<0.000000e+00> : vector<8x8xf32>
    %627 = tpu.matmul %624, %625, %cst_165 {dimension_numbers = #tpu.dot_dimension_numbers<[1], [1], [0], [0], [0, 0, 1, 0], [], []>} : vector<8x16xf32>, vector<8x16xf32>, vector<8x8xf32> -> vector<8x8xf32>
    %cst_166 = arith.constant 2.500000e-01 : f32
    %628 = vector.broadcast %cst_166 : f32 to vector<8x8xf32>
    %629 = arith.mulf %627, %628 : vector<8x8xf32>
    %630 = vector.broadcast %623 : vector<1x8xf32> to vector<8x8xf32>
    %631 = arith.addf %629, %630 : vector<8x8xf32>
    %cst_167 = arith.constant dense<0xFF800000> : vector<8xf32>
    %632 = vector.multi_reduction <maximumf>, %631, %cst_167 [1] : vector<8x8xf32> to vector<8xf32>
    %cst_168 = arith.constant 0xFF800000 : f32
    %633 = vector.broadcast %cst_168 : f32 to vector<8xf32>
    %634 = arith.maximumf %633, %632 : vector<8xf32>
    %635 = vector.shape_cast %634 : vector<8xf32> to vector<8x1xf32>
    %636 = vector.broadcast %635 : vector<8x1xf32> to vector<8x8xf32>
    %637 = arith.subf %631, %636 : vector<8x8xf32>
    %638 = math.exp %637 : vector<8x8xf32>
    %cst_169 = arith.constant dense<0.000000e+00> : vector<8xf32>
    %639 = vector.multi_reduction <add>, %638, %cst_169 [1] : vector<8x8xf32> to vector<8xf32>
    %640 = vector.shape_cast %639 : vector<8xf32> to vector<8x1xf32>
    %641 = vector.broadcast %640 : vector<8x1xf32> to vector<8x8xf32>
    %642 = arith.divf %638, %641 : vector<8x8xf32>
    %cst_170 = arith.constant dense<0.000000e+00> : vector<8x16xf32>
    %643 = tpu.matmul %642, %626, %cst_170 {dimension_numbers = #tpu.dot_dimension_numbers<[1], [0], [0], [1], [0, 0, 1, 1], [], []>} : vector<8x8xf32>, vector<8x16xf32>, vector<8x16xf32> -> vector<8x16xf32>
    %644 = vector.extract_strided_slice %570 {offsets = [8, 16], sizes = [8, 16], strides = [1, 1]} : vector<16x32xf32> to vector<8x16xf32>
    %645 = vector.extract_strided_slice %575 {offsets = [8, 16], sizes = [8, 16], strides = [1, 1]} : vector<16x32xf32> to vector<8x16xf32>
    %646 = vector.extract_strided_slice %580 {offsets = [8, 16], sizes = [8, 16], strides = [1, 1]} : vector<16x32xf32> to vector<8x16xf32>
    %cst_171 = arith.constant dense<0.000000e+00> : vector<8x8xf32>
    %647 = tpu.matmul %644, %645, %cst_171 {dimension_numbers = #tpu.dot_dimension_numbers<[1], [1], [0], [0], [0, 0, 1, 0], [], []>} : vector<8x16xf32>, vector<8x16xf32>, vector<8x8xf32> -> vector<8x8xf32>
    %cst_172 = arith.constant 2.500000e-01 : f32
    %648 = vector.broadcast %cst_172 : f32 to vector<8x8xf32>
    %649 = arith.mulf %647, %648 : vector<8x8xf32>
    %650 = vector.broadcast %623 : vector<1x8xf32> to vector<8x8xf32>
    %651 = arith.addf %649, %650 : vector<8x8xf32>
    %cst_173 = arith.constant dense<0xFF800000> : vector<8xf32>
    %652 = vector.multi_reduction <maximumf>, %651, %cst_173 [1] : vector<8x8xf32> to vector<8xf32>
    %cst_174 = arith.constant 0xFF800000 : f32
    %653 = vector.broadcast %cst_174 : f32 to vector<8xf32>
    %654 = arith.maximumf %653, %652 : vector<8xf32>
    %655 = vector.shape_cast %654 : vector<8xf32> to vector<8x1xf32>
    %656 = vector.broadcast %655 : vector<8x1xf32> to vector<8x8xf32>
    %657 = arith.subf %651, %656 : vector<8x8xf32>
    %658 = math.exp %657 : vector<8x8xf32>
    %cst_175 = arith.constant dense<0.000000e+00> : vector<8xf32>
    %659 = vector.multi_reduction <add>, %658, %cst_175 [1] : vector<8x8xf32> to vector<8xf32>
    %660 = vector.shape_cast %659 : vector<8xf32> to vector<8x1xf32>
    %661 = vector.broadcast %660 : vector<8x1xf32> to vector<8x8xf32>
    %662 = arith.divf %658, %661 : vector<8x8xf32>
    %cst_176 = arith.constant dense<0.000000e+00> : vector<8x16xf32>
    %663 = tpu.matmul %662, %646, %cst_176 {dimension_numbers = #tpu.dot_dimension_numbers<[1], [0], [0], [1], [0, 0, 1, 1], [], []>} : vector<8x8xf32>, vector<8x16xf32>, vector<8x16xf32> -> vector<8x16xf32>
    %664 = tpu.concatenate %643, %663 in 1 : vector<8x16xf32>, vector<8x16xf32> -> vector<8x32xf32>
    %665 = tpu.concatenate %622, %664 in 0 : vector<8x32xf32>, vector<8x32xf32> -> vector<16x32xf32>
    %c0_177 = arith.constant 0 : index
    %c0_178 = arith.constant 0 : index
    %666 = vector.load %arg23[%c0_177, %c0_178] : memref<32x32xf32, #tpu.memory_space<vmem>>, vector<32x32xf32>
    %cst_179 = arith.constant dense<0.000000e+00> : vector<16x32xf32>
    %667 = tpu.matmul %665, %666, %cst_179 {dimension_numbers = #tpu.dot_dimension_numbers<[1], [0], [0], [1], [0, 0, 1, 1], [], []>} : vector<16x32xf32>, vector<32x32xf32>, vector<16x32xf32> -> vector<16x32xf32>
    %c0_180 = arith.constant 0 : index
    %c0_181 = arith.constant 0 : index
    %668 = vector.load %arg24[%c0_180, %c0_181] : memref<1x32xf32, #tpu.memory_space<vmem>>, vector<1x32xf32>
    %669 = vector.broadcast %668 : vector<1x32xf32> to vector<16x32xf32>
    %670 = arith.addf %667, %669 : vector<16x32xf32>
    %671 = arith.addf %670, %564 : vector<16x32xf32>
    %c0_182 = arith.constant 0 : index
    %c0_183 = arith.constant 0 : index
    %672 = vector.load %arg25[%c0_182, %c0_183] : memref<1x32xf32, #tpu.memory_space<vmem>>, vector<1x32xf32>
    %c0_184 = arith.constant 0 : index
    %c0_185 = arith.constant 0 : index
    %673 = vector.load %arg26[%c0_184, %c0_185] : memref<1x32xf32, #tpu.memory_space<vmem>>, vector<1x32xf32>
    %cst_186 = arith.constant dense<0.000000e+00> : vector<16xf32>
    %674 = vector.multi_reduction <add>, %671, %cst_186 [1] : vector<16x32xf32> to vector<16xf32>
    %675 = vector.shape_cast %674 : vector<16xf32> to vector<16x1xf32>
    %cst_187 = arith.constant 3.200000e+01 : f32
    %676 = vector.broadcast %cst_187 : f32 to vector<16x1xf32>
    %677 = arith.divf %675, %676 : vector<16x1xf32>
    %678 = vector.broadcast %677 : vector<16x1xf32> to vector<16x32xf32>
    %679 = arith.subf %671, %678 : vector<16x32xf32>
    %680 = arith.mulf %679, %679 : vector<16x32xf32>
    %cst_188 = arith.constant dense<0.000000e+00> : vector<16xf32>
    %681 = vector.multi_reduction <add>, %680, %cst_188 [1] : vector<16x32xf32> to vector<16xf32>
    %682 = vector.shape_cast %681 : vector<16xf32> to vector<16x1xf32>
    %cst_189 = arith.constant 3.200000e+01 : f32
    %683 = vector.broadcast %cst_189 : f32 to vector<16x1xf32>
    %684 = arith.divf %682, %683 : vector<16x1xf32>
    %685 = vector.broadcast %677 : vector<16x1xf32> to vector<16x32xf32>
    %686 = arith.subf %671, %685 : vector<16x32xf32>
    %cst_190 = arith.constant 9.99999996E-13 : f32
    %687 = vector.broadcast %cst_190 : f32 to vector<16x1xf32>
    %688 = arith.addf %684, %687 : vector<16x1xf32>
    %689 = math.rsqrt %688 : vector<16x1xf32>
    %690 = vector.broadcast %689 : vector<16x1xf32> to vector<16x32xf32>
    %691 = arith.mulf %686, %690 : vector<16x32xf32>
    %692 = vector.broadcast %672 : vector<1x32xf32> to vector<16x32xf32>
    %693 = arith.mulf %691, %692 : vector<16x32xf32>
    %694 = vector.broadcast %673 : vector<1x32xf32> to vector<16x32xf32>
    %695 = arith.addf %693, %694 : vector<16x32xf32>
    %c0_191 = arith.constant 0 : index
    %c0_192 = arith.constant 0 : index
    %696 = vector.load %arg27[%c0_191, %c0_192] : memref<32x32xf32, #tpu.memory_space<vmem>>, vector<32x32xf32>
    %cst_193 = arith.constant dense<0.000000e+00> : vector<16x32xf32>
    %697 = tpu.matmul %695, %696, %cst_193 {dimension_numbers = #tpu.dot_dimension_numbers<[1], [0], [0], [1], [0, 0, 1, 1], [], []>} : vector<16x32xf32>, vector<32x32xf32>, vector<16x32xf32> -> vector<16x32xf32>
    %c0_194 = arith.constant 0 : index
    %c0_195 = arith.constant 0 : index
    %698 = vector.load %arg28[%c0_194, %c0_195] : memref<1x32xf32, #tpu.memory_space<vmem>>, vector<1x32xf32>
    %699 = vector.broadcast %698 : vector<1x32xf32> to vector<16x32xf32>
    %700 = arith.addf %697, %699 : vector<16x32xf32>
    %701 = arith.mulf %700, %700 : vector<16x32xf32>
    %702 = arith.mulf %700, %701 : vector<16x32xf32>
    %cst_196 = arith.constant 4.471500e-02 : f32
    %703 = vector.broadcast %cst_196 : f32 to vector<16x32xf32>
    %704 = arith.mulf %703, %702 : vector<16x32xf32>
    %705 = arith.addf %700, %704 : vector<16x32xf32>
    %cst_197 = arith.constant 0.797884583 : f32
    %706 = vector.broadcast %cst_197 : f32 to vector<16x32xf32>
    %707 = arith.mulf %706, %705 : vector<16x32xf32>
    %708 = math.tanh %707 : vector<16x32xf32>
    %cst_198 = arith.constant 1.000000e+00 : f32
    %709 = vector.broadcast %cst_198 : f32 to vector<16x32xf32>
    %710 = arith.addf %709, %708 : vector<16x32xf32>
    %cst_199 = arith.constant 5.000000e-01 : f32
    %711 = vector.broadcast %cst_199 : f32 to vector<16x32xf32>
    %712 = arith.mulf %711, %710 : vector<16x32xf32>
    %713 = arith.mulf %700, %712 : vector<16x32xf32>
    %c0_200 = arith.constant 0 : index
    %c0_201 = arith.constant 0 : index
    %714 = vector.load %arg29[%c0_200, %c0_201] : memref<32x32xf32, #tpu.memory_space<vmem>>, vector<32x32xf32>
    %cst_202 = arith.constant dense<0.000000e+00> : vector<16x32xf32>
    %715 = tpu.matmul %713, %714, %cst_202 {dimension_numbers = #tpu.dot_dimension_numbers<[1], [0], [0], [1], [0, 0, 1, 1], [], []>} : vector<16x32xf32>, vector<32x32xf32>, vector<16x32xf32> -> vector<16x32xf32>
    %c0_203 = arith.constant 0 : index
    %c0_204 = arith.constant 0 : index
    %716 = vector.load %arg30[%c0_203, %c0_204] : memref<1x32xf32, #tpu.memory_space<vmem>>, vector<1x32xf32>
    %717 = vector.broadcast %716 : vector<1x32xf32> to vector<16x32xf32>
    %718 = arith.addf %715, %717 : vector<16x32xf32>
    %719 = arith.addf %718, %695 : vector<16x32xf32>
    %c0_205 = arith.constant 0 : index
    %c0_206 = arith.constant 0 : index
    %720 = vector.load %arg31[%c0_205, %c0_206] : memref<1x32xf32, #tpu.memory_space<vmem>>, vector<1x32xf32>
    %c0_207 = arith.constant 0 : index
    %c0_208 = arith.constant 0 : index
    %721 = vector.load %arg32[%c0_207, %c0_208] : memref<1x32xf32, #tpu.memory_space<vmem>>, vector<1x32xf32>
    %cst_209 = arith.constant dense<0.000000e+00> : vector<16xf32>
    %722 = vector.multi_reduction <add>, %719, %cst_209 [1] : vector<16x32xf32> to vector<16xf32>
    %723 = vector.shape_cast %722 : vector<16xf32> to vector<16x1xf32>
    %cst_210 = arith.constant 3.200000e+01 : f32
    %724 = vector.broadcast %cst_210 : f32 to vector<16x1xf32>
    %725 = arith.divf %723, %724 : vector<16x1xf32>
    %726 = vector.broadcast %725 : vector<16x1xf32> to vector<16x32xf32>
    %727 = arith.subf %719, %726 : vector<16x32xf32>
    %728 = arith.mulf %727, %727 : vector<16x32xf32>
    %cst_211 = arith.constant dense<0.000000e+00> : vector<16xf32>
    %729 = vector.multi_reduction <add>, %728, %cst_211 [1] : vector<16x32xf32> to vector<16xf32>
    %730 = vector.shape_cast %729 : vector<16xf32> to vector<16x1xf32>
    %cst_212 = arith.constant 3.200000e+01 : f32
    %731 = vector.broadcast %cst_212 : f32 to vector<16x1xf32>
    %732 = arith.divf %730, %731 : vector<16x1xf32>
    %733 = vector.broadcast %725 : vector<16x1xf32> to vector<16x32xf32>
    %734 = arith.subf %719, %733 : vector<16x32xf32>
    %cst_213 = arith.constant 9.99999996E-13 : f32
    %735 = vector.broadcast %cst_213 : f32 to vector<16x1xf32>
    %736 = arith.addf %732, %735 : vector<16x1xf32>
    %737 = math.rsqrt %736 : vector<16x1xf32>
    %738 = vector.broadcast %737 : vector<16x1xf32> to vector<16x32xf32>
    %739 = arith.mulf %734, %738 : vector<16x32xf32>
    %740 = vector.broadcast %720 : vector<1x32xf32> to vector<16x32xf32>
    %741 = arith.mulf %739, %740 : vector<16x32xf32>
    %742 = vector.broadcast %721 : vector<1x32xf32> to vector<16x32xf32>
    %743 = arith.addf %741, %742 : vector<16x32xf32>
    %c0_214 = arith.constant 0 : index
    %c0_215 = arith.constant 0 : index
    %744 = vector.load %arg33[%c0_214, %c0_215] : memref<1x32xf32, #tpu.memory_space<vmem>>, vector<1x32xf32>
    %745 = vector.extract_strided_slice %743 {offsets = [0, 0], sizes = [8, 32], strides = [1, 1]} : vector<16x32xf32> to vector<8x32xf32>
    %cst_216 = arith.constant dense<0.000000e+00> : vector<1x8xf32>
    %746 = tpu.matmul %744, %745, %cst_216 {dimension_numbers = #tpu.dot_dimension_numbers<[1], [1], [0], [0], [0, 0, 1, 0], [], []>} : vector<1x32xf32>, vector<8x32xf32>, vector<1x8xf32> -> vector<1x8xf32>
    %c0_217 = arith.constant 0 : index
    %c0_218 = arith.constant 0 : index
    %747 = vector.load %arg34[%c0_217, %c0_218] : memref<1x1xf32, #tpu.memory_space<vmem>>, vector<1x1xf32>
    %748 = vector.broadcast %747 : vector<1x1xf32> to vector<1x8xf32>
    %749 = arith.addf %746, %748 : vector<1x8xf32>
    %c0_219 = arith.constant 0 : index
    %c0_220 = arith.constant 0 : index
    %750 = vector.load %arg33[%c0_219, %c0_220] : memref<1x32xf32, #tpu.memory_space<vmem>>, vector<1x32xf32>
    %751 = vector.extract_strided_slice %743 {offsets = [8, 0], sizes = [8, 32], strides = [1, 1]} : vector<16x32xf32> to vector<8x32xf32>
    %cst_221 = arith.constant dense<0.000000e+00> : vector<1x8xf32>
    %752 = tpu.matmul %750, %751, %cst_221 {dimension_numbers = #tpu.dot_dimension_numbers<[1], [1], [0], [0], [0, 0, 1, 0], [], []>} : vector<1x32xf32>, vector<8x32xf32>, vector<1x8xf32> -> vector<1x8xf32>
    %c0_222 = arith.constant 0 : index
    %c0_223 = arith.constant 0 : index
    %753 = vector.load %arg34[%c0_222, %c0_223] : memref<1x1xf32, #tpu.memory_space<vmem>>, vector<1x1xf32>
    %754 = vector.broadcast %753 : vector<1x1xf32> to vector<1x8xf32>
    %755 = arith.addf %752, %754 : vector<1x8xf32>
    %756 = tpu.concatenate %749, %755 in 0 : vector<1x8xf32>, vector<1x8xf32> -> vector<2x8xf32>
    %c0_224 = arith.constant 0 : index
    %c0_225 = arith.constant 0 : index
    %757 = vector.load %arg35[%c0_224, %c0_225] : memref<2x8xf32, #tpu.memory_space<vmem>>, vector<2x8xf32>
    tpu.vector_store %arg35[%c0_224, %c0_225], %756 {strides = array<i32>} : memref<2x8xf32, #tpu.memory_space<vmem>>, vector<2x8xf32>,
    return
  }
}

</mosaic_0001>

<bundles_post_ra>
// kernel: tpu_custom_call.1
= control target key start
LH: loop header
LB: loop body
LE: loop exit
PB: predicated region body
PF: predicated region fallthrough
CT: control target
= control target key end

     0   :  { %s5749_s6 = smov 1   ;;  %s5750_s10 = smov 2   ;;  %s6836_s0 = inlined_call_operand.smem [shape: u32[36], index: -1, kind: input, shape index: {}] }
   0x1   :  { %s5824_s5 = sld [smem:[%s6836_s0]]   ;;  %s5751_s14 = smov 3  }
   0x2   :  { %s5829_s9 = sld [smem:[%s6836_s0 + %s5749_s6]]   ;;  %s5752_s18 = smov 4  }
   0x3   :  { %s5834_s13 = sld [smem:[%s6836_s0 + %s5750_s10]]   ;;  %s5753_s22 = smov 5  }
   0x4   :  { %s5839_s17 = sld [smem:[%s6836_s0 + %s5751_s14]]   ;;  %s5754_s26 = smov 6  }
   0x5   :  { %s5844_s21 = sld [smem:[%s6836_s0 + %s5752_s18]]   ;;  %s5755_s30 = smov 7  }
   0x6   :  { %s5849_s25 = sld [smem:[%s6836_s0 + %s5753_s22]]   ;;  %s5756_s4 = smov 8  }
   0x7   :  { %6843 = sst [smem:[#allocation51_spill]] %s5824_s5  ;;  %s5757_s10 = smov 9  }
   0x8   :  { %6844 = sst [smem:[#allocation52_spill]] %s5829_s9  ;;  %s5758_s15 = smov 10  }
   0x9   :  { %s5854_s29 = sld [smem:[%s6836_s0 + %s5754_s26]]   ;;  %s5759_s20 = smov 11  }
   0xa   :  { %6845 = sst [smem:[#allocation53_spill]] %s5839_s17  ;;  %s5760_s26 = smov 12  }
   0xb   :  { %6846 = sst [smem:[#allocation54_spill]] %s5844_s21  ;;  %s5761_s1 = smov 13  }
   0xc   :  { %s5859_s3 = sld [smem:[%s6836_s0 + %s5755_s30]]   ;;  %s5762_s7 = smov 14  }
   0xd   :  { %s5864_s8 = sld [smem:[%s6836_s0 + %s5756_s4]]   ;;  %s5764_s22 = smov 16  }
   0xe   :  { %s5869_s14 = sld [smem:[%s6836_s0 + %s5757_s10]]   ;;  %s5765_s28 = smov 17  }
   0xf   :  { %s5874_s19 = sld [smem:[%s6836_s0 + %s5758_s15]]   ;;  %s5763_s15 = smov 15  }
  0x10   :  { %s5879_s24 = sld [smem:[%s6836_s0 + %s5759_s20]]   ;;  %s5783_s16 = smov 35  }
  0x11   :  { %s5884_s30 = sld [smem:[%s6836_s0 + %s5760_s26]]  }
  0x12   :  { %s5889_s6 = sld [smem:[%s6836_s0 + %s5761_s1]]  }
  0x13   :  { %s5894_s12 = sld [smem:[%s6836_s0 + %s5762_s7]]   ;;  %s5766_s7 = smov 18  }
  0x14   :  { %6847 = sst [smem:[#allocation55_spill]] %s5869_s14 }
  0x15   :  { %s5899_s20 = sld [smem:[%s6836_s0 + %s5763_s15]]   ;;  %s5767_s15 = smov 19  }
  0x16   :  { %6848 = sst [smem:[#allocation56_spill]] %s5879_s24 }
  0x17   :  { %s5904_s27 = sld [smem:[%s6836_s0 + %s5764_s22]]   ;;  %s5768_s22 = smov 20  }
  0x18   :  { %s5909_s4 = sld [smem:[%s6836_s0 + %s5765_s28]]   ;;  %s5769_s28 = smov 21  }
  0x19   :  { %6849 = sst [smem:[#allocation57_spill]] %s5894_s12 }
  0x1a   :  { %s5914_s14 = sld [smem:[%s6836_s0 + %s5766_s7]]   ;;  %s5770_s7 = smov 22  }
  0x1b   :  { %6850 = sst [smem:[#allocation58_spill]] %s5899_s20 }
  0x1c   :  { %s5919_s20 = sld [smem:[%s6836_s0 + %s5767_s15]]   ;;  %s5771_s15 = smov 23  }
  0x1d   :  { %s5924_s24 = sld [smem:[%s6836_s0 + %s5768_s22]]   ;;  %s5772_s22 = smov 24  }
  0x1e   :  { %6851 = sst [smem:[#allocation59_spill]] %s5909_s4 }
  0x1f   :  { %s5929_s21 = sld [smem:[%s6836_s0 + %s5769_s28]]   ;;  %s5773_s28 = smov 25  }
  0x20   :  { %s5934_s5 = sld [smem:[%s6836_s0 + %s5770_s7]]   ;;  %s5774_s7 = smov 26  }
  0x21   :  { %s5939_s17 = sld [smem:[%s6836_s0 + %s5771_s15]]   ;;  %s5775_s15 = smov 27  }
  0x22   :  { %6852 = sst [smem:[#allocation60_spill]] %s5919_s20 }
  0x23   :  { %s5944_s9 = sld [smem:[%s6836_s0 + %s5772_s22]]   ;;  %s5776_s22 = smov 28  }
  0x24   :  { %s5954_s20 = sld [smem:[%s6836_s0 + %s5774_s7]]   ;;  %s5778_s7 = smov 30  }
  0x25   :  { %6853 = sst [smem:[#allocation61_spill]] %s5929_s21 }
  0x26   :  { %s5949_s21 = sld [smem:[%s6836_s0 + %s5773_s28]]   ;;  %s5777_s28 = smov 29  }
  0x27   :  { %6854 = sst [smem:[#allocation62_spill]] %s5939_s17 }
  0x28   :  { %s5959_s17 = sld [smem:[%s6836_s0 + %s5775_s15]]   ;;  %s5779_s15 = smov 31  }
  0x29   :  { %s5964_s4 = sld [smem:[%s6836_s0 + %s5776_s22]]   ;;  %s5780_s22 = smov 32  }
  0x2a   :  { %s5974_s12 = sld [smem:[%s6836_s0 + %s5778_s7]]   ;;  %s5782_s7 = smov 34  }
  0x2c   :  { %6855 = sst [smem:[#allocation63_spill]] %s5949_s21 }
  0x2d   :  { %s5969_s21 = sld [smem:[%s6836_s0 + %s5777_s28]]   ;;  %s5781_s28 = smov 33  }
  0x2e   :  { %6856 = sst [smem:[#allocation64_spill]] %s5959_s17 }
  0x2f   :  { %6857 = sst [smem:[#allocation65_spill]] %s5964_s4 }
  0x30   :  { %6859 = sst [smem:[#allocation67_spill]] %s5974_s12 }
  0x31   :  { %s5979_s17 = sld [smem:[%s6836_s0 + %s5779_s15]]  }
  0x32   :  { %s5984_s4 = sld [smem:[%s6836_s0 + %s5780_s22]]  }
  0x33   :  { %6858 = sst [smem:[#allocation66_spill]] %s5969_s21 }
  0x34   :  { %s5989_s21 = sld [smem:[%s6836_s0 + %s5781_s28]]  }
  0x35   :  { %s4354_s12 = sld [smem:[%s6836_s0 + %s5782_s7]]  }
  0x37   :  { %6860 = sst [smem:[#allocation68_spill]] %s5979_s17 }
  0x38   :  { %s5997_s17 = sld [smem:[%s6836_s0 + %s5783_s16]]  }
  0x3b   :  { %v76_v0 = vstv %s4354_s12 }
  0x3c   :  { %77 = vst [vmem:[#allocation4] sm:$0x1] %v76_v0 }
  0x3d   :  { %78 = vsyncpa [#allocation6], 0 }
  0x3e   :  { %79 = vsyncpa [#allocation9], 0 }
  0x3f   :  { %80 = vsyncpa [#allocation12], 0 }
  0x40   :  { %81 = vsyncpa [#allocation15], 0 }
  0x41   :  { %82 = vsyncpa [#allocation18], 0 }
  0x42   :  { %83 = vsyncpa [#allocation21], 0 }
  0x43   :  { %84 = vsyncpa [#allocation24], 0 }
  0x44   :  { %85 = vsyncpa [#allocation27], 0 }
  0x45   :  { %86 = vsyncpa [#allocation30], 0 }
  0x46   :  { %87 = vsyncpa [#allocation33], 0 }
  0x47   :  { %88 = vsyncpa [#allocation36], 0 }
  0x48   :  { %89 = vsyncpa [#allocation7], 0  ;;  %s5784_s22 = smov [#allocation8]   ;;  %s5785_s26 = smov [#allocation11]  }
  0x49   :  { %s114_s23 = sshll.u32 %s5784_s22, 4  ;;  %s134_s28 = sshll.u32 %s5785_s26, 4  ;;  %s115_s23 = int_to_ptr.vmem [resolvable:$true] %s114_s23  ;;  %s135_s28 = int_to_ptr.vmem [resolvable:$true] %s134_s28 }
  0x4a   :  { %s5293_s0 = scalar_lea.vmem %s115_s23, 16  ;;  %s5297_s12 = scalar_lea.vmem %s115_s23, 32 }
  0x4b   :  { %p5294_p0 = scmp.ne.s32.totalorder %s115_s23, %s5293_s0  ;;  %p5298_p1 = scmp.lt.s32.totalorder %s115_s23, %s115_s23 }
  0x4c   :  { %p5299_p2 = scmp.lt.s32.totalorder %s5297_s12, %s5293_s0 }
  0x4e   :  { %p5300_p3 = por %p5299_p2, %p5298_p1 }
  0x50   :  { %p5301_p4 = pnand %p5300_p3, %p5294_p0 }
  0x52   :  { %5304 = shalt.err (!%p5301_p4)
}
  0x53   :  { %117 = dma.hbm_to_vmem [thread:$0]  %s5849_s25, 16, %s115_s23, [#allocation9]  }
  0x54   :  { %s5313_s1 = scalar_lea.vmem %s135_s28, 16  ;;  %s5317_s2 = scalar_lea.vmem %s135_s28, 32 }
  0x55   :  { %p5314_p5 = scmp.ne.s32.totalorder %s135_s28, %s5313_s1  ;;  %p5318_p6 = scmp.lt.s32.totalorder %s135_s28, %s135_s28 }
  0x56   :  { %p5319_p7 = scmp.lt.s32.totalorder %s5317_s2, %s5313_s1 }
  0x58   :  { %p5320_p8 = por %p5319_p7, %p5318_p6 }
  0x5a   :  { %p5321_p9 = pnand %p5320_p8, %p5314_p5 }
  0x5c   :  { %5324 = shalt.err (!%p5321_p9)
}
  0x5d   :  { %137 = dma.hbm_to_vmem [thread:$0]  %s5859_s3, 16, %s135_s28, [#allocation12]  }
  0x5e   :  { %s5786_s7 = smov [#allocation14]   ;;  %s5787_s11 = smov [#allocation17]  }
  0x5f   :  { %s156_s10 = sshll.u32 %s5786_s7, 4  ;;  %s177_s16 = sshll.u32 %s5787_s11, 4  ;;  %s157_s10 = int_to_ptr.vmem [resolvable:$true] %s156_s10  ;;  %s178_s16 = int_to_ptr.vmem [resolvable:$true] %s177_s16 }
  0x60   :  { %s5333_s15 = scalar_lea.vmem %s157_s10, 16  ;;  %s5337_s18 = scalar_lea.vmem %s157_s10, 32 }
  0x61   :  { %p5334_p10 = scmp.ne.s32.totalorder %s157_s10, %s5333_s15  ;;  %p5338_p11 = scmp.lt.s32.totalorder %s157_s10, %s157_s10 }
  0x62   :  { %p5339_p12 = scmp.lt.s32.totalorder %s5337_s18, %s5333_s15 }
  0x64   :  { %p5340_p13 = por %p5339_p12, %p5338_p11 }
  0x66   :  { %p5341_p0 = pnand %p5340_p13, %p5334_p10 }
  0x68   :  { %5344 = shalt.err (!%p5341_p0)
}
  0x69   :  { %159 = dma.hbm_to_vmem [thread:$0]  %s5874_s19, 16, %s157_s10, [#allocation15]  }
  0x6a   :  { %s5353_s25 = scalar_lea.vmem %s178_s16, 512  ;;  %p5358_p2 = scmp.lt.s32.totalorder %s178_s16, %s178_s16 }
  0x6b   :  { %p5354_p1 = scmp.ne.s32.totalorder %s178_s16, %s5353_s25  ;;  %p5359_p3 = scmp.lt.s32.totalorder %s5353_s25, %s5353_s25 }
  0x6d   :  { %p5360_p4 = por %p5359_p3, %p5358_p2 }
  0x6f   :  { %p5361_p5 = pnand %p5360_p4, %p5354_p1 }
  0x71   :  { %5364 = shalt.err (!%p5361_p5)
}
  0x72   :  { %s5788_s3 = smov 128   ;;  %s5789_s22 = smov 8  }
  0x73   :  { %183 = dma.hbm_to_vmem [thread:$0]  %s5889_s6, 512, %s178_s16, [#allocation18], %s5788_s3, %s5788_s3, %s5789_s22  }
  0x74   :  { %s5790_s23 = smov [#allocation20]   ;;  %s5791_s28 = smov [#allocation23]  }
  0x75   :  { %s202_s26 = sshll.u32 %s5790_s23, 4  ;;  %s224_s0 = sshll.u32 %s5791_s28, 4  ;;  %s203_s26 = int_to_ptr.vmem [resolvable:$true] %s202_s26  ;;  %s225_s0 = int_to_ptr.vmem [resolvable:$true] %s224_s0 }
  0x76   :  { %s5373_s19 = scalar_lea.vmem %s203_s26, 16  ;;  %s5377_s12 = scalar_lea.vmem %s203_s26, 32 }
  0x77   :  { %p5374_p6 = scmp.ne.s32.totalorder %s203_s26, %s5373_s19  ;;  %p5378_p7 = scmp.lt.s32.totalorder %s203_s26, %s203_s26 }
  0x78   :  { %p5379_p8 = scmp.lt.s32.totalorder %s5377_s12, %s5373_s19 }
  0x7a   :  { %p5380_p9 = por %p5379_p8, %p5378_p7 }
  0x7c   :  { %p5381_p10 = pnand %p5380_p9, %p5374_p6 }
  0x7e   :  { %5384 = shalt.err (!%p5381_p10)
}
  0x7f   :  { %205 = dma.hbm_to_vmem [thread:$0]  %s5904_s27, 16, %s203_s26, [#allocation21]  }
  0x80   :  { %s5393_s1 = scalar_lea.vmem %s225_s0, 16  ;;  %s5397_s2 = scalar_lea.vmem %s225_s0, 32 }
  0x81   :  { %p5394_p11 = scmp.ne.s32.totalorder %s225_s0, %s5393_s1  ;;  %p5398_p12 = scmp.lt.s32.totalorder %s225_s0, %s225_s0 }
  0x82   :  { %p5399_p13 = scmp.lt.s32.totalorder %s5397_s2, %s5393_s1 }
  0x84   :  { %p5400_p0 = por %p5399_p13, %p5398_p12 }
  0x86   :  { %p5401_p1 = pnand %p5400_p0, %p5394_p11 }
  0x88   :  { %5404 = shalt.err (!%p5401_p1)
}
  0x89   :  { %227 = dma.hbm_to_vmem [thread:$0]  %s5914_s14, 16, %s225_s0, [#allocation24]  }
  0x8a   :  { %s5792_s6 = smov [#allocation26]   ;;  %s5793_s10 = smov [#allocation29]  }
  0x8b   :  { %s246_s7 = sshll.u32 %s5792_s6, 4  ;;  %s268_s11 = sshll.u32 %s5793_s10, 4  ;;  %s247_s7 = int_to_ptr.vmem [resolvable:$true] %s246_s7  ;;  %s269_s11 = int_to_ptr.vmem [resolvable:$true] %s268_s11 }
  0x8c   :  { %s5413_s16 = scalar_lea.vmem %s247_s7, 16  ;;  %s5417_s15 = scalar_lea.vmem %s247_s7, 32 }
  0x8d   :  { %p5414_p2 = scmp.ne.s32.totalorder %s247_s7, %s5413_s16  ;;  %p5418_p3 = scmp.lt.s32.totalorder %s247_s7, %s247_s7 }
  0x8e   :  { %p5419_p4 = scmp.lt.s32.totalorder %s5417_s15, %s5413_s16 }
  0x90   :  { %p5420_p5 = por %p5419_p4, %p5418_p3 }
  0x92   :  { %p5421_p6 = pnand %p5420_p5, %p5414_p2 }
  0x94   :  { %5424 = shalt.err (!%p5421_p6)
}
  0x95   :  { %249 = dma.hbm_to_vmem [thread:$0]  %s5924_s24, 16, %s247_s7, [#allocation27]  }
  0x96   :  { %s5433_s27 = scalar_lea.vmem %s269_s11, 16  ;;  %s5437_s18 = scalar_lea.vmem %s269_s11, 32 }
  0x97   :  { %p5434_p7 = scmp.ne.s32.totalorder %s269_s11, %s5433_s27  ;;  %p5438_p8 = scmp.lt.s32.totalorder %s269_s11, %s269_s11 }
  0x98   :  { %p5439_p9 = scmp.lt.s32.totalorder %s5437_s18, %s5433_s27 }
  0x9a   :  { %p5440_p10 = por %p5439_p9, %p5438_p8 }
  0x9c   :  { %p5441_p11 = pnand %p5440_p10, %p5434_p7 }
  0x9e   :  { %5444 = shalt.err (!%p5441_p11)
}
  0x9f   :  { %271 = dma.hbm_to_vmem [thread:$0]  %s5934_s5, 16, %s269_s11, [#allocation30]  }
  0xa0   :  { %s5794_s14 = smov [#allocation32]   ;;  %s5795_s23 = smov [#allocation35]  }
  0xa1   :  { %s290_s25 = sshll.u32 %s5794_s14, 4  ;;  %s310_s26 = sshll.u32 %s5795_s23, 4  ;;  %s291_s25 = int_to_ptr.vmem [resolvable:$true] %s290_s25  ;;  %s311_s26 = int_to_ptr.vmem [resolvable:$true] %s310_s26 }
  0xa2   :  { %s5453_s28 = scalar_lea.vmem %s291_s25, 16  ;;  %s5457_s0 = scalar_lea.vmem %s291_s25, 32 }
  0xa3   :  { %p5454_p12 = scmp.ne.s32.totalorder %s291_s25, %s5453_s28  ;;  %p5458_p13 = scmp.lt.s32.totalorder %s291_s25, %s291_s25 }
  0xa4   :  { %p5459_p0 = scmp.lt.s32.totalorder %s5457_s0, %s5453_s28 }
  0xa6   :  { %p5460_p1 = por %p5459_p0, %p5458_p13 }
  0xa8   :  { %p5461_p2 = pnand %p5460_p1, %p5454_p12 }
  0xaa   :  { %5464 = shalt.err (!%p5461_p2)
}
  0xab   :  { %293 = dma.hbm_to_vmem [thread:$0]  %s5944_s9, 16, %s291_s25, [#allocation33]  }
  0xac   :  { %s5473_s24 = scalar_lea.vmem %s311_s26, 16  ;;  %s5477_s19 = scalar_lea.vmem %s311_s26, 32 }
  0xad   :  { %p5474_p3 = scmp.ne.s32.totalorder %s311_s26, %s5473_s24  ;;  %p5478_p4 = scmp.lt.s32.totalorder %s311_s26, %s311_s26 }
  0xae   :  { %p5479_p5 = scmp.lt.s32.totalorder %s5477_s19, %s5473_s24 }
  0xb0   :  { %p5480_p6 = por %p5479_p5, %p5478_p4 }
  0xb2   :  { %p5481_p7 = pnand %p5480_p6, %p5474_p3 }
  0xb4   :  { %5484 = shalt.err (!%p5481_p7)
}
  0xb5   :  { %313 = dma.hbm_to_vmem [thread:$0]  %s5954_s20, 16, %s311_s26, [#allocation36]  }
  0xb6   :  { %s5796_s5 = smov [#allocation5]   ;;  %s5797_s1 = smov [#allocation10]  }
  0xb7   :  { %s100_s12 = sshll.u32 %s5796_s5, 4  ;;  %s124_s2 = sshll.u32 %s5797_s1, 4  ;;  %s101_s12 = int_to_ptr.vmem [resolvable:$true] %s100_s12  ;;  %s125_s2 = int_to_ptr.vmem [resolvable:$true] %s124_s2 }
  0xb8   :  { %s5493_s6 = scalar_lea.vmem %s101_s12, 32  ;;  %p5498_p9 = scmp.lt.s32.totalorder %s101_s12, %s101_s12 }
  0xb9   :  { %p5494_p8 = scmp.ne.s32.totalorder %s101_s12, %s5493_s6  ;;  %p5499_p10 = scmp.lt.s32.totalorder %s5493_s6, %s5493_s6 }
  0xbb   :  { %p5500_p11 = por %p5499_p10, %p5498_p9 }
  0xbd   :  { %p5501_p12 = pnand %p5500_p11, %p5494_p8 }
  0xbf   :  { %5504 = shalt.err (!%p5501_p12)
}
  0xc0   :  { %103 = dma.hbm_to_vmem [thread:$0]  %s5834_s13, 32, %s101_s12, [#allocation6]  }
  0xc1   :  { %s5513_s9 = scalar_lea.vmem %s125_s2, 16  ;;  %s5517_s7 = scalar_lea.vmem %s125_s2, 32 }
  0xc2   :  { %p5514_p13 = scmp.ne.s32.totalorder %s125_s2, %s5513_s9  ;;  %p5518_p0 = scmp.lt.s32.totalorder %s125_s2, %s125_s2 }
  0xc3   :  { %p5519_p1 = scmp.lt.s32.totalorder %s5517_s7, %s5513_s9 }
  0xc5   :  { %p5520_p2 = por %p5519_p1, %p5518_p0 }
  0xc7   :  { %p5521_p3 = pnand %p5520_p2, %p5514_p13 }
  0xc9   :  { %5524 = shalt.err (!%p5521_p3)
}
  0xca   :  { %127 = dma.hbm_to_vmem [thread:$0]  %s5854_s29, 16, %s125_s2, [#allocation9]  }
  0xcb   :  { %s5798_s20 = smov [#allocation13]   ;;  %s5799_s11 = smov [#allocation16]  }
  0xcc   :  { %s144_s10 = sshll.u32 %s5798_s20, 4  ;;  %s168_s16 = sshll.u32 %s5799_s11, 4  ;;  %s145_s10 = int_to_ptr.vmem [resolvable:$true] %s144_s10  ;;  %s169_s16 = int_to_ptr.vmem [resolvable:$true] %s168_s16 }
  0xcd   :  { %s5533_s15 = scalar_lea.vmem %s145_s10, 16  ;;  %s5537_s27 = scalar_lea.vmem %s145_s10, 32 }
  0xce   :  { %p5534_p4 = scmp.ne.s32.totalorder %s145_s10, %s5533_s15  ;;  %p5538_p5 = scmp.lt.s32.totalorder %s145_s10, %s145_s10 }
  0xcf   :  { %p5539_p6 = scmp.lt.s32.totalorder %s5537_s27, %s5533_s15 }
  0xd1   :  { %p5540_p7 = por %p5539_p6, %p5538_p5 }
  0xd3   :  { %p5541_p8 = pnand %p5540_p7, %p5534_p4 }
  0xd5   :  { %5544 = shalt.err (!%p5541_p8)
}
  0xd6   :  { %147 = dma.hbm_to_vmem [thread:$0]  %s5864_s8, 16, %s145_s10, [#allocation12]  }
  0xd7   :  { %s5553_s13 = scalar_lea.vmem %s169_s16, 16  ;;  %s5557_s18 = scalar_lea.vmem %s169_s16, 32 }
  0xd8   :  { %p5554_p9 = scmp.ne.s32.totalorder %s169_s16, %s5553_s13  ;;  %p5558_p10 = scmp.lt.s32.totalorder %s169_s16, %s169_s16 }
  0xd9   :  { %p5559_p11 = scmp.lt.s32.totalorder %s5557_s18, %s5553_s13 }
  0xdb   :  { %p5560_p12 = por %p5559_p11, %p5558_p10 }
  0xdd   :  { %p5561_p13 = pnand %p5560_p12, %p5554_p9 }
  0xdf   :  { %5564 = shalt.err (!%p5561_p13)
}
  0xe0   :  { %171 = dma.hbm_to_vmem [thread:$0]  %s5884_s30, 16, %s169_s16, [#allocation15]  }
  0xe1   :  { %s5800_s29 = smov [#allocation19]   ;;  %s5801_s25 = smov [#allocation22]  }
  0xe2   :  { %s190_s14 = sshll.u32 %s5800_s29, 4  ;;  %s211_s23 = sshll.u32 %s5801_s25, 4  ;;  %s191_s14 = int_to_ptr.vmem [resolvable:$true] %s190_s14  ;;  %s212_s23 = int_to_ptr.vmem [resolvable:$true] %s211_s23 }
  0xe3   :  { %s5573_s26 = scalar_lea.vmem %s191_s14, 16  ;;  %s5577_s28 = scalar_lea.vmem %s191_s14, 32 }
  0xe4   :  { %p5574_p0 = scmp.ne.s32.totalorder %s191_s14, %s5573_s26  ;;  %p5578_p1 = scmp.lt.s32.totalorder %s191_s14, %s191_s14 }
  0xe5   :  { %p5579_p2 = scmp.lt.s32.totalorder %s5577_s28, %s5573_s26 }
  0xe7   :  { %p5580_p3 = por %p5579_p2, %p5578_p1 }
  0xe9   :  { %p5581_p4 = pnand %p5580_p3, %p5574_p0 }
  0xeb   :  { %5584 = shalt.err (!%p5581_p4)
}
  0xec   :  { %s6861_s8 = sld [smem:[#allocation57_spill]]  ;;  %s5593_s0 = scalar_lea.vmem %s212_s23, 512 }
  0xed   :  { %p5594_p5 = scmp.ne.s32.totalorder %s212_s23, %s5593_s0  ;;  %p5598_p6 = scmp.lt.s32.totalorder %s212_s23, %s212_s23 }
  0xee   :  { %p5599_p7 = scmp.lt.s32.totalorder %s5593_s0, %s5593_s0 }
  0xf0   :  { %p5600_p8 = por %p5599_p7, %p5598_p6 }
  0xf2   :  { %193 = dma.hbm_to_vmem [thread:$0]  %s6861_s8, 16, %s191_s14, [#allocation18]  }
  0xf3   :  { %p5601_p9 = pnand %p5600_p8, %p5594_p5 }
  0xf5   :  { %5604 = shalt.err (!%p5601_p9)
}
  0xf6   :  { %s6862_s30 = sld [smem:[#allocation59_spill]]  ;;  %s5802_s24 = smov [#allocation25]  }
  0xf7   :  { %s233_s19 = sshll.u32 %s5802_s24, 4  ;;  %s5803_s5 = smov [#allocation28]   ;;  %s234_s19 = int_to_ptr.vmem [resolvable:$true] %s233_s19 }
  0xf8   :  { %s255_s12 = sshll.u32 %s5803_s5, 4  ;;  %s5613_s1 = scalar_lea.vmem %s234_s19, 512  ;;  %s256_s12 = int_to_ptr.vmem [resolvable:$true] %s255_s12 }
  0xf9   :  { %p5614_p10 = scmp.ne.s32.totalorder %s234_s19, %s5613_s1  ;;  %p5618_p11 = scmp.lt.s32.totalorder %s234_s19, %s234_s19 }
  0xfa   :  { %p5619_p12 = scmp.lt.s32.totalorder %s5613_s1, %s5613_s1 }
  0xfc   :  { %217 = dma.hbm_to_vmem [thread:$0]  %s6862_s30, 512, %s212_s23, [#allocation21], %s5788_s3, %s5788_s3, %s5789_s22  }
  0xfd   :  { %p5620_p13 = por %p5619_p12, %p5618_p11 }
  0xff   :  { %p5621_p0 = pnand %p5620_p13, %p5614_p10 }
 0x101   :  { %5624 = shalt.err (!%p5621_p0)
}
 0x102   :  { %s6863_s2 = sld [smem:[#allocation60_spill]]  ;;  %s5633_s6 = scalar_lea.vmem %s256_s12, 512 }
 0x103   :  { %p5634_p1 = scmp.ne.s32.totalorder %s256_s12, %s5633_s6  ;;  %p5638_p2 = scmp.lt.s32.totalorder %s256_s12, %s256_s12 }
 0x104   :  { %p5639_p3 = scmp.lt.s32.totalorder %s5633_s6, %s5633_s6 }
 0x106   :  { %p5640_p4 = por %p5639_p3, %p5638_p2 }
 0x108   :  { %239 = dma.hbm_to_vmem [thread:$0]  %s6863_s2, 512, %s234_s19, [#allocation24], %s5788_s3, %s5788_s3, %s5789_s22  }
 0x109   :  { %p5641_p5 = pnand %p5640_p4, %p5634_p1 }
 0x10b   :  { %5644 = shalt.err (!%p5641_p5)
}
 0x10c   :  { %s6864_s9 = sld [smem:[#allocation61_spill]]  ;;  %s5804_s7 = smov [#allocation31]  }
 0x10d   :  { %s277_s20 = sshll.u32 %s5804_s7, 4  ;;  %s5805_s10 = smov [#allocation34]   ;;  %s278_s20 = int_to_ptr.vmem [resolvable:$true] %s277_s20 }
 0x10e   :  { %s300_s11 = sshll.u32 %s5805_s10, 4  ;;  %s5653_s16 = scalar_lea.vmem %s278_s20, 512  ;;  %s301_s11 = int_to_ptr.vmem [resolvable:$true] %s300_s11 }
 0x10f   :  { %p5654_p6 = scmp.ne.s32.totalorder %s278_s20, %s5653_s16  ;;  %p5658_p7 = scmp.lt.s32.totalorder %s278_s20, %s278_s20 }
 0x110   :  { %p5659_p8 = scmp.lt.s32.totalorder %s5653_s16, %s5653_s16 }
 0x112   :  { %261 = dma.hbm_to_vmem [thread:$0]  %s6864_s9, 512, %s256_s12, [#allocation27], %s5788_s3, %s5788_s3, %s5789_s22  }
 0x113   :  { %p5660_p9 = por %p5659_p8, %p5658_p7 }
 0x115   :  { %p5661_p10 = pnand %p5660_p9, %p5654_p6 }
 0x117   :  { %5664 = shalt.err (!%p5661_p10)
}
 0x118   :  { %s6865_s15 = sld [smem:[#allocation62_spill]]  ;;  %s5673_s27 = scalar_lea.vmem %s301_s11, 16 }
 0x119   :  { %p5674_p11 = scmp.ne.s32.totalorder %s301_s11, %s5673_s27  ;;  %s5677_s13 = scalar_lea.vmem %s301_s11, 32 }
 0x11a   :  { %p5678_p12 = scmp.lt.s32.totalorder %s301_s11, %s301_s11  ;;  %p5679_p13 = scmp.lt.s32.totalorder %s5677_s13, %s5673_s27 }
 0x11c   :  { %p5680_p0 = por %p5679_p13, %p5678_p12 }
 0x11e   :  { %283 = dma.hbm_to_vmem [thread:$0]  %s6865_s15, 512, %s278_s20, [#allocation30], %s5788_s3, %s5788_s3, %s5789_s22  }
 0x11f   :  { %p5681_p1 = pnand %p5680_p0, %p5674_p11 }
 0x121   :  { %5684 = shalt.err (!%p5681_p1)
}
 0x122   :  { %s6866_s18 = sld [smem:[#allocation63_spill]]  ;;  %s5806_s29 = smov [#allocation37]  }
 0x123   :  { %s323_s14 = sshll.u32 %s5806_s29, 4  ;;  %s324_s14 = int_to_ptr.vmem [resolvable:$true] %s323_s14 }
 0x124   :  { %s5693_s25 = scalar_lea.vmem %s324_s14, 512  ;;  %p5698_p3 = scmp.lt.s32.totalorder %s324_s14, %s324_s14 }
 0x125   :  { %p5694_p2 = scmp.ne.s32.totalorder %s324_s14, %s5693_s25  ;;  %p5699_p4 = scmp.lt.s32.totalorder %s5693_s25, %s5693_s25 }
 0x127   :  { %p5700_p5 = por %p5699_p4, %p5698_p3 }
 0x128   :  { %303 = dma.hbm_to_vmem [thread:$0]  %s6866_s18, 16, %s301_s11, [#allocation33]  }
 0x129   :  { %p5701_p6 = pnand %p5700_p5, %p5694_p2 }
 0x12b   :  { %5704 = shalt.err (!%p5701_p6)
}
 0x12c   :  { %s6867_s23 = sld [smem:[#allocation66_spill]] }
 0x132   :  { %329 = dma.hbm_to_vmem [thread:$0]  %s6867_s23, 512, %s324_s14, [#allocation36], %s5788_s3, %s5788_s3, %s5789_s22  }
 0x133   :  { %5725 = dma.done.wait [#allocation6], 32  }
 0x134   :  { %5726 = vsyncadd [#allocation6], 4294967264 }
 0x135   :  { %5727 = dma.done.wait [#allocation9], 32  }
 0x136   :  { %5728 = vsyncadd [#allocation9], 4294967264 }
 0x137   :  { %5729 = dma.done.wait [#allocation12], 32  }
 0x138   :  { %5730 = vsyncadd [#allocation12], 4294967264 }
 0x139   :  { %5731 = dma.done.wait [#allocation15], 32  }
 0x13a   :  { %5732 = vsyncadd [#allocation15], 4294967264 }
 0x13b   :  { %5733 = dma.done.wait [#allocation18], 528  }
 0x13c   :  { %5734 = vsyncadd [#allocation18], 4294966768 }
 0x13d   :  { %5735 = dma.done.wait [#allocation21], 528  }
 0x13e   :  { %5736 = vsyncadd [#allocation21], 4294966768 }
 0x13f   :  { %5737 = dma.done.wait [#allocation24], 528  }
 0x140   :  { %5738 = vsyncadd [#allocation24], 4294966768 }
 0x141   :  { %5739 = dma.done.wait [#allocation27], 528  }
 0x142   :  { %5740 = vsyncadd [#allocation27], 4294966768 }
 0x143   :  { %5741 = dma.done.wait [#allocation30], 528  }
 0x144   :  { %5742 = vsyncadd [#allocation30], 4294966768 }
 0x145   :  { %5743 = dma.done.wait [#allocation33], 32  }
 0x146   :  { %5744 = vsyncadd [#allocation33], 4294967264 }
 0x147   :  { %5745 = dma.done.wait [#allocation36], 528  }
 0x148   :  { %5746 = vsyncadd [#allocation36], 4294966768  ;;  %s6868_s3 = sld [smem:[#allocation52_spill]]  ;;  %v5807_v1 = vmov 0   ;;  %vm426_vm0 = vcmask 523264   ;;  %vm558_vm1 = vcmask 130048  }
 0x149   :  { %s6869_s22 = sld [smem:[#allocation53_spill]]  ;;  %5119 = vset.pattern.permute.xlu1 %v5807_v1  ;;  %5118 = vset.pattern.permute.xlu0 %v5807_v1  ;;  %v4367_v26 = vld [vmem:[#allocation11] ss:$0 sm:$0xff]  ;;  %v4368_v29 = vld [vmem:[#allocation13] ss:$0 sm:$0xff]  ;;  %s5809_s30 = smov 16  }
 0x14a   :  { %s6870_s26 = sld [smem:[#allocation51_spill]]  ;;  %vm5810_vm2 = vmmov 0   ;;  %vm955_vm3 = vcmask 261120   ;;  %vm1085_vm4 = vcmask 785408   ;;  %s5811_s24 = smov 64   ;;  %vm3145_vm5 = vcmask 64512  }
 0x14b   :  { %s6871_s28 = sld [smem:[#allocation54_spill]]  ;;  %s5812_s5 = smov 96   ;;  %vm4292_vm6 = vcmask 1040384   ;;  %vm4294_vm7 = vcmask 58368  }
 0x14c   :  { %s6872_s8 = sld [smem:[#allocation56_spill]]  ;;  %s5813_s12 = smov 32  }
 0x14d   :  { %s6873_s0 = sld [smem:[#allocation55_spill]]  ;;  %s5814_s1 = smov 112  }
 0x14e   :  { %v694_v2 = vld [vmem:[%s6868_s3 + $0x10] sm:$0xff]  ;;  %v692_v3 = vld [vmem:[%s6868_s3] sm:$0xff]  ;;  %v695_v6 = vld [vmem:[%s6868_s3 + $0x18] sm:$0xff]  ;;  %s6874_s19 = sld [smem:[#allocation58_spill]] }
 0x14f   :  { %v418_v4 = vld [vmem:[%s6869_s22 + $0x38] sm:$0xff]  ;;  %713 = vperm.xlu1 %5119, %v694_v2   ;;  %703 = vperm.xlu0 %5118, %v692_v3   ;;  %v417_v5 = vld [vmem:[%s6869_s22 + $0x30] sm:$0xff]  ;;  %v693_v7 = vld [vmem:[%s6868_s3 + $0x8] sm:$0xff]  ;;  %s6875_s2 = sld [smem:[#allocation64_spill]] }
 0x150   :  { %4647 = vmatprep.subr.mxu0 %v418_v4  ;;  %v416_v8 = vld [vmem:[%s6869_s22 + $0x28] sm:$0xff]  ;;  %v415_v9 = vld [vmem:[%s6869_s22 + $0x20] sm:$0xff]  ;;  %v414_v13 = vld [vmem:[%s6869_s22 + $0x18] sm:$0xff]  ;;  %s6876_s6 = sld [smem:[#allocation65_spill]] }
 0x151   :  { %4648 = vmatpush3.msra.mxu0 %v418_v4  ;;  %v403_v10 = vld [vmem:[%s6870_s26] sm:$0xff]  ;;  %v697_v11 = vld [vmem:[%s6868_s3 + $0x28] sm:$0xff]  ;;  %v413_v14 = vld [vmem:[%s6869_s22 + $0x10] sm:$0xff]  ;;  %s6877_s9 = sld [smem:[#allocation67_spill]] }
 0x152   :  { %4649 = vmatprep.subr.mxu0 %v417_v5  ;;  %v696_v12 = vld [vmem:[%s6868_s3 + $0x20] sm:$0xff]  ;;  %4663 = vmatprep.mubr.msk.f32.mxu0 %vm426_vm0, %v403_v10  ;;  %v699_v15 = vld [vmem:[%s6868_s3 + $0x38] sm:$0xff]  ;;  %v698_v16 = vld [vmem:[%s6868_s3 + $0x30] sm:$0xff]  ;;  %s6878_s7 = sld [smem:[#allocation68_spill]] }
 0x153   :  { %4650 = vmatpush3.msra.mxu0 %v417_v5  ;;  %718 = vperm.xlu1 %5119, %v695_v6   ;;  %v412_v17 = vld [vmem:[%s6869_s22 + $0x8] sm:$0xff]  ;;  %v411_v18 = vld [vmem:[%s6869_s22] sm:$0xff]  ;;  %v405_v20 = vld [vmem:[%s6870_s26 + $0x10] sm:$0xff] }
 0x154   :  { %708 = vperm.xlu0 %5118, %v693_v7   ;;  %4651 = vmatprep.subr.mxu0 %v416_v8  ;;  %v404_v19 = vld [vmem:[%s6870_s26 + $0x8] sm:$0xff]  ;;  %v406_v21 = vld [vmem:[%s6870_s26 + $0x18] sm:$0xff]  ;;  %v407_v22 = vld [vmem:[%s6870_s26 + $0x20] sm:$0xff] }
 0x155   :  { %4652 = vmatpush3.msra.mxu0 %v416_v8  ;;  %v408_v23 = vld [vmem:[%s6870_s26 + $0x28] sm:$0xff]  ;;  %v409_v24 = vld [vmem:[%s6870_s26 + $0x30] sm:$0xff]  ;;  %v410_v25 = vld [vmem:[%s6870_s26 + $0x38] sm:$0xff] }
 0x156   :  { %4653 = vmatprep.subr.mxu0 %v415_v9  ;;  %v4356_v60 = vld [vmem:[%s6871_s28] ss:$0 sm:$0xff] }
 0x157   :  { %4654 = vmatpush3.msra.mxu0 %v415_v9  ;;  %728 = vperm.xlu1 %5119, %v697_v11  }
 0x158   :  { %723 = vperm.xlu0 %5118, %v696_v12   ;;  %4655 = vmatprep.subr.mxu0 %v414_v13 }
 0x159   :  { %4656 = vmatpush3.msra.mxu0 %v414_v13 }
 0x15a   :  { %4657 = vmatprep.subr.mxu0 %v413_v14 }
 0x15b   :  { %4658 = vmatpush3.msra.mxu0 %v413_v14  ;;  %738 = vperm.xlu1 %5119, %v699_v15  }
 0x15c   :  { %733 = vperm.xlu0 %5118, %v698_v16   ;;  %4659 = vmatprep.subr.mxu0 %v412_v17 }
 0x15d   :  { %4660 = vmatpush3.msra.mxu0 %v412_v17 }
 0x15e   :  { %4661 = vmatprep.subr.mxu0 %v411_v18 }
 0x15f   :  { %4662 = vmatpush3.msra.mxu0 %v411_v18 }
 0x160   :  { %4664 = vmatmul.mubr.msk.f32.vlgmr.msra.gmra.mxu0 %vm426_vm0, %v404_v19 }
 0x161   :  { %4666 = vmatprep.mubr.msk.f32.mxu0 %vm426_vm0, %v405_v20 }
 0x164   :  { %4667 = vmatmul.mubr.msk.f32.gmra.mxu0 %vm426_vm0, %v406_v21 }
 0x165   :  { %4669 = vmatprep.mubr.msk.f32.mxu0 %vm426_vm0, %v407_v22 }
 0x168   :  { %4670 = vmatmul.mubr.msk.f32.gmra.mxu0 %vm426_vm0, %v408_v23 }
 0x169   :  { %4672 = vmatprep.mubr.msk.f32.mxu0 %vm426_vm0, %v409_v24 }
 0x16c   :  { %4673 = vmatmul.mubr.msk.f32.gmra.mxu0 %vm426_vm0, %v410_v25 }
 0x1ca   :  { %v714_v27 = vpop.permute.xlu1 %713  ;;  %v704_v28 = vpop.permute.xlu0 %703 }
 0x1cb   :  { %v749_v30 = vmul.f32 %v4367_v26, %v714_v27  ;;  %v747_v31 = vmul.f32 %v4367_v26, %v704_v28 }
 0x1cd   :  { %v6070_v32 = vadd.f32 %v4368_v29, %v747_v31  ;;  %v6072_v33 = vadd.f32 %v4368_v29, %v749_v30 }
 0x1ce   :  { %v719_v34 = vpop.permute.xlu1 %718 }
 0x1cf   :  { %v750_v35 = vmul.f32 %v4367_v26, %v719_v34  ;;  %v709_v36 = vpop.permute.xlu0 %708  ;;  %v772_v37 = vsel %vm558_vm1, %v6070_v32, 0.0  ;;  %v778_v39 = vsel %vm558_vm1, %v6072_v33, 0.0 }
 0x1d0   :  { %v748_v38 = vmul.f32 %v4367_v26, %v709_v36  ;;  %773 = vadd.xlane.f32.xlu0 %v772_v37 }
 0x1d1   :  { %v6080_v44 = vadd.f32 %v4368_v29, %v750_v35 }
 0x1d2   :  { %v729_v40 = vpop.permute.xlu1 %728  ;;  %v6078_v41 = vadd.f32 %v4368_v29, %v748_v38 }
 0x1d3   :  { %v752_v42 = vmul.f32 %v4367_v26, %v729_v40  ;;  %v724_v43 = vpop.permute.xlu0 %723  ;;  %v781_v51 = vsel %vm558_vm1, %v6080_v44, 0.0 }
 0x1d4   :  { %v751_v45 = vmul.f32 %v4367_v26, %v724_v43  ;;  %779 = vadd.xlane.f32.xlu0 %v778_v39  ;;  %v775_v46 = vsel %vm558_vm1, %v6078_v41, 0.0 }
 0x1d5   :  { %776 = vadd.xlane.f32.xlu1 %v775_v46  ;;  %v6088_v52 = vadd.f32 %v4368_v29, %v752_v42 }
 0x1d6   :  { %v739_v47 = vpop.permute.xlu1 %738  ;;  %v6084_v48 = vadd.f32 %v4368_v29, %v751_v45 }
 0x1d7   :  { %v754_v49 = vmul.f32 %v4367_v26, %v739_v47  ;;  %v734_v50 = vpop.permute.xlu0 %733  ;;  %v787_v56 = vsel %vm558_vm1, %v6088_v52, 0.0 }
 0x1d8   :  { %v753_v53 = vmul.f32 %v4367_v26, %v734_v50  ;;  %782 = vadd.xlane.f32.xlu0 %v781_v51  ;;  %v784_v54 = vsel %vm558_vm1, %v6084_v48, 0.0 }
 0x1d9   :  { %785 = vadd.xlane.f32.xlu1 %v784_v54  ;;  %v6096_v57 = vadd.f32 %v4368_v29, %v754_v49 }
 0x1da   :  { %v6092_v55 = vadd.f32 %v4368_v29, %v753_v53 }
 0x1db   :  { %v793_v59 = vsel %vm558_vm1, %v6096_v57, 0.0 }
 0x1dc   :  { %788 = vadd.xlane.f32.xlu0 %v787_v56  ;;  %v790_v58 = vsel %vm558_vm1, %v6092_v55, 0.0 }
 0x1dd   :  { %791 = vadd.xlane.f32.xlu1 %v790_v58 }
 0x1e0   :  { %794 = vadd.xlane.f32.xlu0 %v793_v59 }
 0x220   :  { %v4665_v61 = vpop.f32.mrf.mxu0 }
 0x221   :  { %v6103_v62 = vadd.f32 %v4665_v61, %v4356_v60 }
 0x222   :  { %v517_v63 = vpop.f32.mrf.mxu0 }
 0x223   :  { %v6105_v0 = vadd.f32 %v4356_v60, %v517_v63  ;;  %v562_v1 = vsel %vm558_vm1, %v6103_v62, 0.0 }
 0x224   :  { %563 = vadd.xlane.f32.xlu0 %v562_v1  ;;  %v4668_v2 = vpop.f32.mrf.mxu0 }
 0x225   :  { %v6109_v3 = vadd.f32 %v4668_v2, %v4356_v60  ;;  %v559_v4 = vsel %vm558_vm1, %v6105_v0, 0.0 }
 0x226   :  { %v527_v5 = vpop.f32.mrf.mxu0  ;;  %560 = vadd.xlane.f32.xlu1 %v559_v4 }
 0x227   :  { %v6113_v6 = vadd.f32 %v4356_v60, %v527_v5  ;;  %v568_v7 = vsel %vm558_vm1, %v6109_v3, 0.0 }
 0x228   :  { %569 = vadd.xlane.f32.xlu0 %v568_v7  ;;  %v4671_v8 = vpop.f32.mrf.mxu0 }
 0x229   :  { %v6117_v9 = vadd.f32 %v4671_v8, %v4356_v60  ;;  %v565_v10 = vsel %vm558_vm1, %v6113_v6, 0.0 }
 0x22a   :  { %v537_v11 = vpop.f32.mrf.mxu0  ;;  %566 = vadd.xlane.f32.xlu1 %v565_v10 }
 0x22b   :  { %v6121_v12 = vadd.f32 %v4356_v60, %v537_v11  ;;  %v574_v13 = vsel %vm558_vm1, %v6117_v9, 0.0 }
 0x22c   :  { %575 = vadd.xlane.f32.xlu0 %v574_v13  ;;  %v4674_v14 = vpop.f32.mrf.mxu0 }
 0x22d   :  { %v6125_v15 = vadd.f32 %v4674_v14, %v4356_v60  ;;  %v571_v16 = vsel %vm558_vm1, %v6121_v12, 0.0 }
 0x22e   :  { %v547_v17 = vpop.f32.mrf.mxu0  ;;  %572 = vadd.xlane.f32.xlu1 %v571_v16 }
 0x22f   :  { %v6129_v18 = vadd.f32 %v4356_v60, %v547_v17  ;;  %v580_v19 = vsel %vm558_vm1, %v6125_v15, 0.0 }
 0x230   :  { %581 = vadd.xlane.f32.xlu0 %v580_v19 }
 0x231   :  { %v577_v20 = vsel %vm558_vm1, %v6129_v18, 0.0 }
 0x232   :  { %578 = vadd.xlane.f32.xlu1 %v577_v20 }
 0x259   :  { %v774_v21 = vpop.xlane.xlu0 %773 }
 0x25a   :  { %v796_v22 = vmul.f32 0.0625, %v774_v21 }
 0x25c   :  { %v6136_v23 = vsub.f32 %v6070_v32, %v796_v22 }
 0x25d   :  { %v780_v24 = vpop.xlane.xlu0 %779 }
 0x25e   :  { %v777_v25 = vpop.xlane.xlu1 %776  ;;  %v798_v26 = vmul.f32 0.0625, %v780_v24  ;;  %v812_v27 = vmul.f32 %v6136_v23, %v6136_v23 }
 0x25f   :  { %v797_v28 = vmul.f32 0.0625, %v777_v25 }
 0x260   :  { %v6141_v29 = vsub.f32 %v6072_v33, %v798_v26  ;;  %v820_v30 = vsel %vm558_vm1, %v812_v27, 0.0 }
 0x261   :  { %v6145_v31 = vsub.f32 %v6078_v41, %v797_v28  ;;  %v783_v34 = vpop.xlane.xlu0 %782  ;;  %821 = vadd.xlane.f32.xlu1 %v820_v30 }
 0x262   :  { %v786_v35 = vpop.xlane.xlu1 %785  ;;  %v799_v32 = vmul.f32 0.0625, %v783_v34  ;;  %v814_v36 = vmul.f32 %v6141_v29, %v6141_v29 }
 0x263   :  { %v800_v37 = vmul.f32 0.0625, %v786_v35  ;;  %v813_v38 = vmul.f32 %v6145_v31, %v6145_v31 }
 0x264   :  { %v6152_v39 = vsub.f32 %v6080_v44, %v799_v32  ;;  %v826_v33 = vsel %vm558_vm1, %v814_v36, 0.0 }
 0x265   :  { %v6156_v40 = vsub.f32 %v6084_v48, %v800_v37  ;;  %v789_v41 = vpop.xlane.xlu0 %788  ;;  %v823_v42 = vsel %vm558_vm1, %v813_v38, 0.0  ;;  %827 = vadd.xlane.f32.xlu1 %v826_v33 }
 0x266   :  { %v792_v43 = vpop.xlane.xlu1 %791  ;;  %v801_v45 = vmul.f32 0.0625, %v789_v41  ;;  %824 = vadd.xlane.f32.xlu0 %v823_v42  ;;  %v815_v46 = vmul.f32 %v6152_v39, %v6152_v39 }
 0x267   :  { %v802_v47 = vmul.f32 0.0625, %v792_v43  ;;  %v816_v44 = vmul.f32 %v6156_v40, %v6156_v40  ;;  %v947_v43 = vld [vmem:[%s6872_s8 + $0x18] sm:$0xff] }
 0x268   :  { %v6164_v49 = vsub.f32 %v6088_v52, %v801_v45  ;;  %v829_v48 = vsel %vm558_vm1, %v815_v46, 0.0  ;;  %v946_v45 = vld [vmem:[%s6872_s8 + $0x10] sm:$0xff]  ;;  %4675 = vmatprep.subr.mxu1 %v947_v43 }
 0x269   :  { %v6168_v50 = vsub.f32 %v6092_v55, %v802_v47  ;;  %v795_v51 = vpop.xlane.xlu0 %794  ;;  %v832_v53 = vsel %vm558_vm1, %v816_v44, 0.0  ;;  %4676 = vmatpush3.msra.mxu1 %v947_v43 }
 0x26a   :  { %v803_v54 = vmul.f32 0.0625, %v795_v51  ;;  %830 = vadd.xlane.f32.xlu0 %v829_v48  ;;  %833 = vadd.xlane.f32.xlu1 %v832_v53  ;;  %v817_v56 = vmul.f32 %v6164_v49, %v6164_v49 }
 0x26b   :  { %v818_v58 = vmul.f32 %v6168_v50, %v6168_v50  ;;  %4677 = vmatprep.subr.mxu1 %v946_v45 }
 0x26c   :  { %v6176_v52 = vsub.f32 %v6096_v57, %v803_v54  ;;  %v835_v59 = vsel %vm558_vm1, %v817_v56, 0.0  ;;  %4678 = vmatpush3.msra.mxu1 %v946_v45 }
 0x26d   :  { %v838_v55 = vsel %vm558_vm1, %v818_v58, 0.0 }
 0x26e   :  { %836 = vadd.xlane.f32.xlu0 %v835_v59  ;;  %839 = vadd.xlane.f32.xlu1 %v838_v55  ;;  %v819_v60 = vmul.f32 %v6176_v52, %v6176_v52 }
 0x270   :  { %v841_v61 = vsel %vm558_vm1, %v819_v60, 0.0 }
 0x272   :  { %842 = vadd.xlane.f32.xlu0 %v841_v61  ;;  %v945_v61 = vld [vmem:[%s6872_s8 + $0x8] sm:$0xff] }
 0x273   :  { %4679 = vmatprep.subr.mxu1 %v945_v61 }
 0x274   :  { %4680 = vmatpush3.msra.mxu1 %v945_v61 }
 0x2ad   :  { %v564_v63 = vpop.xlane.xlu0 %563 }
 0x2ae   :  { %v585_v1 = vmul.f32 0.0625, %v564_v63 }
 0x2af   :  { %v561_v2 = vpop.xlane.xlu1 %560 }
 0x2b0   :  { %v6184_v4 = vsub.f32 %v6103_v62, %v585_v1  ;;  %v584_v57 = vmul.f32 0.0625, %v561_v2 }
 0x2b1   :  { %v570_v5 = vpop.xlane.xlu0 %569 }
 0x2b2   :  { %v6187_v7 = vsub.f32 %v6105_v0, %v584_v57  ;;  %v587_v8 = vmul.f32 0.0625, %v570_v5  ;;  %v601_v10 = vmul.f32 %v6184_v4, %v6184_v4  ;;  %v944_v5 = vld [vmem:[%s6872_s8] sm:$0xff] }
 0x2b3   :  { %v567_v11 = vpop.xlane.xlu1 %566  ;;  %4681 = vmatprep.subr.mxu1 %v944_v5 }
 0x2b4   :  { %v6192_v13 = vsub.f32 %v6109_v3, %v587_v8  ;;  %v586_v14 = vmul.f32 0.0625, %v567_v11  ;;  %v611_v16 = vsel %vm558_vm1, %v601_v10, 0.0  ;;  %v600_v62 = vmul.f32 %v6187_v7, %v6187_v7  ;;  %4682 = vmatpush3.msra.mxu1 %v944_v5 }
 0x2b5   :  { %v576_v17 = vpop.xlane.xlu0 %575  ;;  %612 = vadd.xlane.f32.xlu0 %v611_v16 }
 0x2b6   :  { %v6198_v19 = vsub.f32 %v6113_v6, %v586_v14  ;;  %v589_v0 = vmul.f32 0.0625, %v576_v17  ;;  %v608_v20 = vsel %vm558_vm1, %v600_v62, 0.0  ;;  %v603_v21 = vmul.f32 %v6192_v13, %v6192_v13 }
 0x2b7   :  { %609 = vadd.xlane.f32.xlu1 %v608_v20  ;;  %v573_v3 = vpop.xlane.xlu1 %572 }
 0x2b8   :  { %v6204_v22 = vsub.f32 %v6117_v9, %v589_v0  ;;  %v588_v24 = vmul.f32 0.0625, %v573_v3  ;;  %v617_v25 = vsel %vm558_vm1, %v603_v21, 0.0  ;;  %v602_v26 = vmul.f32 %v6198_v19, %v6198_v19  ;;  %v4369_v0 = vld [vmem:[%s6873_s0] ss:$0 sm:$0xff] }
 0x2b9   :  { %618 = vadd.xlane.f32.xlu0 %v617_v25  ;;  %v582_v6 = vpop.xlane.xlu0 %581  ;;  %v5808_v21 = vmov 0.0  }
 0x2ba   :  { %v6210_v27 = vsub.f32 %v6121_v12, %v588_v24  ;;  %v591_v28 = vmul.f32 0.0625, %v582_v6  ;;  %v614_v30 = vsel %vm558_vm1, %v602_v26, 0.0  ;;  %v605_v34 = vmul.f32 %v6204_v22, %v6204_v22  ;;  %4695 = vmatprep.subr.mxu1 %v5808_v21  ;;  %4706 = vmatprep.subr.mxu0 %v5808_v21  ;;  %v4370_v24 = vld [vmem:[#allocation14] ss:$0 sm:$0xff] }
 0x2bb   :  { %615 = vadd.xlane.f32.xlu1 %v614_v30  ;;  %v579_v9 = vpop.xlane.xlu1 %578  ;;  %4722 = vmatprep.mubr.msk.f32.mxu0 %vm5810_vm2, %v5808_v21 }
 0x2bc   :  { %v6216_v35 = vsub.f32 %v6125_v15, %v591_v28  ;;  %v590_v32 = vmul.f32 0.0625, %v579_v9  ;;  %v623_v36 = vsel %vm558_vm1, %v605_v34, 0.0  ;;  %v604_v12 = vmul.f32 %v6210_v27, %v6210_v27 }
 0x2bd   :  { %624 = vadd.xlane.f32.xlu0 %v623_v36 }
 0x2be   :  { %v6222_v37 = vsub.f32 %v6129_v18, %v590_v32  ;;  %v620_v38 = vsel %vm558_vm1, %v604_v12, 0.0  ;;  %v607_v33 = vmul.f32 %v6216_v35, %v6216_v35 }
 0x2bf   :  { %621 = vadd.xlane.f32.xlu1 %v620_v38 }
 0x2c0   :  { %v629_v41 = vsel %vm558_vm1, %v607_v33, 0.0  ;;  %v606_v15 = vmul.f32 %v6222_v37, %v6222_v37 }
 0x2c1   :  { %630 = vadd.xlane.f32.xlu0 %v629_v41 }
 0x2c2   :  { %v626_v42 = vsel %vm558_vm1, %v606_v15, 0.0 }
 0x2c3   :  { %627 = vadd.xlane.f32.xlu1 %v626_v42 }
 0x2ea   :  { %v822_v18 = vpop.xlane.xlu1 %821 }
 0x2eb   :  { %v844_v46 = vmul.f32 0.0625, %v822_v18 }
 0x2ed   :  { %v852_v47 = vadd.f32 1e-05, %v844_v46 }
 0x2ee   :  { %v828_v44 = vpop.xlane.xlu1 %827 }
 0x2ef   :  { %5120 = vrsqrt.f32 %v852_v47  ;;  %v825_v48 = vpop.xlane.xlu0 %824  ;;  %v846_v51 = vmul.f32 0.0625, %v828_v44 }
 0x2f0   :  { %v845_v53 = vmul.f32 0.0625, %v825_v48 }
 0x2f1   :  { %v854_v54 = vadd.f32 1e-05, %v846_v51 }
 0x2f2   :  { %v853_v56 = vadd.f32 1e-05, %v845_v53 }
 0x2f3   :  { %5122 = vrsqrt.f32 %v854_v54  ;;  %v831_v58 = vpop.xlane.xlu0 %830  ;;  %v834_v59 = vpop.xlane.xlu1 %833 }
 0x2f4   :  { %5124 = vrsqrt.f32 %v853_v56  ;;  %v847_v55 = vmul.f32 0.0625, %v831_v58  ;;  %v848_v60 = vmul.f32 0.0625, %v834_v59 }
 0x2f6   :  { %v855_v63 = vadd.f32 1e-05, %v847_v55  ;;  %v856_v1 = vadd.f32 1e-05, %v848_v60 }
 0x2f7   :  { %v837_v2 = vpop.xlane.xlu0 %836  ;;  %v840_v57 = vpop.xlane.xlu1 %839 }
 0x2f8   :  { %5126 = vrsqrt.f32 %v855_v63  ;;  %v849_v8 = vmul.f32 0.0625, %v837_v2  ;;  %v850_v10 = vmul.f32 0.0625, %v840_v57 }
 0x2f9   :  { %5128 = vrsqrt.f32 %v856_v1 }
 0x2fa   :  { %v857_v11 = vadd.f32 1e-05, %v849_v8  ;;  %v858_v14 = vadd.f32 1e-05, %v850_v10 }
 0x2fb   :  { %v843_v16 = vpop.xlane.xlu0 %842 }
 0x2fc   :  { %v5121_v62 = vpop.eup %5120  ;;  %5130 = vrsqrt.f32 %v857_v11  ;;  %v851_v17 = vmul.f32 0.0625, %v843_v16 }
 0x2fd   :  { %5132 = vrsqrt.f32 %v858_v14  ;;  %v868_v20 = vmul.f32 %v5121_v62, %v6136_v23 }
 0x2fe   :  { %v859_v3 = vadd.f32 1e-05, %v851_v17 }
 0x2ff   :  { %v882_v25 = vmul.f32 %v4369_v0, %v868_v20 }
 0x300   :  { %v5123_v26 = vpop.eup %5122  ;;  %5134 = vrsqrt.f32 %v859_v3 }
 0x301   :  { %v5125_v6 = vpop.eup %5124  ;;  %v896_v28 = vadd.f32 %v4370_v24, %v882_v25  ;;  %v870_v30 = vmul.f32 %v5123_v26, %v6141_v29 }
 0x302   :  { %v869_v34 = vmul.f32 %v5125_v6, %v6145_v31 }
 0x303   :  { %912 = vrot.lane.b32.xlu1 %v896_v28, %s5809_s30  ;;  %v884_v23 = vmul.f32 %v4369_v0, %v870_v30  ;;  %v4365_v28 = vld [vmem:[#allocation8] ss:$0 sm:$0xff] }
 0x304   :  { %v883_v9 = vmul.f32 %v4369_v0, %v869_v34 }
 0x305   :  { %v5127_v32 = vpop.eup %5126  ;;  %v898_v36 = vadd.f32 %v4370_v24, %v884_v23 }
 0x306   :  { %v5129_v12 = vpop.eup %5128  ;;  %v897_v38 = vadd.f32 %v4370_v24, %v883_v9  ;;  %v871_v33 = vmul.f32 %v5127_v32, %v6152_v39 }
 0x307   :  { %916 = vrot.lane.b32.xlu1 %v898_v36, %s5809_s30  ;;  %v872_v41 = vmul.f32 %v5129_v12, %v6156_v40  ;;  %v4366_v36 = vld [vmem:[#allocation10] ss:$0 sm:$0xff] }
 0x308   :  { %914 = vrot.lane.b32.xlu0 %v897_v38, %s5809_s30  ;;  %v885_v29 = vmul.f32 %v4369_v0, %v871_v33 }
 0x309   :  { %v5131_v15 = vpop.eup %5130  ;;  %v886_v31 = vmul.f32 %v4369_v0, %v872_v41 }
 0x30a   :  { %v5133_v42 = vpop.eup %5132  ;;  %v899_v43 = vadd.f32 %v4370_v24, %v885_v29  ;;  %v873_v45 = vmul.f32 %v5131_v15, %v6164_v49 }
 0x30b   :  { %v900_v18 = vadd.f32 %v4370_v24, %v886_v31  ;;  %v874_v39 = vmul.f32 %v5133_v42, %v6168_v50 }
 0x30c   :  { %918 = vrot.lane.b32.xlu1 %v899_v43, %s5809_s30  ;;  %v887_v46 = vmul.f32 %v4369_v0, %v873_v45 }
 0x30d   :  { %v5135_v40 = vpop.eup %5134  ;;  %920 = vrot.lane.b32.xlu0 %v900_v18, %s5809_s30  ;;  %v888_v47 = vmul.f32 %v4369_v0, %v874_v39 }
 0x30e   :  { %v901_v44 = vadd.f32 %v4370_v24, %v887_v46  ;;  %v875_v48 = vmul.f32 %v5135_v40, %v6176_v52 }
 0x30f   :  { %v902_v51 = vadd.f32 %v4370_v24, %v888_v47  ;;  %v6265_v47 = vld [vmem:[#allocation17 + $0x18] sm:$0xff] }
 0x310   :  { %922 = vrot.lane.b32.xlu1 %v901_v44, %s5809_s30  ;;  %v889_v53 = vmul.f32 %v4369_v0, %v875_v48  ;;  %v6270_v48 = vld [vmem:[#allocation17 + $0x10] sm:$0xff] }
 0x311   :  { %924 = vrot.lane.b32.xlu0 %v902_v51, %s5809_s30 }
 0x312   :  { %v903_v49 = vadd.f32 %v4370_v24, %v889_v53 }
 0x314   :  { %926 = vrot.lane.b32.xlu1 %v903_v49, %s5809_s30 }
 0x33e   :  { %v613_v54 = vpop.xlane.xlu0 %612 }
 0x33f   :  { %v633_v61 = vmul.f32 0.0625, %v613_v54 }
 0x340   :  { %v610_v50 = vpop.xlane.xlu1 %609 }
 0x341   :  { %v632_v58 = vmul.f32 0.0625, %v610_v50  ;;  %v641_v2 = vadd.f32 1e-05, %v633_v61 }
 0x342   :  { %v619_v59 = vpop.xlane.xlu0 %618 }
 0x343   :  { %v640_v55 = vadd.f32 1e-05, %v632_v58  ;;  %v635_v57 = vmul.f32 0.0625, %v619_v59 }
 0x344   :  { %v616_v56 = vpop.xlane.xlu1 %615 }
 0x345   :  { %v634_v60 = vmul.f32 0.0625, %v616_v56  ;;  %5136 = vrsqrt.f32 %v640_v55  ;;  %v643_v10 = vadd.f32 1e-05, %v635_v57  ;;  %v6283_v55 = vld [vmem:[#allocation17] sm:$0xff] }
 0x346   :  { %v625_v1 = vpop.xlane.xlu0 %624 }
 0x347   :  { %v642_v52 = vadd.f32 1e-05, %v634_v60  ;;  %v637_v11 = vmul.f32 0.0625, %v625_v1 }
 0x348   :  { %v622_v63 = vpop.xlane.xlu1 %621 }
 0x349   :  { %v636_v5 = vmul.f32 0.0625, %v622_v63  ;;  %5138 = vrsqrt.f32 %v642_v52  ;;  %v645_v17 = vadd.f32 1e-05, %v637_v11 }
 0x34a   :  { %5140 = vrsqrt.f32 %v641_v2  ;;  %v631_v16 = vpop.xlane.xlu0 %630 }
 0x34b   :  { %v644_v14 = vadd.f32 1e-05, %v636_v5  ;;  %5142 = vrsqrt.f32 %v643_v10  ;;  %v639_v0 = vmul.f32 0.0625, %v631_v16  ;;  %v4371_v10 = vld [vmem:[#allocation16] ss:$0 sm:$0xff] }
 0x34c   :  { %v628_v8 = vpop.xlane.xlu1 %627 }
 0x34d   :  { %v638_v62 = vmul.f32 0.0625, %v628_v8  ;;  %5144 = vrsqrt.f32 %v644_v14  ;;  %v647_v24 = vadd.f32 1e-05, %v639_v0 }
 0x34e   :  { %5146 = vrsqrt.f32 %v645_v17 }
 0x34f   :  { %v646_v20 = vadd.f32 1e-05, %v638_v62 }
 0x351   :  { %5148 = vrsqrt.f32 %v646_v20 }
 0x352   :  { %v5137_v3 = vpop.eup %5136  ;;  %5150 = vrsqrt.f32 %v647_v24 }
 0x353   :  { %v656_v25 = vmul.f32 %v5137_v3, %v6187_v7 }
 0x355   :  { %v670_v30 = vmul.f32 %v4365_v28, %v656_v25 }
 0x356   :  { %v5139_v26 = vpop.eup %5138 }
 0x357   :  { %v5141_v6 = vpop.eup %5140  ;;  %v658_v34 = vmul.f32 %v5139_v26, %v6198_v19  ;;  %v684_v12 = vadd.f32 %v4366_v36, %v670_v30 }
 0x358   :  { %v657_v23 = vmul.f32 %v5141_v6, %v6184_v4  ;;  %v5143_v9 = vpop.eup %5142 }
 0x359   :  { %v672_v38 = vmul.f32 %v4365_v28, %v658_v34  ;;  %v659_v29 = vmul.f32 %v5143_v9, %v6192_v13 }
 0x35a   :  { %v5145_v32 = vpop.eup %5144  ;;  %v671_v41 = vmul.f32 %v4365_v28, %v657_v23  ;;  %v6315_v23 = vld [vmem:[#allocation19] ss:$0 sm:$0xff] }
 0x35b   :  { %v5147_v7 = vpop.eup %5146  ;;  %v660_v31 = vmul.f32 %v5145_v32, %v6210_v27  ;;  %v686_v19 = vadd.f32 %v4366_v36, %v672_v38  ;;  %v673_v45 = vmul.f32 %v4365_v28, %v659_v29 }
 0x35c   :  { %v685_v4 = vadd.f32 %v4366_v36, %v671_v41  ;;  %v661_v18 = vmul.f32 %v5147_v7, %v6204_v22 }
 0x35d   :  { %v674_v13 = vmul.f32 %v4365_v28, %v660_v31  ;;  %v687_v22 = vadd.f32 %v4366_v36, %v673_v45  ;;  %v6326_v45 = vld [vmem:[%s6874_s19 + $0x30] sm:$0xff] }
 0x35e   :  { %v5149_v42 = vpop.eup %5148  ;;  %v675_v51 = vmul.f32 %v4365_v28, %v661_v18  ;;  %v6331_v18 = vld [vmem:[%s6874_s19 + $0x28] sm:$0xff] }
 0x35f   :  { %v5151_v39 = vpop.eup %5150  ;;  %v662_v44 = vmul.f32 %v5149_v42, %v6222_v37  ;;  %v688_v49 = vadd.f32 %v4366_v36, %v674_v13  ;;  %v6276_v37 = vld [vmem:[#allocation17 + $0x8] sm:$0xff] }
 0x360   :  { %v663_v53 = vmul.f32 %v5151_v39, %v6216_v35  ;;  %v689_v35 = vadd.f32 %v4366_v36, %v675_v51  ;;  %v6336_v39 = vld [vmem:[%s6874_s19 + $0x20] sm:$0xff]  ;;  %v6346_v13 = vld [vmem:[%s6874_s19 + $0x10] sm:$0xff] }
 0x361   :  { %v676_v54 = vmul.f32 %v4365_v28, %v662_v44  ;;  %v6352_v44 = vld [vmem:[%s6874_s19 + $0x8] sm:$0xff] }
 0x362   :  { %v677_v60 = vmul.f32 %v4365_v28, %v663_v53 }
 0x363   :  { %v690_v61 = vadd.f32 %v4366_v36, %v676_v54 }
 0x364   :  { %v691_v57 = vadd.f32 %v4366_v36, %v677_v60 }
 0x375   :  { %v913_v33 = vpop.permute.xlu1 %912 }
 0x376   :  { %v936_v15 = vsel %vm558_vm1, %v684_v12, %v913_v33 }
 0x377   :  { %4683 = vmatprep.mubr.msk.f32.mxu1 %vm955_vm3, %v936_v15 }
 0x379   :  { %v917_v43 = vpop.permute.xlu1 %916 }
 0x37a   :  { %v915_v46 = vpop.permute.xlu0 %914  ;;  %v938_v40 = vsel %vm558_vm1, %v686_v19, %v917_v43  ;;  %v6323_v43 = vld [vmem:[%s6874_s19 + $0x38] sm:$0xff] }
 0x37b   :  { %v937_v27 = vsel %vm558_vm1, %v685_v4, %v915_v46  ;;  %4707 = vmatpush3.msra.mxu0 %v6323_v43  ;;  %v6341_v46 = vld [vmem:[%s6874_s19 + $0x18] sm:$0xff] }
 0x37c   :  { %4684 = vmatmul.mubr.msk.f32.vlgmr.msra.gmra.mxu1 %vm955_vm3, %v937_v27  ;;  %4708 = vmatprep.subr.mxu0 %v5808_v21  ;;  %v6359_v27 = vld [vmem:[%s6874_s19] sm:$0xff] }
 0x37d   :  { %4686 = vmatprep.mubr.msk.f32.mxu1 %vm955_vm3, %v938_v40  ;;  %4696 = vmatpush3.msra.mxu1 %v6265_v47 }
 0x37e   :  { %v919_v50 = vpop.permute.xlu1 %918  ;;  %4697 = vmatprep.subr.mxu1 %v5808_v21  ;;  %4709 = vmatpush3.msra.mxu0 %v6326_v45 }
 0x37f   :  { %v921_v56 = vpop.permute.xlu0 %920  ;;  %v939_v58 = vsel %vm558_vm1, %v687_v22, %v919_v50  ;;  %4698 = vmatpush3.msra.mxu1 %v6270_v48  ;;  %4710 = vmatprep.subr.mxu0 %v5808_v21 }
 0x380   :  { %v940_v59 = vsel %vm558_vm1, %v688_v49, %v921_v56  ;;  %4687 = vmatmul.mubr.msk.f32.gmra.mxu1 %vm955_vm3, %v939_v58  ;;  %4699 = vmatprep.subr.mxu1 %v5808_v21 }
 0x381   :  { %4689 = vmatprep.mubr.msk.f32.mxu1 %vm955_vm3, %v940_v59  ;;  %4700 = vmatpush3.msra.mxu1 %v6276_v37 }
 0x382   :  { %v923_v63 = vpop.permute.xlu1 %922  ;;  %4701 = vmatprep.subr.mxu1 %v5808_v21  ;;  %4711 = vmatpush3.msra.mxu0 %v6331_v18 }
 0x383   :  { %v925_v52 = vpop.permute.xlu0 %924  ;;  %v941_v1 = vsel %vm558_vm1, %v689_v35, %v923_v63  ;;  %4702 = vmatpush3.msra.mxu1 %v6283_v55  ;;  %4712 = vmatprep.subr.mxu0 %v5808_v21 }
 0x384   :  { %v942_v2 = vsel %vm558_vm1, %v690_v61, %v925_v52  ;;  %4690 = vmatmul.mubr.msk.f32.gmra.mxu1 %vm955_vm3, %v941_v1  ;;  %4725 = vmatprep.subr.mxu1 %v5808_v21 }
 0x385   :  { %4692 = vmatprep.mubr.msk.f32.mxu1 %vm955_vm3, %v942_v2  ;;  %4713 = vmatpush3.msra.mxu0 %v6336_v39 }
 0x386   :  { %v927_v5 = vpop.permute.xlu1 %926  ;;  %4714 = vmatprep.subr.mxu0 %v5808_v21 }
 0x387   :  { %v943_v8 = vsel %vm558_vm1, %v691_v57, %v927_v5  ;;  %4715 = vmatpush3.msra.mxu0 %v6341_v46 }
 0x388   :  { %4693 = vmatmul.mubr.msk.f32.gmra.mxu1 %vm955_vm3, %v943_v8  ;;  %4716 = vmatprep.subr.mxu0 %v5808_v21 }
 0x389   :  { %4703 = vmatprep.mubr.msk.f32.mxu1 %vm5810_vm2, %v5808_v21  ;;  %4717 = vmatpush3.msra.mxu0 %v6346_v13 }
 0x38a   :  { %4718 = vmatprep.subr.mxu0 %v5808_v21 }
 0x38b   :  { %4719 = vmatpush3.msra.mxu0 %v6352_v44 }
 0x38c   :  { %4704 = vmatmul.mubr.f32.vlgmr.msra.gmra.mxu1 %v5808_v21  ;;  %4720 = vmatprep.subr.mxu0 %v5808_v21 }
 0x38d   :  { %4726 = vmatpush3.msra.mxu1 %v6265_v47  ;;  %4733 = vmatprep.mubr.msk.f32.mxu1 %vm5810_vm2, %v5808_v21 }
 0x38e   :  { %4727 = vmatprep.subr.mxu1 %v5808_v21  ;;  %4721 = vmatpush3.msra.mxu0 %v6359_v27 }
 0x38f   :  { %4728 = vmatpush3.msra.mxu1 %v6270_v48  ;;  %4736 = vmatprep.subr.mxu0 %v5808_v21 }
 0x390   :  { %4729 = vmatprep.subr.mxu1 %v5808_v21 }
 0x391   :  { %4730 = vmatpush3.msra.mxu1 %v6276_v37 }
 0x392   :  { %4731 = vmatprep.subr.mxu1 %v5808_v21 }
 0x393   :  { %4732 = vmatpush3.msra.mxu1 %v6283_v55 }
 0x394   :  { %4755 = vmatprep.subr.mxu1 %v5808_v21 }
 0x43c   :  { %v4685_v11 = vpop.f32.mrf.mxu1 }
 0x43d   :  { %v1052_v14 = vadd.f32 %v4685_v11, %v4371_v10 }
 0x43e   :  { %v1046_v16 = vpop.f32.mrf.mxu1 }
 0x43f   :  { %1087 = vst.msk [vmem:[#allocation2 + $0x8] sm:$0xff] %vm1085_vm4, %v1052_v14  ;;  %v1047_v62 = vadd.f32 %v4371_v10, %v1046_v16 }
 0x440   :  { %v4688_v17 = vpop.f32.mrf.mxu1 }
 0x441   :  { %1086 = vst.msk [vmem:[#allocation2] sm:$0xff] %vm1085_vm4, %v1047_v62  ;;  %v1062_v0 = vadd.f32 %v4688_v17, %v4371_v10  ;;  %v6401_v62 = vld [vmem:[#allocation20] ss:$0 sm:$0xff] }
 0x442   :  { %v1056_v20 = vpop.f32.mrf.mxu1 }
 0x443   :  { %1089 = vst.msk [vmem:[#allocation2 + $0x18] sm:$0xff] %vm1085_vm4, %v1062_v0  ;;  %v1057_v3 = vadd.f32 %v4371_v10, %v1056_v20 }
 0x444   :  { %v4691_v24 = vpop.f32.mrf.mxu1 }
 0x445   :  { %1088 = vst.msk [vmem:[#allocation2 + $0x10] sm:$0xff] %vm1085_vm4, %v1057_v3  ;;  %v1072_v25 = vadd.f32 %v4691_v24, %v4371_v10 }
 0x446   :  { %v1066_v26 = vpop.f32.mrf.mxu1  ;;  %v1329_v63 = vld [vmem:[#allocation2 + $0x8] sm:$0xff] }
 0x447   :  { %1091 = vst.msk [vmem:[#allocation2 + $0x28] sm:$0xff] %vm1085_vm4, %v1072_v25  ;;  %v1067_v6 = vadd.f32 %v4371_v10, %v1066_v26 }
 0x448   :  { %v4694_v28 = vpop.f32.mrf.mxu1  ;;  %v1108_v38 = vld [vmem:[#allocation2] sm:$0xff] }
 0x449   :  { %1090 = vst.msk [vmem:[#allocation2 + $0x20] sm:$0xff] %vm1085_vm4, %v1067_v6  ;;  %v1082_v30 = vadd.f32 %v4694_v28, %v4371_v10 }
 0x44a   :  { %v1076_v34 = vpop.f32.mrf.mxu1 }
 0x44b   :  { %1093 = vst.msk [vmem:[#allocation2 + $0x38] sm:$0xff] %vm1085_vm4, %v1082_v30  ;;  %v1077_v9 = vadd.f32 %v4371_v10, %v1076_v34 }
 0x44c   :  { %v1184_v32 = vpop.f32.mrf.mxu1 }
 0x44d   :  { %1092 = vst.msk [vmem:[#allocation2 + $0x30] sm:$0xff] %vm1085_vm4, %v1077_v9  ;;  %v1185_v36 = vadd.f32 %v6315_v23, %v1184_v32 }
 0x44e   :  { %v4705_v12 = vpop.f32.mrf.mxu1 }
 0x44f   :  { %1196 = vrot.lane.b32.xlu0 %v1185_v36, %s5811_s24  ;;  %v1188_v33 = vadd.f32 %v1185_v36, %v1108_v38 }
 0x451   :  { %v4381_v41 = vmul.f32 -1.442695, %v1188_v33 }
 0x453   :  { %5152 = vpow2.f32 %v4381_v41 }
 0x460   :  { %v5153_v29 = vpop.eup %5152 }
 0x461   :  { %v1192_v7 = vadd.f32 1.0, %v5153_v29 }
 0x463   :  { %5154 = vrcp.f32 %v1192_v7 }
 0x470   :  { %v5155_v15 = vpop.eup %5154 }
 0x471   :  { %v1206_v22 = vsub.f32 1.0, %v5155_v15  ;;  %v1212_v53 = vmul.f32 0.0, %v5155_v15 }
 0x4c1   :  { %v1197_v31 = vpop.permute.xlu0 %1196 }
 0x4c2   :  { %v1199_v42 = vmul.f32 %v5155_v15, %v1197_v31 }
 0x4c4   :  { %1201 = vrot.lane.b32.xlu1 %v1199_v42, %s5811_s24 }
 0x536   :  { %v1202_v19 = vpop.permute.xlu1 %1201 }
 0x537   :  { %v1204_v4 = vadd.f32 %v1202_v19, %v1108_v38 }
 0x539   :  { %5156 = vtanh.f32 %v1204_v4 }
 0x546   :  { %v5157_v40 = vpop.eup %5156 }
 0x547   :  { %1208 = vrot.lane.b32.xlu0 %v5157_v40, %s5812_s5  ;;  %v1538_v40 = vld [vmem:[#allocation2 + $0x10] sm:$0xff] }
 0x5b9   :  { %v1209_v51 = vpop.permute.xlu0 %1208 }
 0x5ba   :  { %v1211_v49 = vmul.f32 %v1209_v51, %v1206_v22 }
 0x5bc   :  { %v6363_v50 = vadd.f32 %v1212_v53, %v1211_v49 }
 0x5be   :  { %1215 = vrot.lane.b32.xlu1 %v6363_v50, %s5812_s5 }
 0x630   :  { %v1216_v54 = vpop.permute.xlu1 %1215 }
 0x631   :  { %v1218_v56 = vsel %vm955_vm3, %v1216_v54, 0.0  ;;  %4734 = vmatmul.mubr.msk.f32.vlgmr.msra.gmra.mxu1 %vm955_vm3, %v1216_v54 }
 0x632   :  { %4723 = vmatmul.mubr.msk.f32.vlgmr.msra.gmra.mxu0 %vm426_vm0, %v1218_v56  ;;  %4756 = vmatpush3.msra.mxu1 %v6265_v47 }
 0x633   :  { %4757 = vmatprep.subr.mxu1 %v5808_v21  ;;  %4763 = vmatprep.mubr.msk.f32.mxu1 %vm5810_vm2, %v5808_v21 }
 0x634   :  { %4758 = vmatpush3.msra.mxu1 %v6270_v48  ;;  %4737 = vmatpush3.msra.mxu0 %v6323_v43 }
 0x635   :  { %4759 = vmatprep.subr.mxu1 %v5808_v21  ;;  %4738 = vmatprep.subr.mxu0 %v5808_v21 }
 0x636   :  { %4760 = vmatpush3.msra.mxu1 %v6276_v37  ;;  %4739 = vmatpush3.msra.mxu0 %v6326_v45 }
 0x637   :  { %4761 = vmatprep.subr.mxu1 %v5808_v21  ;;  %4740 = vmatprep.subr.mxu0 %v5808_v21 }
 0x638   :  { %4762 = vmatpush3.msra.mxu1 %v6283_v55  ;;  %4741 = vmatpush3.msra.mxu0 %v6331_v18 }
 0x639   :  { %4742 = vmatprep.subr.mxu0 %v5808_v21  ;;  %4752 = vmatprep.mubr.msk.f32.mxu0 %vm5810_vm2, %v5808_v21 }
 0x63a   :  { %4743 = vmatpush3.msra.mxu0 %v6336_v39  ;;  %4766 = vmatprep.subr.mxu1 %v5808_v21 }
 0x63b   :  { %4744 = vmatprep.subr.mxu0 %v5808_v21 }
 0x63c   :  { %4745 = vmatpush3.msra.mxu0 %v6341_v46 }
 0x63d   :  { %4746 = vmatprep.subr.mxu0 %v5808_v21 }
 0x63e   :  { %4747 = vmatpush3.msra.mxu0 %v6346_v13 }
 0x63f   :  { %4748 = vmatprep.subr.mxu0 %v5808_v21 }
 0x640   :  { %4749 = vmatpush3.msra.mxu0 %v6352_v44 }
 0x641   :  { %4750 = vmatprep.subr.mxu0 %v5808_v21 }
 0x642   :  { %4751 = vmatpush3.msra.mxu0 %v6359_v27 }
 0x643   :  { %4785 = vmatprep.subr.mxu0 %v5808_v21 }
 0x6f1   :  { %v1398_v58 = vpop.f32.mrf.mxu1 }
 0x6f2   :  { %v1399_v59 = vadd.f32 %v6315_v23, %v1398_v58  ;;  %v1294_v35 = vpop.f32.mrf.mxu0 }
 0x6f3   :  { %v4735_v60 = vpop.f32.mrf.mxu1  ;;  %v1295_v17 = vadd.f32 %v6401_v62, %v1294_v35 }
 0x6f4   :  { %v4724_v61 = vpop.f32.mrf.mxu0  ;;  %1410 = vrot.lane.b32.xlu0 %v1399_v59, %s5811_s24  ;;  %v1402_v52 = vadd.f32 %v1399_v59, %v1329_v63 }
 0x6f5   :  { %v4384_v0 = vmul.f32 -1.442695, %v1295_v17 }
 0x6f6   :  { %v4386_v1 = vmul.f32 -1.442695, %v1402_v52 }
 0x6f8   :  { %5158 = vpow2.f32 %v4386_v1 }
 0x705   :  { %v5159_v2 = vpop.eup %5158 }
 0x706   :  { %v1406_v57 = vadd.f32 1.0, %v5159_v2 }
 0x708   :  { %5160 = vrcp.f32 %v1406_v57 }
 0x715   :  { %v5161_v5 = vpop.eup %5160 }
 0x716   :  { %v1420_v24 = vsub.f32 1.0, %v5161_v5  ;;  %v1426_v26 = vmul.f32 %v5161_v5, %v6363_v50 }
 0x766   :  { %v1411_v8 = vpop.permute.xlu0 %1410 }
 0x767   :  { %v1413_v10 = vmul.f32 %v5161_v5, %v1411_v8 }
 0x769   :  { %1415 = vrot.lane.b32.xlu1 %v1413_v10, %s5811_s24 }
 0x7db   :  { %v1416_v11 = vpop.permute.xlu1 %1415 }
 0x7dc   :  { %v1418_v14 = vadd.f32 %v1416_v11, %v1329_v63 }
 0x7de   :  { %5162 = vtanh.f32 %v1418_v14 }
 0x7df   :  { %5164 = vpow2.f32 %v4384_v0 }
 0x7eb   :  { %v5163_v16 = vpop.eup %5162 }
 0x7ec   :  { %1422 = vrot.lane.b32.xlu0 %v5163_v16, %s5812_s5  ;;  %v5165_v20 = vpop.eup %5164 }
 0x7ed   :  { %v1301_v3 = vadd.f32 1.0, %v5165_v20 }
 0x7ef   :  { %5166 = vrcp.f32 %v1301_v3 }
 0x7f0   :  { %1305 = vrot.lane.b32.xlu0 %v1295_v17, %s5813_s12 }
 0x7fc   :  { %v5167_v30 = vpop.eup %5166 }
 0x7fd   :  { %v1315_v33 = vsub.f32 1.0, %v5167_v30  ;;  %v1321_v29 = vmul.f32 0.0, %v5167_v30 }
 0x85e   :  { %v1423_v25 = vpop.permute.xlu0 %1422 }
 0x85f   :  { %v1425_v6 = vmul.f32 %v1423_v25, %v1420_v24 }
 0x861   :  { %v6407_v28 = vadd.f32 %v1426_v26, %v1425_v6 }
 0x862   :  { %v1306_v34 = vpop.permute.xlu0 %1305 }
 0x863   :  { %v1308_v9 = vmul.f32 %v5167_v30, %v1306_v34  ;;  %1429 = vrot.lane.b32.xlu1 %v6407_v28, %s5812_s5 }
 0x865   :  { %1310 = vrot.lane.b32.xlu0 %v1308_v9, %s5811_s24 }
 0x8d5   :  { %v1430_v32 = vpop.permute.xlu1 %1429 }
 0x8d6   :  { %4764 = vmatmul.mubr.msk.f32.vlgmr.msra.gmra.mxu1 %vm955_vm3, %v1430_v32 }
 0x8d7   :  { %v1311_v36 = vpop.permute.xlu0 %1310  ;;  %4767 = vmatpush3.msra.mxu1 %v6323_v43  ;;  %4782 = vmatprep.mubr.msk.f32.mxu1 %vm5810_vm2, %v5808_v21 }
 0x8d8   :  { %v1313_v12 = vadd.f32 %v1311_v36, %v1295_v17  ;;  %4768 = vmatprep.subr.mxu1 %v5808_v21 }
 0x8d9   :  { %4769 = vmatpush3.msra.mxu1 %v6326_v45 }
 0x8da   :  { %5168 = vtanh.f32 %v1313_v12  ;;  %4770 = vmatprep.subr.mxu1 %v5808_v21  ;;  %v1747_v12 = vld [vmem:[#allocation2 + $0x18] sm:$0xff] }
 0x8db   :  { %4771 = vmatpush3.msra.mxu1 %v6331_v18 }
 0x8dc   :  { %4772 = vmatprep.subr.mxu1 %v5808_v21 }
 0x8dd   :  { %4773 = vmatpush3.msra.mxu1 %v6336_v39 }
 0x8de   :  { %4774 = vmatprep.subr.mxu1 %v5808_v21 }
 0x8df   :  { %4775 = vmatpush3.msra.mxu1 %v6341_v46 }
 0x8e0   :  { %4776 = vmatprep.subr.mxu1 %v5808_v21 }
 0x8e1   :  { %4777 = vmatpush3.msra.mxu1 %v6346_v13 }
 0x8e2   :  { %4778 = vmatprep.subr.mxu1 %v5808_v21 }
 0x8e3   :  { %4779 = vmatpush3.msra.mxu1 %v6352_v44 }
 0x8e4   :  { %4780 = vmatprep.subr.mxu1 %v5808_v21 }
 0x8e5   :  { %4781 = vmatpush3.msra.mxu1 %v6359_v27 }
 0x8e6   :  { %4815 = vmatprep.subr.mxu1 %v5808_v21 }
 0x8e7   :  { %v5169_v38 = vpop.eup %5168 }
 0x8e8   :  { %1317 = vrot.lane.b32.xlu0 %v5169_v38, %s5812_s5 }
 0x95a   :  { %v1318_v41 = vpop.permute.xlu0 %1317 }
 0x95b   :  { %v1320_v7 = vmul.f32 %v1318_v41, %v1315_v33 }
 0x95d   :  { %v6432_v15 = vadd.f32 %v1321_v29, %v1320_v7 }
 0x95f   :  { %v1432_v31 = vsel %vm955_vm3, %v1430_v32, %v6432_v15 }
 0x960   :  { %4753 = vmatmul.mubr.msk.f32.vlgmr.msra.gmra.mxu0 %vm426_vm0, %v1432_v31 }
 0x961   :  { %4786 = vmatpush3.msra.mxu0 %v6265_v47  ;;  %4793 = vmatprep.mubr.msk.f32.mxu0 %vm5810_vm2, %v5808_v21 }
 0x962   :  { %4787 = vmatprep.subr.mxu0 %v5808_v21 }
 0x963   :  { %4788 = vmatpush3.msra.mxu0 %v6270_v48 }
 0x964   :  { %4789 = vmatprep.subr.mxu0 %v5808_v21 }
 0x965   :  { %4790 = vmatpush3.msra.mxu0 %v6276_v37 }
 0x966   :  { %4791 = vmatprep.subr.mxu0 %v5808_v21 }
 0x967   :  { %4792 = vmatpush3.msra.mxu0 %v6283_v55 }
 0x968   :  { %4796 = vmatprep.subr.mxu0 %v5808_v21 }
 0x996   :  { %v1607_v42 = vpop.f32.mrf.mxu1 }
 0x997   :  { %v1608_v19 = vadd.f32 %v6315_v23, %v1607_v42 }
 0x998   :  { %v4765_v4 = vpop.f32.mrf.mxu1 }
 0x999   :  { %1619 = vrot.lane.b32.xlu1 %v1608_v19, %s5811_s24  ;;  %v1611_v22 = vadd.f32 %v1608_v19, %v1538_v40 }
 0x99b   :  { %v4390_v51 = vmul.f32 -1.442695, %v1611_v22 }
 0x99d   :  { %5170 = vpow2.f32 %v4390_v51 }
 0x9aa   :  { %v5171_v53 = vpop.eup %5170 }
 0x9ab   :  { %v1615_v49 = vadd.f32 1.0, %v5171_v53 }
 0x9ad   :  { %5172 = vrcp.f32 %v1615_v49 }
 0x9ba   :  { %v5173_v50 = vpop.eup %5172 }
 0x9bb   :  { %v1629_v57 = vsub.f32 1.0, %v5173_v50  ;;  %v1635_v8 = vmul.f32 %v5173_v50, %v6407_v28 }
 0xa0b   :  { %v1620_v54 = vpop.permute.xlu1 %1619 }
 0xa0c   :  { %v1622_v56 = vmul.f32 %v5173_v50, %v1620_v54 }
 0xa0e   :  { %1624 = vrot.lane.b32.xlu1 %v1622_v56, %s5811_s24 }
 0xa20   :  { %v1502_v58 = vpop.f32.mrf.mxu0 }
 0xa21   :  { %v1503_v63 = vadd.f32 %v6401_v62, %v1502_v58 }
 0xa22   :  { %v4754_v59 = vpop.f32.mrf.mxu0 }
 0xa23   :  { %v4388_v52 = vmul.f32 -1.442695, %v1503_v63 }
 0xa80   :  { %v1625_v35 = vpop.permute.xlu1 %1624 }
 0xa81   :  { %v1627_v60 = vadd.f32 %v1625_v35, %v1538_v40 }
 0xa83   :  { %5174 = vtanh.f32 %v1627_v60 }
 0xa84   :  { %5176 = vpow2.f32 %v4388_v52 }
 0xa90   :  { %v5175_v61 = vpop.eup %5174 }
 0xa91   :  { %1631 = vrot.lane.b32.xlu1 %v5175_v61, %s5812_s5  ;;  %v5177_v1 = vpop.eup %5176 }
 0xa92   :  { %v1509_v2 = vadd.f32 1.0, %v5177_v1 }
 0xa94   :  { %5178 = vrcp.f32 %v1509_v2 }
 0xa95   :  { %1513 = vrot.lane.b32.xlu1 %v1503_v63, %s5813_s12 }
 0xaa1   :  { %v5179_v16 = vpop.eup %5178 }
 0xaa2   :  { %v1523_v25 = vsub.f32 1.0, %v5179_v16  ;;  %v1529_v6 = vmul.f32 %v5179_v16, %v6432_v15 }
 0xb03   :  { %v1632_v5 = vpop.permute.xlu1 %1631 }
 0xb04   :  { %v1634_v10 = vmul.f32 %v1632_v5, %v1629_v57 }
 0xb06   :  { %v6454_v11 = vadd.f32 %v1635_v8, %v1634_v10 }
 0xb07   :  { %v1514_v14 = vpop.permute.xlu1 %1513 }
 0xb08   :  { %1638 = vrot.lane.b32.xlu0 %v6454_v11, %s5812_s5  ;;  %v1516_v17 = vmul.f32 %v5179_v16, %v1514_v14 }
 0xb0c   :  { %1518 = vrot.lane.b32.xlu0 %v1516_v17, %s5811_s24 }
 0xb7a   :  { %v1639_v0 = vpop.permute.xlu0 %1638 }
 0xb7b   :  { %4794 = vmatmul.mubr.msk.f32.vlgmr.msra.gmra.mxu0 %vm955_vm3, %v1639_v0 }
 0xb7c   :  { %4797 = vmatpush3.msra.mxu0 %v6323_v43  ;;  %4812 = vmatprep.mubr.msk.f32.mxu0 %vm5810_vm2, %v5808_v21 }
 0xb7d   :  { %4798 = vmatprep.subr.mxu0 %v5808_v21 }
 0xb7e   :  { %v1519_v20 = vpop.permute.xlu0 %1518  ;;  %4799 = vmatpush3.msra.mxu0 %v6326_v45 }
 0xb7f   :  { %v1521_v3 = vadd.f32 %v1519_v20, %v1503_v63  ;;  %4800 = vmatprep.subr.mxu0 %v5808_v21 }
 0xb80   :  { %4801 = vmatpush3.msra.mxu0 %v6331_v18 }
 0xb81   :  { %5180 = vtanh.f32 %v1521_v3  ;;  %4802 = vmatprep.subr.mxu0 %v5808_v21 }
 0xb82   :  { %4803 = vmatpush3.msra.mxu0 %v6336_v39 }
 0xb83   :  { %4804 = vmatprep.subr.mxu0 %v5808_v21 }
 0xb84   :  { %4805 = vmatpush3.msra.mxu0 %v6341_v46 }
 0xb85   :  { %4806 = vmatprep.subr.mxu0 %v5808_v21 }
 0xb86   :  { %4807 = vmatpush3.msra.mxu0 %v6346_v13 }
 0xb87   :  { %4808 = vmatprep.subr.mxu0 %v5808_v21 }
 0xb88   :  { %4809 = vmatpush3.msra.mxu0 %v6352_v44 }
 0xb89   :  { %4810 = vmatprep.subr.mxu0 %v5808_v21 }
 0xb8a   :  { %4811 = vmatpush3.msra.mxu0 %v6359_v27 }
 0xb8b   :  { %4845 = vmatprep.subr.mxu0 %v5808_v21 }
 0xb8e   :  { %v5181_v24 = vpop.eup %5180 }
 0xb8f   :  { %1525 = vrot.lane.b32.xlu0 %v5181_v24, %s5812_s5  ;;  %v1956_v24 = vld [vmem:[#allocation2 + $0x20] sm:$0xff] }
 0xc01   :  { %v1526_v26 = vpop.permute.xlu0 %1525 }
 0xc02   :  { %v1528_v28 = vmul.f32 %v1526_v26, %v1523_v25 }
 0xc04   :  { %v6480_v30 = vadd.f32 %v1529_v6, %v1528_v28 }
 0xc06   :  { %v1641_v34 = vsel %vm955_vm3, %v1639_v0, %v6480_v30 }
 0xc07   :  { %4783 = vmatmul.mubr.msk.f32.vlgmr.msra.gmra.mxu1 %vm426_vm0, %v1641_v34 }
 0xc08   :  { %4816 = vmatpush3.msra.mxu1 %v6265_v47  ;;  %4823 = vmatprep.mubr.msk.f32.mxu1 %vm5810_vm2, %v5808_v21 }
 0xc09   :  { %4817 = vmatprep.subr.mxu1 %v5808_v21 }
 0xc0a   :  { %4818 = vmatpush3.msra.mxu1 %v6270_v48 }
 0xc0b   :  { %4819 = vmatprep.subr.mxu1 %v5808_v21 }
 0xc0c   :  { %4820 = vmatpush3.msra.mxu1 %v6276_v37 }
 0xc0d   :  { %4821 = vmatprep.subr.mxu1 %v5808_v21 }
 0xc0e   :  { %4822 = vmatpush3.msra.mxu1 %v6283_v55 }
 0xc0f   :  { %4826 = vmatprep.subr.mxu1 %v5808_v21 }
 0xc3b   :  { %v1816_v9 = vpop.f32.mrf.mxu0 }
 0xc3c   :  { %v1817_v32 = vadd.f32 %v6315_v23, %v1816_v9 }
 0xc3d   :  { %v4795_v36 = vpop.f32.mrf.mxu0 }
 0xc3e   :  { %1828 = vrot.lane.b32.xlu1 %v1817_v32, %s5811_s24  ;;  %v1820_v38 = vadd.f32 %v1817_v32, %v1747_v12 }
 0xc40   :  { %v4394_v33 = vmul.f32 -1.442695, %v1820_v38 }
 0xc42   :  { %5182 = vpow2.f32 %v4394_v33 }
 0xc4f   :  { %v5183_v41 = vpop.eup %5182 }
 0xc50   :  { %v1824_v29 = vadd.f32 1.0, %v5183_v41 }
 0xc52   :  { %5184 = vrcp.f32 %v1824_v29 }
 0xc5f   :  { %v5185_v7 = vpop.eup %5184 }
 0xc60   :  { %v1838_v56 = vsub.f32 1.0, %v5185_v7  ;;  %v1844_v59 = vmul.f32 %v5185_v7, %v6454_v11 }
 0xcb0   :  { %v1829_v31 = vpop.permute.xlu1 %1828 }
 0xcb1   :  { %v1831_v42 = vmul.f32 %v5185_v7, %v1829_v31 }
 0xcb3   :  { %1833 = vrot.lane.b32.xlu1 %v1831_v42, %s5811_s24 }
 0xcc7   :  { %v1711_v19 = vpop.f32.mrf.mxu1 }
 0xcc8   :  { %v1712_v53 = vadd.f32 %v6401_v62, %v1711_v19 }
 0xcc9   :  { %v4784_v4 = vpop.f32.mrf.mxu1 }
 0xcca   :  { %v4392_v49 = vmul.f32 -1.442695, %v1712_v53 }
 0xd25   :  { %v1834_v40 = vpop.permute.xlu1 %1833 }
 0xd26   :  { %v1836_v22 = vadd.f32 %v1834_v40, %v1747_v12 }
 0xd28   :  { %5186 = vtanh.f32 %v1836_v22 }
 0xd29   :  { %5188 = vpow2.f32 %v4392_v49 }
 0xd35   :  { %v5187_v51 = vpop.eup %5186 }
 0xd36   :  { %1840 = vrot.lane.b32.xlu0 %v5187_v51, %s5812_s5  ;;  %v5189_v50 = vpop.eup %5188 }
 0xd37   :  { %v1718_v54 = vadd.f32 1.0, %v5189_v50 }
 0xd39   :  { %5190 = vrcp.f32 %v1718_v54 }
 0xd3a   :  { %1722 = vrot.lane.b32.xlu0 %v1712_v53, %s5813_s12 }
 0xd46   :  { %v5191_v63 = vpop.eup %5190 }
 0xd47   :  { %v1732_v8 = vsub.f32 1.0, %v5191_v63  ;;  %v1738_v11 = vmul.f32 %v5191_v63, %v6480_v30 }
 0xda8   :  { %v1841_v58 = vpop.permute.xlu0 %1840 }
 0xda9   :  { %v1843_v35 = vmul.f32 %v1841_v58, %v1838_v56 }
 0xdab   :  { %v6502_v60 = vadd.f32 %v1844_v59, %v1843_v35 }
 0xdac   :  { %v1723_v61 = vpop.permute.xlu0 %1722 }
 0xdad   :  { %1847 = vrot.lane.b32.xlu1 %v6502_v60, %s5812_s5  ;;  %v1725_v52 = vmul.f32 %v5191_v63, %v1723_v61 }
 0xdb1   :  { %1727 = vrot.lane.b32.xlu1 %v1725_v52, %s5811_s24 }
 0xe1f   :  { %v1848_v1 = vpop.permute.xlu1 %1847 }
 0xe20   :  { %4824 = vmatmul.mubr.msk.f32.vlgmr.msra.gmra.mxu1 %vm955_vm3, %v1848_v1 }
 0xe21   :  { %4827 = vmatpush3.msra.mxu1 %v6323_v43  ;;  %4842 = vmatprep.mubr.msk.f32.mxu1 %vm5810_vm2, %v5808_v21 }
 0xe22   :  { %4828 = vmatprep.subr.mxu1 %v5808_v21 }
 0xe23   :  { %v1728_v2 = vpop.permute.xlu1 %1727  ;;  %4829 = vmatpush3.msra.mxu1 %v6326_v45 }
 0xe24   :  { %v1730_v57 = vadd.f32 %v1728_v2, %v1712_v53  ;;  %4830 = vmatprep.subr.mxu1 %v5808_v21 }
 0xe25   :  { %4831 = vmatpush3.msra.mxu1 %v6331_v18 }
 0xe26   :  { %5192 = vtanh.f32 %v1730_v57  ;;  %4832 = vmatprep.subr.mxu1 %v5808_v21 }
 0xe27   :  { %4833 = vmatpush3.msra.mxu1 %v6336_v39 }
 0xe28   :  { %4834 = vmatprep.subr.mxu1 %v5808_v21 }
 0xe29   :  { %4835 = vmatpush3.msra.mxu1 %v6341_v46 }
 0xe2a   :  { %4836 = vmatprep.subr.mxu1 %v5808_v21 }
 0xe2b   :  { %4837 = vmatpush3.msra.mxu1 %v6346_v13 }
 0xe2c   :  { %4838 = vmatprep.subr.mxu1 %v5808_v21 }
 0xe2d   :  { %4839 = vmatpush3.msra.mxu1 %v6352_v44 }
 0xe2e   :  { %4840 = vmatprep.subr.mxu1 %v5808_v21 }
 0xe2f   :  { %4841 = vmatpush3.msra.mxu1 %v6359_v27 }
 0xe30   :  { %4875 = vmatprep.subr.mxu1 %v5808_v21 }
 0xe33   :  { %v5193_v5 = vpop.eup %5192 }
 0xe34   :  { %1734 = vrot.lane.b32.xlu0 %v5193_v5, %s5812_s5  ;;  %v2165_v5 = vld [vmem:[#allocation2 + $0x28] sm:$0xff] }
 0xea6   :  { %v1735_v10 = vpop.permute.xlu0 %1734 }
 0xea7   :  { %v1737_v14 = vmul.f32 %v1735_v10, %v1732_v8 }
 0xea9   :  { %v6528_v16 = vadd.f32 %v1738_v11, %v1737_v14 }
 0xeab   :  { %v1850_v17 = vsel %vm955_vm3, %v1848_v1, %v6528_v16 }
 0xeac   :  { %4813 = vmatmul.mubr.msk.f32.vlgmr.msra.gmra.mxu0 %vm426_vm0, %v1850_v17 }
 0xead   :  { %4846 = vmatpush3.msra.mxu0 %v6265_v47  ;;  %4853 = vmatprep.mubr.msk.f32.mxu0 %vm5810_vm2, %v5808_v21 }
 0xeae   :  { %4847 = vmatprep.subr.mxu0 %v5808_v21 }
 0xeaf   :  { %4848 = vmatpush3.msra.mxu0 %v6270_v48 }
 0xeb0   :  { %4849 = vmatprep.subr.mxu0 %v5808_v21 }
 0xeb1   :  { %4850 = vmatpush3.msra.mxu0 %v6276_v37 }
 0xeb2   :  { %4851 = vmatprep.subr.mxu0 %v5808_v21 }
 0xeb3   :  { %4852 = vmatpush3.msra.mxu0 %v6283_v55 }
 0xeb4   :  { %4856 = vmatprep.subr.mxu0 %v5808_v21 }
 0xee0   :  { %v2025_v0 = vpop.f32.mrf.mxu1 }
 0xee1   :  { %v2026_v20 = vadd.f32 %v6315_v23, %v2025_v0 }
 0xee2   :  { %v4825_v3 = vpop.f32.mrf.mxu1 }
 0xee3   :  { %2037 = vrot.lane.b32.xlu1 %v2026_v20, %s5811_s24  ;;  %v2029_v25 = vadd.f32 %v2026_v20, %v1956_v24 }
 0xee5   :  { %v4398_v26 = vmul.f32 -1.442695, %v2029_v25 }
 0xee7   :  { %5194 = vpow2.f32 %v4398_v26 }
 0xef4   :  { %v5195_v6 = vpop.eup %5194 }
 0xef5   :  { %v2033_v28 = vadd.f32 1.0, %v5195_v6 }
 0xef7   :  { %5196 = vrcp.f32 %v2033_v28 }
 0xf04   :  { %v5197_v34 = vpop.eup %5196 }
 0xf05   :  { %v2047_v19 = vsub.f32 1.0, %v5197_v34  ;;  %v2053_v40 = vmul.f32 %v5197_v34, %v6502_v60 }
 0xf55   :  { %v2038_v9 = vpop.permute.xlu1 %2037 }
 0xf56   :  { %v2040_v32 = vmul.f32 %v5197_v34, %v2038_v9 }
 0xf58   :  { %2042 = vrot.lane.b32.xlu0 %v2040_v32, %s5811_s24 }
 0xf6c   :  { %v1920_v36 = vpop.f32.mrf.mxu0 }
 0xf6d   :  { %v1921_v29 = vadd.f32 %v6401_v62, %v1920_v36 }
 0xf6e   :  { %v4814_v12 = vpop.f32.mrf.mxu0 }
 0xf6f   :  { %v4396_v7 = vmul.f32 -1.442695, %v1921_v29 }
 0xfca   :  { %v2043_v38 = vpop.permute.xlu0 %2042 }
 0xfcb   :  { %v2045_v33 = vadd.f32 %v2043_v38, %v1956_v24 }
 0xfcd   :  { %5198 = vtanh.f32 %v2045_v33 }
 0xfce   :  { %5200 = vpow2.f32 %v4396_v7 }
 0xfda   :  { %v5199_v41 = vpop.eup %5198 }
 0xfdb   :  { %2049 = vrot.lane.b32.xlu1 %v5199_v41, %s5812_s5  ;;  %v5201_v31 = vpop.eup %5200 }
 0xfdc   :  { %v1927_v42 = vadd.f32 1.0, %v5201_v31 }
 0xfde   :  { %5202 = vrcp.f32 %v1927_v42 }
 0xfdf   :  { %1931 = vrot.lane.b32.xlu1 %v1921_v29, %s5813_s12 }
 0xfeb   :  { %v5203_v49 = vpop.eup %5202 }
 0xfec   :  { %v1941_v35 = vsub.f32 1.0, %v5203_v49  ;;  %v1947_v61 = vmul.f32 %v5203_v49, %v6528_v16 }
0x104d   :  { %v2050_v4 = vpop.permute.xlu1 %2049 }
0x104e   :  { %v2052_v22 = vmul.f32 %v2050_v4, %v2047_v19 }
0x1050   :  { %v6550_v51 = vadd.f32 %v2053_v40, %v2052_v22  ;;  %v5276_v40 = vld [vmem:[#allocation17 + $0x18] sm:$0xff]  ;;  %v5277_v22 = vld [vmem:[#allocation17 + $0x10] sm:$0xff] }
0x1051   :  { %v1932_v53 = vpop.permute.xlu1 %1931 }
0x1052   :  { %2056 = vrot.lane.b32.xlu0 %v6550_v51, %s5812_s5  ;;  %v1934_v50 = vmul.f32 %v5203_v49, %v1932_v53  ;;  %v5279_v53 = vld [vmem:[#allocation17] sm:$0xff] }
0x1056   :  { %1936 = vrot.lane.b32.xlu0 %v1934_v50, %s5811_s24 }
0x10c4   :  { %v2057_v54 = vpop.permute.xlu0 %2056 }
0x10c5   :  { %4854 = vmatmul.mubr.msk.f32.vlgmr.msra.gmra.mxu0 %vm955_vm3, %v2057_v54 }
0x10c6   :  { %4857 = vmatpush3.msra.mxu0 %v6323_v43  ;;  %4872 = vmatprep.mubr.msk.f32.mxu0 %vm5810_vm2, %v5808_v21 }
0x10c7   :  { %4858 = vmatprep.subr.mxu0 %v5808_v21 }
0x10c8   :  { %v1937_v56 = vpop.permute.xlu0 %1936  ;;  %4859 = vmatpush3.msra.mxu0 %v6326_v45 }
0x10c9   :  { %v1939_v58 = vadd.f32 %v1937_v56, %v1921_v29  ;;  %4860 = vmatprep.subr.mxu0 %v5808_v21 }
0x10ca   :  { %4861 = vmatpush3.msra.mxu0 %v6331_v18 }
0x10cb   :  { %5204 = vtanh.f32 %v1939_v58  ;;  %4862 = vmatprep.subr.mxu0 %v5808_v21 }
0x10cc   :  { %4863 = vmatpush3.msra.mxu0 %v6336_v39 }
0x10cd   :  { %4864 = vmatprep.subr.mxu0 %v5808_v21 }
0x10ce   :  { %4865 = vmatpush3.msra.mxu0 %v6341_v46 }
0x10cf   :  { %4866 = vmatprep.subr.mxu0 %v5808_v21 }
0x10d0   :  { %4867 = vmatpush3.msra.mxu0 %v6346_v13 }
0x10d1   :  { %4868 = vmatprep.subr.mxu0 %v5808_v21 }
0x10d2   :  { %4869 = vmatpush3.msra.mxu0 %v6352_v44 }
0x10d3   :  { %4870 = vmatprep.subr.mxu0 %v5808_v21 }
0x10d4   :  { %4871 = vmatpush3.msra.mxu0 %v6359_v27 }
0x10d5   :  { %4905 = vmatprep.subr.mxu0 %v5808_v21 }
0x10d8   :  { %v5205_v59 = vpop.eup %5204 }
0x10d9   :  { %1943 = vrot.lane.b32.xlu1 %v5205_v59, %s5812_s5 }
0x114b   :  { %v1944_v60 = vpop.permute.xlu1 %1943 }
0x114c   :  { %v1946_v63 = vmul.f32 %v1944_v60, %v1941_v35  ;;  %v2374_v35 = vld [vmem:[#allocation2 + $0x30] sm:$0xff] }
0x114e   :  { %v6576_v52 = vadd.f32 %v1947_v61, %v1946_v63 }
0x1150   :  { %v2059_v1 = vsel %vm955_vm3, %v2057_v54, %v6576_v52 }
0x1151   :  { %4843 = vmatmul.mubr.msk.f32.vlgmr.msra.gmra.mxu1 %vm426_vm0, %v2059_v1 }
0x1152   :  { %4876 = vmatpush3.msra.mxu1 %v6265_v47  ;;  %4883 = vmatprep.mubr.msk.f32.mxu1 %vm5810_vm2, %v5808_v21 }
0x1153   :  { %4877 = vmatprep.subr.mxu1 %v5808_v21 }
0x1154   :  { %4878 = vmatpush3.msra.mxu1 %v6270_v48 }
0x1155   :  { %4879 = vmatprep.subr.mxu1 %v5808_v21 }
0x1156   :  { %4880 = vmatpush3.msra.mxu1 %v6276_v37 }
0x1157   :  { %4881 = vmatprep.subr.mxu1 %v5808_v21 }
0x1158   :  { %4882 = vmatpush3.msra.mxu1 %v6283_v55 }
0x1159   :  { %4886 = vmatprep.subr.mxu1 %v5808_v21 }
0x1185   :  { %v2234_v2 = vpop.f32.mrf.mxu0 }
0x1186   :  { %v2235_v47 = vadd.f32 %v6315_v23, %v2234_v2 }
0x1187   :  { %v4855_v57 = vpop.f32.mrf.mxu0 }
0x1188   :  { %2246 = vrot.lane.b32.xlu0 %v2235_v47, %s5811_s24  ;;  %v2238_v8 = vadd.f32 %v2235_v47, %v2165_v5 }
0x118a   :  { %v4402_v10 = vmul.f32 -1.442695, %v2238_v8 }
0x118c   :  { %5206 = vpow2.f32 %v4402_v10 }
0x1199   :  { %v5207_v48 = vpop.eup %5206 }
0x119a   :  { %v2242_v11 = vadd.f32 1.0, %v5207_v48 }
0x119c   :  { %5208 = vrcp.f32 %v2242_v11 }
0x11a9   :  { %v5209_v37 = vpop.eup %5208 }
0x11aa   :  { %v2256_v36 = vsub.f32 1.0, %v5209_v37  ;;  %v2262_v38 = vmul.f32 %v5209_v37, %v6550_v51  ;;  %v5278_v51 = vld [vmem:[#allocation17 + $0x8] sm:$0xff] }
0x11fa   :  { %v2247_v14 = vpop.permute.xlu0 %2246 }
0x11fb   :  { %v2249_v17 = vmul.f32 %v5209_v37, %v2247_v14 }
0x11fd   :  { %2251 = vrot.lane.b32.xlu1 %v2249_v17, %s5811_s24 }
0x1211   :  { %v2129_v55 = vpop.f32.mrf.mxu1 }
0x1212   :  { %v2130_v0 = vadd.f32 %v6401_v62, %v2129_v55 }
0x1213   :  { %v4844_v20 = vpop.f32.mrf.mxu1 }
0x1214   :  { %2140 = vrot.lane.b32.xlu1 %v2130_v0, %s5813_s12  ;;  %v4400_v3 = vmul.f32 -1.442695, %v2130_v0 }
0x1216   :  { %5210 = vpow2.f32 %v4400_v3 }
0x1223   :  { %v5211_v26 = vpop.eup %5210 }
0x1224   :  { %v2136_v6 = vadd.f32 1.0, %v5211_v26 }
0x126f   :  { %v2252_v24 = vpop.permute.xlu1 %2251 }
0x1270   :  { %v2254_v25 = vadd.f32 %v2252_v24, %v2165_v5 }
0x1272   :  { %5212 = vtanh.f32 %v2254_v25 }
0x1273   :  { %5214 = vrcp.f32 %v2136_v6 }
0x127f   :  { %v5213_v28 = vpop.eup %5212 }
0x1280   :  { %2258 = vrot.lane.b32.xlu0 %v5213_v28, %s5812_s5  ;;  %v5215_v34 = vpop.eup %5214 }
0x1286   :  { %v2141_v9 = vpop.permute.xlu1 %2140 }
0x1287   :  { %v2143_v32 = vmul.f32 %v5215_v34, %v2141_v9 }
0x1289   :  { %2145 = vrot.lane.b32.xlu1 %v2143_v32, %s5811_s24 }
0x12f2   :  { %v2259_v12 = vpop.permute.xlu0 %2258 }
0x12f3   :  { %v2261_v33 = vmul.f32 %v2259_v12, %v2256_v36 }
0x12f5   :  { %v6599_v41 = vadd.f32 %v2262_v38, %v2261_v33  ;;  %v5280_v33 = vld [vmem:[%s6874_s19 + $0x38] sm:$0xff] }
0x12f7   :  { %2265 = vrot.lane.b32.xlu0 %v6599_v41, %s5812_s5 }
0x12fb   :  { %v2146_v29 = vpop.permute.xlu1 %2145 }
0x12fc   :  { %v2148_v7 = vadd.f32 %v2146_v29, %v2130_v0  ;;  %v5282_v29 = vld [vmem:[%s6874_s19 + $0x28] sm:$0xff] }
0x12fe   :  { %5216 = vtanh.f32 %v2148_v7  ;;  %v5283_v7 = vld [vmem:[%s6874_s19 + $0x20] sm:$0xff] }
0x130b   :  { %v5217_v31 = vpop.eup %5216 }
0x130c   :  { %2152 = vrot.lane.b32.xlu0 %v5217_v31, %s5812_s5 }
0x1369   :  { %v2266_v42 = vpop.permute.xlu0 %2265 }
0x136a   :  { %4884 = vmatmul.mubr.msk.f32.vlgmr.msra.gmra.mxu1 %vm955_vm3, %v2266_v42 }
0x136b   :  { %4887 = vmatpush3.msra.mxu1 %v6323_v43  ;;  %4902 = vmatprep.mubr.msk.f32.mxu1 %vm5810_vm2, %v5808_v21  ;;  %v2150_v43 = vsub.f32 1.0, %v5215_v34 }
0x136c   :  { %4888 = vmatprep.subr.mxu1 %v5808_v21 }
0x136d   :  { %4889 = vmatpush3.msra.mxu1 %v6326_v45 }
0x136e   :  { %4890 = vmatprep.subr.mxu1 %v5808_v21 }
0x136f   :  { %4891 = vmatpush3.msra.mxu1 %v6331_v18  ;;  %v2156_v18 = vmul.f32 %v5215_v34, %v6576_v52 }
0x1370   :  { %4892 = vmatprep.subr.mxu1 %v5808_v21 }
0x1371   :  { %4893 = vmatpush3.msra.mxu1 %v6336_v39 }
0x1372   :  { %4894 = vmatprep.subr.mxu1 %v5808_v21 }
0x1373   :  { %4895 = vmatpush3.msra.mxu1 %v6341_v46 }
0x1374   :  { %4896 = vmatprep.subr.mxu1 %v5808_v21 }
0x1375   :  { %4897 = vmatpush3.msra.mxu1 %v6346_v13 }
0x1376   :  { %4898 = vmatprep.subr.mxu1 %v5808_v21 }
0x1377   :  { %4899 = vmatpush3.msra.mxu1 %v6352_v44 }
0x1378   :  { %4900 = vmatprep.subr.mxu1 %v5808_v21 }
0x1379   :  { %4901 = vmatpush3.msra.mxu1 %v6359_v27 }
0x137e   :  { %v2153_v45 = vpop.permute.xlu0 %2152 }
0x137f   :  { %v2155_v39 = vmul.f32 %v2153_v45, %v2150_v43 }
0x1381   :  { %v6623_v19 = vadd.f32 %v2156_v18, %v2155_v39 }
0x1383   :  { %v2268_v4 = vsel %vm955_vm3, %v2266_v42, %v6623_v19  ;;  %v5284_v42 = vld [vmem:[#allocation19] ss:$0 sm:$0xff] }
0x1384   :  { %4873 = vmatmul.mubr.msk.f32.vlgmr.msra.gmra.mxu0 %vm426_vm0, %v2268_v4 }
0x1385   :  { %4906 = vmatpush3.msra.mxu0 %v5276_v40  ;;  %4913 = vmatprep.mubr.msk.f32.mxu0 %vm5810_vm2, %v5808_v21 }
0x1386   :  { %4907 = vmatprep.subr.mxu0 %v5808_v21 }
0x1387   :  { %4908 = vmatpush3.msra.mxu0 %v5277_v22 }
0x1388   :  { %4909 = vmatprep.subr.mxu0 %v5808_v21 }
0x1389   :  { %4910 = vmatpush3.msra.mxu0 %v5278_v51 }
0x138a   :  { %4911 = vmatprep.subr.mxu0 %v5808_v21 }
0x138b   :  { %4912 = vmatpush3.msra.mxu0 %v5279_v53 }
0x138c   :  { %4916 = vmatprep.subr.mxu0 %v5808_v21 }
0x142a   :  { %v2443_v49 = vpop.f32.mrf.mxu1 }
0x142b   :  { %v2444_v50 = vadd.f32 %v6315_v23, %v2443_v49 }
0x142c   :  { %v4885_v54 = vpop.f32.mrf.mxu1 }
0x142d   :  { %2455 = vrot.lane.b32.xlu1 %v2444_v50, %s5811_s24  ;;  %v2447_v60 = vadd.f32 %v2444_v50, %v2374_v35 }
0x142f   :  { %v4406_v61 = vmul.f32 -1.442695, %v2447_v60 }
0x1431   :  { %5218 = vpow2.f32 %v4406_v61 }
0x143e   :  { %v5219_v63 = vpop.eup %5218 }
0x143f   :  { %v2451_v1 = vadd.f32 1.0, %v5219_v63 }
0x1441   :  { %5220 = vrcp.f32 %v2451_v1 }
0x1444   :  { %v2338_v56 = vpop.f32.mrf.mxu0 }
0x1445   :  { %v2339_v58 = vadd.f32 %v6401_v62, %v2338_v56 }
0x1446   :  { %v4874_v59 = vpop.f32.mrf.mxu0 }
0x1447   :  { %2349 = vrot.lane.b32.xlu1 %v2339_v58, %s5813_s12  ;;  %v4404_v2 = vmul.f32 -1.442695, %v2339_v58 }
0x1449   :  { %5222 = vpow2.f32 %v4404_v2 }
0x144e   :  { %v5221_v47 = vpop.eup %5220 }
0x144f   :  { %v2465_v3 = vsub.f32 1.0, %v5221_v47  ;;  %v2471_v25 = vmul.f32 %v5221_v47, %v6599_v41  ;;  %v5281_v41 = vld [vmem:[%s6874_s19 + $0x30] sm:$0xff] }
0x1456   :  { %v5223_v5 = vpop.eup %5222 }
0x1457   :  { %v2345_v8 = vadd.f32 1.0, %v5223_v5 }
0x1459   :  { %5224 = vrcp.f32 %v2345_v8 }
0x1466   :  { %v5225_v10 = vpop.eup %5224 }
0x1467   :  { %v2359_v34 = vsub.f32 1.0, %v5225_v10  ;;  %v2365_v32 = vmul.f32 %v5225_v10, %v6623_v19 }
0x149f   :  { %v2456_v23 = vpop.permute.xlu1 %2455 }
0x14a0   :  { %v2458_v57 = vmul.f32 %v5221_v47, %v2456_v23 }
0x14a2   :  { %2460 = vrot.lane.b32.xlu0 %v2458_v57, %s5811_s24 }
0x14b9   :  { %v2350_v48 = vpop.permute.xlu1 %2349 }
0x14ba   :  { %v2352_v11 = vmul.f32 %v5225_v10, %v2350_v48 }
0x14bc   :  { %2354 = vrot.lane.b32.xlu1 %v2352_v11, %s5811_s24 }
0x1514   :  { %v2461_v37 = vpop.permute.xlu0 %2460 }
0x1515   :  { %v2463_v14 = vadd.f32 %v2461_v37, %v2374_v35 }
0x1517   :  { %5226 = vtanh.f32 %v2463_v14 }
0x1524   :  { %v5227_v17 = vpop.eup %5226 }
0x1525   :  { %2467 = vrot.lane.b32.xlu0 %v5227_v17, %s5812_s5 }
0x152e   :  { %v2355_v55 = vpop.permute.xlu1 %2354 }
0x152f   :  { %v2357_v0 = vadd.f32 %v2355_v55, %v2339_v58 }
0x1531   :  { %5228 = vtanh.f32 %v2357_v0 }
0x153e   :  { %v5229_v20 = vpop.eup %5228 }
0x153f   :  { %2361 = vrot.lane.b32.xlu1 %v5229_v20, %s5812_s5 }
0x1597   :  { %v2468_v24 = vpop.permute.xlu0 %2467 }
0x1598   :  { %v2470_v26 = vmul.f32 %v2468_v24, %v2465_v3 }
0x159a   :  { %v6643_v6 = vadd.f32 %v2471_v25, %v2470_v26 }
0x159c   :  { %2474 = vrot.lane.b32.xlu0 %v6643_v6, %s5812_s5 }
0x15b1   :  { %v2362_v28 = vpop.permute.xlu1 %2361 }
0x15b2   :  { %v2364_v9 = vmul.f32 %v2362_v28, %v2359_v34 }
0x15b4   :  { %v6648_v36 = vadd.f32 %v2365_v32, %v2364_v9 }
0x160e   :  { %v2475_v12 = vpop.permute.xlu0 %2474 }
0x160f   :  { %v2477_v38 = vsel %vm955_vm3, %v2475_v12, %v6648_v36  ;;  %4914 = vmatmul.mubr.msk.f32.vlgmr.msra.gmra.mxu0 %vm955_vm3, %v2475_v12 }
0x1610   :  { %4903 = vmatmul.mubr.msk.f32.vlgmr.msra.gmra.mxu1 %vm426_vm0, %v2477_v38  ;;  %4917 = vmatpush3.msra.mxu0 %v5280_v33  ;;  %v2980_v33 = vld [vmem:[#allocation28 + $0x18] sm:$0xff] }
0x1611   :  { %4918 = vmatprep.subr.mxu0 %v5808_v21  ;;  %4932 = vmatprep.mubr.msk.f32.mxu0 %vm5810_vm2, %v5808_v21 }
0x1612   :  { %4919 = vmatpush3.msra.mxu0 %v5281_v41  ;;  %v2801_v41 = vld [vmem:[#allocation22 + $0x10] sm:$0xff] }
0x1613   :  { %4920 = vmatprep.subr.mxu0 %v5808_v21 }
0x1614   :  { %4921 = vmatpush3.msra.mxu0 %v5282_v29  ;;  %v2979_v29 = vld [vmem:[#allocation28 + $0x10] sm:$0xff] }
0x1615   :  { %4922 = vmatprep.subr.mxu0 %v5808_v21 }
0x1616   :  { %4923 = vmatpush3.msra.mxu0 %v5283_v7  ;;  %v2800_v7 = vld [vmem:[#allocation22 + $0x8] sm:$0xff] }
0x1617   :  { %4924 = vmatprep.subr.mxu0 %v5808_v21 }
0x1618   :  { %4925 = vmatpush3.msra.mxu0 %v6341_v46 }
0x1619   :  { %4926 = vmatprep.subr.mxu0 %v5808_v21 }
0x161a   :  { %4927 = vmatpush3.msra.mxu0 %v6346_v13  ;;  %v2583_v13 = vld [vmem:[#allocation2 + $0x38] sm:$0xff] }
0x161b   :  { %4928 = vmatprep.subr.mxu0 %v5808_v21 }
0x161c   :  { %4929 = vmatpush3.msra.mxu0 %v6352_v44 }
0x161d   :  { %4930 = vmatprep.subr.mxu0 %v5808_v21 }
0x161e   :  { %4931 = vmatpush3.msra.mxu0 %v6359_v27 }
0x161f   :  { %4957 = vmatprep.subr.mxu0 %v2980_v33 }
0x16cf   :  { %v2652_v31 = vpop.f32.mrf.mxu0 }
0x16d0   :  { %v2653_v43 = vadd.f32 %v5284_v42, %v2652_v31  ;;  %v2547_v45 = vpop.f32.mrf.mxu1  ;;  %v2978_v31 = vld [vmem:[#allocation28 + $0x8] sm:$0xff]  ;;  %v2977_v42 = vld [vmem:[#allocation28] sm:$0xff] }
0x16d1   :  { %v2548_v18 = vadd.f32 %v6401_v62, %v2547_v45  ;;  %v4915_v39 = vpop.f32.mrf.mxu0 }
0x16d2   :  { %2664 = vrot.lane.b32.xlu0 %v2653_v43, %s5811_s24  ;;  %v4904_v46 = vpop.f32.mrf.mxu1  ;;  %v2656_v4 = vadd.f32 %v2653_v43, %v2583_v13 }
0x16d3   :  { %2558 = vrot.lane.b32.xlu1 %v2548_v18, %s5813_s12  ;;  %v4408_v44 = vmul.f32 -1.442695, %v2548_v18 }
0x16d4   :  { %v4410_v40 = vmul.f32 -1.442695, %v2656_v4 }
0x16d6   :  { %5230 = vpow2.f32 %v4410_v40 }
0x16d7   :  { %5232 = vpow2.f32 %v4408_v44 }
0x16e3   :  { %v5231_v22 = vpop.eup %5230 }
0x16e4   :  { %v5233_v27 = vpop.eup %5232  ;;  %v2660_v51 = vadd.f32 1.0, %v5231_v22 }
0x16e5   :  { %v2554_v53 = vadd.f32 1.0, %v5233_v27 }
0x16e6   :  { %5234 = vrcp.f32 %v2660_v51 }
0x16e7   :  { %5236 = vrcp.f32 %v2554_v53 }
0x16f3   :  { %v5235_v49 = vpop.eup %5234 }
0x16f4   :  { %v5237_v54 = vpop.eup %5236  ;;  %v2674_v47 = vsub.f32 1.0, %v5235_v49  ;;  %v2680_v57 = vmul.f32 %v5235_v49, %v6643_v6 }
0x16f5   :  { %v2568_v48 = vsub.f32 1.0, %v5237_v54  ;;  %v2574_v37 = vmul.f32 %v5237_v54, %v6648_v36 }
0x1744   :  { %v2665_v50 = vpop.permute.xlu0 %2664 }
0x1745   :  { %v2667_v56 = vmul.f32 %v5235_v49, %v2665_v50  ;;  %v2559_v58 = vpop.permute.xlu1 %2558  ;;  %v2893_v50 = vld [vmem:[#allocation25 + $0x10] sm:$0xff] }
0x1746   :  { %v2561_v59 = vmul.f32 %v5237_v54, %v2559_v58  ;;  %v2892_v54 = vld [vmem:[#allocation25 + $0x8] sm:$0xff]  ;;  %v4419_v58 = vld [vmem:[#allocation29] ss:$0 sm:$0xff] }
0x1747   :  { %2669 = vrot.lane.b32.xlu0 %v2667_v56, %s5811_s24  ;;  %v2891_v56 = vld [vmem:[#allocation25] sm:$0xff] }
0x1748   :  { %2563 = vrot.lane.b32.xlu1 %v2561_v59, %s5811_s24 }
0x17b9   :  { %v2670_v35 = vpop.permute.xlu0 %2669 }
0x17ba   :  { %v2672_v60 = vadd.f32 %v2670_v35, %v2583_v13  ;;  %v2564_v61 = vpop.permute.xlu1 %2563 }
0x17bb   :  { %v2566_v63 = vadd.f32 %v2564_v61, %v2548_v18  ;;  %v2894_v18 = vld [vmem:[#allocation25 + $0x18] sm:$0xff] }
0x17bc   :  { %5238 = vtanh.f32 %v2672_v60  ;;  %v4413_v61 = vld [vmem:[#allocation23] ss:$0 sm:$0xff] }
0x17bd   :  { %5240 = vtanh.f32 %v2566_v63 }
0x17c9   :  { %v5239_v1 = vpop.eup %5238 }
0x17ca   :  { %v5241_v2 = vpop.eup %5240  ;;  %2676 = vrot.lane.b32.xlu0 %v5239_v1, %s5812_s5 }
0x17cb   :  { %2570 = vrot.lane.b32.xlu1 %v5241_v2, %s5812_s5 }
0x183c   :  { %v2677_v23 = vpop.permute.xlu0 %2676 }
0x183d   :  { %v2679_v5 = vmul.f32 %v2677_v23, %v2674_v47  ;;  %v2571_v10 = vpop.permute.xlu1 %2570  ;;  %v4416_v23 = vld [vmem:[#allocation26] ss:$0 sm:$0xff] }
0x183e   :  { %v2573_v11 = vmul.f32 %v2571_v10, %v2568_v48 }
0x183f   :  { %v2681_v8 = vadd.f32 %v2680_v57, %v2679_v5 }
0x1840   :  { %v6681_v14 = vadd.f32 %v2574_v37, %v2573_v11 }
0x1841   :  { %2683 = vrot.lane.b32.xlu0 %v2681_v8, %s5812_s5 }
0x18b3   :  { %v2684_v17 = vpop.permute.xlu0 %2683 }
0x18b4   :  { %v2686_v55 = vsel %vm955_vm3, %v2684_v17, %v6681_v14 }
0x18b5   :  { %4933 = vmatmul.mubr.msk.f32.vlgmr.msra.gmra.mxu0 %vm426_vm0, %v2686_v55  ;;  %v3140_v55 = vlaneseq }
0x18b6   :  { %4958 = vmatpush3.msra.mxu0 %v2980_v33 }
0x18b7   :  { %4959 = vmatprep.subr.mxu0 %v2979_v29 }
0x18b8   :  { %4960 = vmatpush3.msra.mxu0 %v2979_v29 }
0x18b9   :  { %4961 = vmatprep.subr.mxu0 %v2978_v31 }
0x18ba   :  { %4962 = vmatpush3.msra.mxu0 %v2978_v31 }
0x18bb   :  { %4963 = vmatprep.subr.mxu0 %v2977_v42 }
0x18bc   :  { %4964 = vmatpush3.msra.mxu0 %v2977_v42 }
0x18bd   :  { %4978 = vmatprep.subr.mxu0 %v5808_v21 }
0x1975   :  { %v2756_v0 = vpop.f32.mrf.mxu0 }
0x1976   :  { %v2757_v20 = vadd.f32 %v6401_v62, %v2756_v0  ;;  %v6763_v0 = vshrl.u32 %v3140_v55, 7 }
0x1977   :  { %v4934_v3 = vpop.f32.mrf.mxu0 }
0x1978   :  { %2767 = vrot.lane.b32.xlu1 %v2757_v20, %s5813_s12  ;;  %v4412_v24 = vmul.f32 -1.442695, %v2757_v20  ;;  %v2798_v3 = vld [vmem:[#allocation5] sm:$0x3] }
0x197a   :  { %5242 = vpow2.f32 %v4412_v24 }
0x1987   :  { %v5243_v25 = vpop.eup %5242 }
0x1988   :  { %v2763_v26 = vadd.f32 1.0, %v5243_v25 }
0x198a   :  { %5244 = vrcp.f32 %v2763_v26 }
0x1997   :  { %v5245_v6 = vpop.eup %5244 }
0x1998   :  { %v2783_v43 = vmul.f32 %v5245_v6, %v6681_v14 }
0x19ea   :  { %v2768_v28 = vpop.permute.xlu1 %2767 }
0x19eb   :  { %v2770_v34 = vmul.f32 %v5245_v6, %v2768_v28 }
0x19ed   :  { %2772 = vrot.lane.b32.xlu0 %v2770_v34, %s5811_s24 }
0x19f1   :  { %1324 = vrot.lane.b32.xlu0 %v6432_v15, %s5812_s5 }
0x19f5   :  { %1741 = vrot.lane.b32.xlu0 %v6528_v16, %s5812_s5 }
0x19f9   :  { %2159 = vrot.lane.b32.xlu0 %v6623_v19, %s5812_s5  ;;  %v2802_v19 = vld [vmem:[#allocation22 + $0x18] sm:$0xff] }
0x19fa   :  { %4935 = vmatprep.subr.mxu1 %v2802_v19 }
0x19fb   :  { %4936 = vmatpush3.msra.mxu1 %v2802_v19 }
0x19fc   :  { %4937 = vmatprep.subr.mxu1 %v2801_v41 }
0x19fd   :  { %2577 = vrot.lane.b32.xlu0 %v6681_v14, %s5812_s5  ;;  %4938 = vmatpush3.msra.mxu1 %v2801_v41 }
0x19fe   :  { %4939 = vmatprep.subr.mxu1 %v2800_v7 }
0x19ff   :  { %4940 = vmatpush3.msra.mxu1 %v2800_v7 }
0x1a5f   :  { %v2773_v62 = vpop.permute.xlu0 %2772 }
0x1a60   :  { %v2775_v9 = vadd.f32 %v2773_v62, %v2757_v20  ;;  %v3142_v20 = vsub.s32 0, %v6763_v0  ;;  %v3482_v62 = vsub.s32 1, %v6763_v0 }
0x1a62   :  { %5246 = vtanh.f32 %v2775_v9  ;;  %v3143_v24 = vrot.slane %v2798_v3, %v3142_v20 }
0x1a63   :  { %v1325_v32 = vpop.permute.xlu0 %1324 }
0x1a64   :  { %1327 = vst.msk [vmem:[#allocation3] sm:$0xff] %vm955_vm3, %v1325_v32 }
0x1a67   :  { %v1742_v12 = vpop.permute.xlu0 %1741 }
0x1a68   :  { %1745 = vst.msk [vmem:[#allocation3 + $0x10] sm:$0xff] %vm955_vm3, %v1742_v12 }
0x1a6b   :  { %v2160_v38 = vpop.permute.xlu0 %2159 }
0x1a6c   :  { %2163 = vst.msk [vmem:[#allocation3 + $0x20] sm:$0xff] %vm955_vm3, %v2160_v38 }
0x1a6f   :  { %v5247_v15 = vpop.eup %5246  ;;  %v2578_v16 = vpop.permute.xlu0 %2577 }
0x1a70   :  { %2581 = vst.msk [vmem:[#allocation3 + $0x30] sm:$0xff] %vm955_vm3, %v2578_v16  ;;  %2779 = vrot.lane.b32.xlu1 %v5247_v15, %s5812_s5  ;;  %v3483_v15 = vrot.slane %v2798_v3, %v3482_v62 }
0x1a74   :  { %1532 = vrot.lane.b32.xlu1 %v6480_v30, %s5812_s5  ;;  %v2799_v30 = vld [vmem:[#allocation22] sm:$0xff] }
0x1a75   :  { %4941 = vmatprep.subr.mxu1 %v2799_v30 }
0x1a76   :  { %4942 = vmatpush3.msra.mxu1 %v2799_v30 }
0x1a77   :  { %4946 = vmatprep.subr.mxu1 %v2894_v18 }
0x1a78   :  { %1950 = vrot.lane.b32.xlu1 %v6576_v52, %s5812_s5  ;;  %v2777_v52 = vsub.f32 1.0, %v5245_v6 }
0x1a7c   :  { %2368 = vrot.lane.b32.xlu1 %v6648_v36, %s5812_s5 }
0x1ae2   :  { %v2780_v36 = vpop.permute.xlu1 %2779 }
0x1ae3   :  { %v2782_v45 = vmul.f32 %v2780_v36, %v2777_v52 }
0x1ae5   :  { %v2784_v39 = vadd.f32 %v2783_v43, %v2782_v45 }
0x1ae6   :  { %v1533_v46 = vpop.permute.xlu1 %1532 }
0x1ae7   :  { %1536 = vst.msk [vmem:[#allocation3 + $0x8] sm:$0xff] %vm955_vm3, %v1533_v46  ;;  %2786 = vrot.lane.b32.xlu1 %v2784_v39, %s5812_s5 }
0x1aea   :  { %v1951_v13 = vpop.permute.xlu1 %1950 }
0x1aeb   :  { %1954 = vst.msk [vmem:[#allocation3 + $0x18] sm:$0xff] %vm955_vm3, %v1951_v13 }
0x1aee   :  { %v2369_v4 = vpop.permute.xlu1 %2368 }
0x1aef   :  { %2372 = vst.msk [vmem:[#allocation3 + $0x28] sm:$0xff] %vm955_vm3, %v2369_v4 }
0x1af2   :  { %v2791_v44 = vld [vmem:[#allocation3] ss:$8 sm:$0xf]  ;;  %v2795_v22 = vld [vmem:[#allocation3 + $0x1] ss:$8 sm:$0xf] }
0x1b59   :  { %v2787_v40 = vpop.permute.xlu1 %2786 }
0x1b5a   :  { %2790 = vst.msk [vmem:[#allocation3 + $0x38] sm:$0xff] %vm955_vm3, %v2787_v40 }
0x1b61   :  { %v2792_v27 = vld [vmem:[#allocation3] ss:$8 sm:$0xf0]  ;;  %v2796_v51 = vld [vmem:[#allocation3 + $0x1] ss:$8 sm:$0xf0] }
0x1b62   :  { %v6715_v53 = vor.u32 %v2792_v27, %v2791_v44  ;;  %v6717_v49 = vor.u32 %v2796_v51, %v2795_v22 }
0x1b64   :  { %4943 = vmatprep.mubr.msk.f32.mxu1 %vm955_vm3, %v6715_v53  ;;  %4965 = vmatprep.mubr.msk.f32.mxu0 %vm955_vm3, %v6715_v53 }
0x1b65   :  { %4944 = vmatmul.mubr.msk.f32.vlgmr.msra.gmra.mxu1 %vm955_vm3, %v6717_v49  ;;  %4966 = vmatmul.mubr.msk.f32.vlgmr.msra.gmra.mxu0 %vm955_vm3, %v6717_v49 }
0x1b66   :  { %4947 = vmatpush3.msra.mxu1 %v2894_v18  ;;  %4954 = vmatprep.mubr.msk.f32.mxu1 %vm955_vm3, %v6715_v53 }
0x1b67   :  { %4948 = vmatprep.subr.mxu1 %v2893_v50  ;;  %4980 = vmatprep.mubr.msk.f32.mxu0 %vm5810_vm2, %v5808_v21 }
0x1b68   :  { %4949 = vmatpush3.msra.mxu1 %v2893_v50 }
0x1b69   :  { %4950 = vmatprep.subr.mxu1 %v2892_v54 }
0x1b6a   :  { %4951 = vmatpush3.msra.mxu1 %v2892_v54 }
0x1b6b   :  { %4952 = vmatprep.subr.mxu1 %v2891_v56 }
0x1b6c   :  { %4953 = vmatpush3.msra.mxu1 %v2891_v56 }
0x1b6d   :  { %4955 = vmatmul.mubr.msk.f32.vlgmr.msra.gmra.mxu1 %vm955_vm3, %v6717_v49  ;;  %4968 = vmatprep.subr.mxu1 %v5808_v21 }
0x1b6e   :  { %4970 = vmatprep.mubr.msk.f32.mxu1 %vm5810_vm2, %v5808_v21 }
0x1c25   :  { %v4945_v59 = vpop.f32.mrf.mxu1  ;;  %v4967_v35 = vpop.f32.mrf.mxu0 }
0x1c26   :  { %v6736_v60 = vadd.f32 %v4967_v35, %v4419_v58  ;;  %v2888_v2 = vadd.f32 %v4945_v59, %v4413_v61 }
0x1c27   :  { %v2882_v63 = vpop.f32.mrf.mxu1  ;;  %v3054_v8 = vpop.f32.mrf.mxu0 }
0x1c28   :  { %v2883_v1 = vadd.f32 %v4413_v61, %v2882_v63  ;;  %v6743_v10 = vadd.f32 %v4419_v58, %v3054_v8 }
0x1c2a   :  { %3230 = vrot.lane.b32.xlu1 %v2883_v1, %s5814_s1 }
0x1c2d   :  { %v4956_v47 = vpop.f32.mrf.mxu1 }
0x1c2e   :  { %3569 = vrot.lane.b32.xlu1 %v2888_v2, %s5814_s1  ;;  %v2974_v48 = vadd.f32 %v4956_v47, %v4416_v23 }
0x1c2f   :  { %v2968_v57 = vpop.f32.mrf.mxu1 }
0x1c30   :  { %v2969_v5 = vadd.f32 %v4416_v23, %v2968_v57 }
0x1c32   :  { %3232 = vrot.lane.b32.xlu0 %v2969_v5, %s5814_s1  ;;  %4969 = vmatpush3.xpose.msk.msra.mxu1 %vm558_vm1, %v2969_v5 }
0x1c33   :  { %4973 = vmatprep.subr.mxu1 %v5808_v21 }
0x1c35   :  { %4971 = vmatmul.mubr.msk.f32.vlgmr.msra.gmra.mxu1 %vm558_vm1, %v2883_v1 }
0x1c36   :  { %3571 = vrot.lane.b32.xlu0 %v2974_v48, %s5814_s1  ;;  %4974 = vmatpush3.msra.mxu1 %v6743_v10 }
0x1c37   :  { %4975 = vmatprep.mubr.msk.f32.mxu1 %vm5810_vm2, %v5808_v21  ;;  %4983 = vmatprep.subr.mxu1 %v5808_v21 }
0x1c9c   :  { %v3231_v37 = vpop.permute.xlu1 %3230 }
0x1ca0   :  { %v3570_v17 = vpop.permute.xlu1 %3569 }
0x1ca4   :  { %v3233_v11 = vpop.permute.xlu0 %3232 }
0x1ca5   :  { %4979 = vmatpush3.xpose.msk.msra.mxu0 %vm558_vm1, %v3233_v11 }
0x1ca6   :  { %4988 = vmatprep.subr.mxu0 %v5808_v21 }
0x1ca8   :  { %4981 = vmatmul.mubr.msk.f32.vlgmr.msra.gmra.mxu0 %vm558_vm1, %v3231_v37  ;;  %v3572_v14 = vpop.permute.xlu0 %3571 }
0x1ca9   :  { %4989 = vmatpush3.xpose.msk.msra.mxu0 %vm558_vm1, %v2974_v48  ;;  %4990 = vmatprep.mubr.msk.f32.mxu0 %vm5810_vm2, %v5808_v21 }
0x1caa   :  { %4998 = vmatprep.subr.mxu0 %v5808_v21 }
0x1cac   :  { %4991 = vmatmul.mubr.msk.f32.vlgmr.msra.gmra.mxu0 %vm558_vm1, %v2888_v2 }
0x1cad   :  { %4999 = vmatpush3.xpose.msk.msra.mxu0 %vm558_vm1, %v3572_v14  ;;  %5000 = vmatprep.mubr.msk.f32.mxu0 %vm5810_vm2, %v5808_v21 }
0x1cb0   :  { %5001 = vmatmul.mubr.msk.f32.vlgmr.msra.gmra.mxu0 %vm558_vm1, %v3570_v17 }
0x1cf5   :  { %v3135_v25 = vpop.f32.mrf.mxu1 }
0x1cf6   :  { %v3139_v26 = vmul.f32 0.25, %v3135_v25  ;;  %v3744_v25 = vld [vmem:[#allocation31 + $0x10] sm:$0xff] }
0x1cf7   :  { %v4972_v6 = vpop.f32.mrf.mxu1 }
0x1cf8   :  { %v3144_v28 = vadd.f32 %v3143_v24, %v3139_v26  ;;  %v3743_v26 = vld [vmem:[#allocation31 + $0x8] sm:$0xff]  ;;  %v3742_v6 = vld [vmem:[#allocation31] sm:$0xff] }
0x1cfa   :  { %v3146_v34 = vsel %vm3145_vm5, %v3144_v28, -inf }
0x1cfb   :  { %3147 = vmax.xlane.f32.xlu0 %v3146_v34 }
0x1d68   :  { %v3304_v9 = vpop.f32.mrf.mxu0 }
0x1d69   :  { %v3308_v32 = vmul.f32 0.25, %v3304_v9 }
0x1d6a   :  { %v4982_v12 = vpop.f32.mrf.mxu0 }
0x1d6b   :  { %v3309_v38 = vadd.f32 %v3308_v32, %v3143_v24 }
0x1d6c   :  { %v3475_v16 = vpop.f32.mrf.mxu0 }
0x1d6d   :  { %v3479_v19 = vmul.f32 0.25, %v3475_v16  ;;  %v3310_v33 = vsel %vm3145_vm5, %v3309_v38, -inf }
0x1d6e   :  { %3311 = vmax.xlane.f32.xlu1 %v3310_v33  ;;  %v4992_v41 = vpop.f32.mrf.mxu0  ;;  %v4434_v33 = vld [vmem:[#allocation32] ss:$0 sm:$0xff] }
0x1d6f   :  { %v3484_v29 = vadd.f32 %v3483_v15, %v3479_v19 }
0x1d70   :  { %v3643_v7 = vpop.f32.mrf.mxu0 }
0x1d71   :  { %v3647_v31 = vmul.f32 0.25, %v3643_v7  ;;  %v3485_v30 = vsel %vm3145_vm5, %v3484_v29, -inf }
0x1d72   :  { %v5002_v42 = vpop.f32.mrf.mxu0  ;;  %3486 = vmax.xlane.f32.xlu0 %v3485_v30 }
0x1d73   :  { %v3648_v52 = vadd.f32 %v3647_v31, %v3483_v15 }
0x1d75   :  { %v3649_v36 = vsel %vm3145_vm5, %v3648_v52, -inf }
0x1d76   :  { %3650 = vmax.xlane.f32.xlu0 %v3649_v36 }
0x1d84   :  { %v3148_v43 = vpop.xlane.xlu0 %3147 }
0x1d85   :  { %v3149_v45 = vsub.f32 %v3144_v28, %v3148_v43 }
0x1d87   :  { %v3150_v18 = vmul.f32 1.442695, %v3149_v45 }
0x1d89   :  { %5248 = vpow2.f32 %v3150_v18 }
0x1d96   :  { %v5249_v39 = vpop.eup %5248 }
0x1d97   :  { %v3152_v46 = vsel %vm3145_vm5, %v5249_v39, 0.0 }
0x1d98   :  { %3153 = vadd.xlane.f32.xlu1 %v3152_v46 }
0x1df7   :  { %v3312_v13 = vpop.xlane.xlu1 %3311 }
0x1df8   :  { %v3313_v4 = vsub.f32 %v3309_v38, %v3312_v13 }
0x1dfa   :  { %v3314_v40 = vmul.f32 1.442695, %v3313_v4 }
0x1dfb   :  { %v3487_v44 = vpop.xlane.xlu0 %3486 }
0x1dfc   :  { %5250 = vpow2.f32 %v3314_v40  ;;  %v3488_v22 = vsub.f32 %v3484_v29, %v3487_v44  ;;  %v3884_v44 = vld [vmem:[%s6875_s2 + $0x18] sm:$0xff] }
0x1dfe   :  { %v3489_v27 = vmul.f32 1.442695, %v3488_v22  ;;  %v3883_v22 = vld [vmem:[%s6875_s2 + $0x10] sm:$0xff] }
0x1dff   :  { %v3651_v51 = vpop.xlane.xlu0 %3650 }
0x1e00   :  { %5252 = vpow2.f32 %v3489_v27  ;;  %v3652_v50 = vsub.f32 %v3648_v52, %v3651_v51  ;;  %v3882_v27 = vld [vmem:[%s6875_s2 + $0x8] sm:$0xff]  ;;  %v3881_v51 = vld [vmem:[%s6875_s2] sm:$0xff] }
0x1e02   :  { %v3653_v54 = vmul.f32 1.442695, %v3652_v50 }
0x1e04   :  { %5254 = vpow2.f32 %v3653_v54 }
0x1e09   :  { %v5251_v56 = vpop.eup %5250 }
0x1e0a   :  { %v3316_v58 = vsel %vm3145_vm5, %v5251_v56, 0.0 }
0x1e0b   :  { %3317 = vadd.xlane.f32.xlu0 %v3316_v58 }
0x1e0d   :  { %v5253_v59 = vpop.eup %5252 }
0x1e0e   :  { %v3491_v35 = vsel %vm3145_vm5, %v5253_v59, 0.0 }
0x1e0f   :  { %3492 = vadd.xlane.f32.xlu1 %v3491_v35 }
0x1e11   :  { %v5255_v61 = vpop.eup %5254 }
0x1e12   :  { %v3655_v63 = vsel %vm3145_vm5, %v5255_v61, 0.0 }
0x1e13   :  { %3656 = vadd.xlane.f32.xlu0 %v3655_v63  ;;  %v4437_v63 = vld [vmem:[#allocation34] ss:$0 sm:$0xff] }
0x1e20   :  { %3322 = vrot.lane.b32.xlu1 %v6743_v10, %s5814_s1 }
0x1e21   :  { %v3154_v1 = vpop.xlane.xlu1 %3153 }
0x1e22   :  { %5256 = vrcp.f32 %v3154_v1 }
0x1e29   :  { %3661 = vrot.lane.b32.xlu0 %v6736_v60, %s5814_s1 }
0x1e2f   :  { %v5257_v2 = vpop.eup %5256 }
0x1e30   :  { %v3156_v47 = vmul.f32 %v5257_v2, %v5249_v39  ;;  %v4438_v2 = vld [vmem:[#allocation35] ss:$0 sm:$0xff] }
0x1e32   :  { %4976 = vmatmul.mubr.msk.f32.vlgmr.msra.gmra.mxu1 %vm3145_vm5, %v3156_v47 }
0x1e33   :  { %4985 = vmatprep.mubr.msk.f32.mxu1 %vm5810_vm2, %v5808_v21 }
0x1e94   :  { %v3318_v23 = vpop.xlane.xlu0 %3317 }
0x1e95   :  { %5258 = vrcp.f32 %v3318_v23 }
0x1e98   :  { %v3493_v57 = vpop.xlane.xlu1 %3492 }
0x1e99   :  { %5260 = vrcp.f32 %v3493_v57 }
0x1e9c   :  { %v3323_v5 = vpop.permute.xlu1 %3322  ;;  %v3657_v8 = vpop.xlane.xlu0 %3656 }
0x1e9d   :  { %5262 = vrcp.f32 %v3657_v8  ;;  %4984 = vmatpush3.msra.mxu1 %v3323_v5 }
0x1e9e   :  { %4993 = vmatprep.subr.mxu1 %v5808_v21 }
0x1ea0   :  { %v3662_v14 = vpop.permute.xlu0 %3661 }
0x1ea2   :  { %v5259_v10 = vpop.eup %5258 }
0x1ea3   :  { %v3320_v48 = vmul.f32 %v5259_v10, %v5251_v56 }
0x1ea5   :  { %4986 = vmatmul.mubr.msk.f32.vlgmr.msra.gmra.mxu1 %vm3145_vm5, %v3320_v48  ;;  %v3994_v48 = vld [vmem:[#allocation37 + $0x18] sm:$0xff] }
0x1ea6   :  { %v5261_v11 = vpop.eup %5260  ;;  %4994 = vmatpush3.msra.mxu1 %v6736_v60  ;;  %4995 = vmatprep.mubr.msk.f32.mxu1 %vm5810_vm2, %v5808_v21  ;;  %v3745_v60 = vld [vmem:[#allocation31 + $0x18] sm:$0xff] }
0x1ea7   :  { %5003 = vmatprep.subr.mxu1 %v5808_v21  ;;  %v3495_v37 = vmul.f32 %v5261_v11, %v5253_v59  ;;  %5008 = vmatprep.subr.mxu0 %v3745_v60  ;;  %v3993_v11 = vld [vmem:[#allocation37 + $0x10] sm:$0xff] }
0x1ea8   :  { %5009 = vmatpush3.msra.mxu0 %v3745_v60 }
0x1ea9   :  { %4996 = vmatmul.mubr.msk.f32.vlgmr.msra.gmra.mxu1 %vm3145_vm5, %v3495_v37  ;;  %5010 = vmatprep.subr.mxu0 %v3744_v25  ;;  %v3992_v37 = vld [vmem:[#allocation37 + $0x8] sm:$0xff] }
0x1eaa   :  { %v5263_v17 = vpop.eup %5262  ;;  %5004 = vmatpush3.msra.mxu1 %v3662_v14  ;;  %5005 = vmatprep.mubr.msk.f32.mxu1 %vm5810_vm2, %v5808_v21  ;;  %v3991_v14 = vld [vmem:[#allocation37] sm:$0xff] }
0x1eab   :  { %v3659_v55 = vmul.f32 %v5263_v17, %v5255_v61  ;;  %5011 = vmatpush3.msra.mxu0 %v3744_v25  ;;  %5019 = vmatprep.subr.mxu1 %v3884_v44  ;;  %v4439_v17 = vld [vmem:[%s6876_s6] ss:$0 sm:$0xff] }
0x1eac   :  { %5012 = vmatprep.subr.mxu0 %v3743_v26 }
0x1ead   :  { %5006 = vmatmul.mubr.msk.f32.vlgmr.msra.gmra.mxu1 %vm3145_vm5, %v3659_v55  ;;  %5013 = vmatpush3.msra.mxu0 %v3743_v26 }
0x1eae   :  { %5014 = vmatprep.subr.mxu0 %v3742_v6  ;;  %5020 = vmatpush3.msra.mxu1 %v3884_v44 }
0x1eaf   :  { %5015 = vmatpush3.msra.mxu0 %v3742_v6  ;;  %5021 = vmatprep.subr.mxu1 %v3883_v22 }
0x1eb0   :  { %5022 = vmatpush3.msra.mxu1 %v3883_v22  ;;  %5030 = vmatprep.subr.mxu0 %v3994_v48 }
0x1eb1   :  { %5023 = vmatprep.subr.mxu1 %v3882_v27 }
0x1eb2   :  { %5024 = vmatpush3.msra.mxu1 %v3882_v27 }
0x1eb3   :  { %5025 = vmatprep.subr.mxu1 %v3881_v51 }
0x1eb4   :  { %5026 = vmatpush3.msra.mxu1 %v3881_v51 }
0x1eb5   :  { %5041 = vmatprep.subr.mxu1 %v5808_v21 }
0x1ef2   :  { %v3226_v3 = vpop.f32.mrf.mxu1 }
0x1ef4   :  { %v4977_v24 = vpop.f32.mrf.mxu1 }
0x1f65   :  { %v3394_v28 = vpop.f32.mrf.mxu1 }
0x1f66   :  { %3399 = vrot.lane.b32.xlu1 %v3394_v28, %s5809_s30 }
0x1f67   :  { %v4987_v34 = vpop.f32.mrf.mxu1 }
0x1f69   :  { %v3565_v62 = vpop.f32.mrf.mxu1 }
0x1f6b   :  { %v4997_v9 = vpop.f32.mrf.mxu1 }
0x1f6d   :  { %v3733_v32 = vpop.f32.mrf.mxu1 }
0x1f6e   :  { %3738 = vrot.lane.b32.xlu1 %v3733_v32, %s5809_s30 }
0x1f6f   :  { %v5007_v12 = vpop.f32.mrf.mxu1 }
0x1fd8   :  { %v3400_v38 = vpop.permute.xlu1 %3399 }
0x1fd9   :  { %v3402_v15 = vsel %vm558_vm1, %v3226_v3, %v3400_v38 }
0x1fda   :  { %5016 = vmatprep.mubr.msk.f32.mxu0 %vm955_vm3, %v3402_v15 }
0x1fe0   :  { %v3739_v16 = vpop.permute.xlu1 %3738 }
0x1fe1   :  { %v3741_v19 = vsel %vm558_vm1, %v3565_v62, %v3739_v16 }
0x1fe2   :  { %5017 = vmatmul.mubr.msk.f32.vlgmr.msra.gmra.mxu0 %vm955_vm3, %v3741_v19 }
0x1fe3   :  { %5031 = vmatpush3.msra.mxu0 %v3994_v48 }
0x1fe4   :  { %5032 = vmatprep.subr.mxu0 %v3993_v11 }
0x1fe5   :  { %5033 = vmatpush3.msra.mxu0 %v3993_v11  ;;  %v4129_v11 = vld [vmem:[%s5989_s21] sm:$0x1]  ;;  %s5815_s21 = smov [#allocation38]  }
0x1fe6   :  { %5034 = vmatprep.subr.mxu0 %v3992_v37 }
0x1fe7   :  { %5035 = vmatpush3.msra.mxu0 %v3992_v37 }
0x1fe8   :  { %5036 = vmatprep.subr.mxu0 %v3991_v14 }
0x1fe9   :  { %5037 = vmatpush3.msra.mxu0 %v3991_v14 }
0x20a2   :  { %v5018_v41 = vpop.f32.mrf.mxu0 }
0x20a3   :  { %v3831_v29 = vadd.f32 %v5018_v41, %v4434_v33 }
0x20a4   :  { %v3825_v7 = vpop.f32.mrf.mxu0 }
0x20a5   :  { %v3835_v31 = vadd.f32 %v3831_v29, %v6717_v49  ;;  %v3826_v30 = vadd.f32 %v4434_v33, %v3825_v7 }
0x20a7   :  { %v3834_v42 = vadd.f32 %v3826_v30, %v6715_v53  ;;  %v3841_v52 = vsel %vm955_vm3, %v3835_v31, 0.0  ;;  %v4442_v30 = vld [vmem:[%s6877_s9] ss:$0 sm:$0xff] }
0x20a8   :  { %3842 = vadd.xlane.f32.xlu1 %v3841_v52 }
0x20a9   :  { %v3838_v36 = vsel %vm955_vm3, %v3834_v42, 0.0 }
0x20aa   :  { %3839 = vadd.xlane.f32.xlu0 %v3838_v36 }
0x2131   :  { %v3843_v43 = vpop.xlane.xlu1 %3842 }
0x2132   :  { %v3846_v45 = vmul.f32 0.03125, %v3843_v43 }
0x2133   :  { %v3840_v18 = vpop.xlane.xlu0 %3839 }
0x2134   :  { %v3845_v39 = vmul.f32 0.03125, %v3840_v18  ;;  %v3848_v46 = vsub.f32 %v3835_v31, %v3846_v45 }
0x2136   :  { %v3847_v13 = vsub.f32 %v3834_v42, %v3845_v39  ;;  %v3850_v53 = vmul.f32 %v3848_v46, %v3848_v46 }
0x2138   :  { %v3849_v49 = vmul.f32 %v3847_v13, %v3847_v13  ;;  %v3854_v40 = vsel %vm955_vm3, %v3850_v53, 0.0 }
0x213a   :  { %v3851_v4 = vsel %vm955_vm3, %v3849_v49, 0.0 }
0x213b   :  { %3852 = vadd.xlane.f32.xlu0 %v3851_v4 }
0x213f   :  { %3855 = vadd.xlane.f32.xlu0 %v3854_v40 }
0x21c4   :  { %v3853_v50 = vpop.xlane.xlu0 %3852 }
0x21c5   :  { %v3857_v54 = vmul.f32 0.03125, %v3853_v50 }
0x21c7   :  { %v3859_v56 = vadd.f32 1e-12, %v3857_v54  ;;  %v4130_v54 = vld [vmem:[#allocation4] sm:$0x1] }
0x21c8   :  { %v3856_v58 = vpop.xlane.xlu0 %3855 }
0x21c9   :  { %5264 = vrsqrt.f32 %v3859_v56  ;;  %v3858_v59 = vmul.f32 0.03125, %v3856_v58 }
0x21cb   :  { %v3860_v35 = vadd.f32 1e-12, %v3858_v59 }
0x21cd   :  { %5266 = vrsqrt.f32 %v3860_v35 }
0x21d6   :  { %v5265_v61 = vpop.eup %5264 }
0x21d7   :  { %v3863_v1 = vmul.f32 %v5265_v61, %v3847_v13 }
0x21d9   :  { %v3871_v47 = vmul.f32 %v4437_v63, %v3863_v1 }
0x21da   :  { %v5267_v23 = vpop.eup %5266 }
0x21db   :  { %v3864_v57 = vmul.f32 %v5267_v23, %v3848_v46  ;;  %v3879_v5 = vadd.f32 %v4438_v2, %v3871_v47 }
0x21dd   :  { %v3872_v8 = vmul.f32 %v4437_v63, %v3864_v57  ;;  %5027 = vmatprep.mubr.msk.f32.mxu1 %vm955_vm3, %v3879_v5  ;;  %v4445_v57 = vld [vmem:[%s6878_s7] ss:$0 sm:$0xff] }
0x21df   :  { %v3880_v10 = vadd.f32 %v4438_v2, %v3872_v8  ;;  %v4446_v8 = vld [vmem:[%s5984_s4] ss:$0 sm:$0xff]  ;;  %s4302_s4 = sshll.u32 %s5815_s21, 4  ;;  %s4303_s4 = int_to_ptr.vmem [resolvable:$true] %s4302_s4 }
0x21e0   :  { %s5705_s20 = scalar_lea.vmem %s4303_s4, 32  ;;  %p5710_p8 = scmp.lt.s32.totalorder %s4303_s4, %s4303_s4 }
0x21e1   :  { %5028 = vmatmul.mubr.msk.f32.vlgmr.msra.gmra.mxu1 %vm955_vm3, %v3880_v10  ;;  %p5706_p7 = scmp.ne.s32.totalorder %s4303_s4, %s5705_s20  ;;  %p5711_p9 = scmp.lt.s32.totalorder %s5705_s20, %s5705_s20 }
0x21e2   :  { %5043 = vmatprep.mubr.msk.f32.mxu1 %vm5810_vm2, %v5808_v21 }
0x21e3   :  { %p5712_p10 = por %p5711_p9, %p5710_p8 }
0x21e5   :  { %p5713_p11 = pnand %p5712_p10, %p5706_p7 }
0x22a1   :  { %v5029_v55 = vpop.f32.mrf.mxu1 }
0x22a2   :  { %v3970_v3 = vadd.f32 %v5029_v55, %v4439_v17 }
0x22a3   :  { %v3964_v24 = vpop.f32.mrf.mxu1 }
0x22a4   :  { %v3974_v60 = vmul.f32 %v3970_v3, %v3970_v3  ;;  %v3965_v25 = vadd.f32 %v4439_v17, %v3964_v24 }
0x22a6   :  { %v3976_v26 = vmul.f32 %v3974_v60, %v3970_v3  ;;  %v3973_v6 = vmul.f32 %v3965_v25, %v3965_v25 }
0x22a8   :  { %v3978_v28 = vmul.f32 0.044715, %v3976_v26  ;;  %v3975_v34 = vmul.f32 %v3973_v6, %v3965_v25 }
0x22aa   :  { %v3980_v62 = vadd.f32 %v3978_v28, %v3970_v3  ;;  %v3977_v9 = vmul.f32 0.044715, %v3975_v34 }
0x22ac   :  { %v3982_v32 = vmul.f32 0.7978846, %v3980_v62  ;;  %v3979_v12 = vadd.f32 %v3977_v9, %v3965_v25 }
0x22ae   :  { %5268 = vtanh.f32 %v3982_v32  ;;  %v3981_v38 = vmul.f32 0.7978846, %v3979_v12 }
0x22b0   :  { %5270 = vtanh.f32 %v3981_v38 }
0x22bb   :  { %v5269_v15 = vpop.eup %5268 }
0x22bc   :  { %v3986_v16 = vadd.f32 1.0, %v5269_v15 }
0x22bd   :  { %v5271_v19 = vpop.eup %5270 }
0x22be   :  { %v3985_v33 = vadd.f32 1.0, %v5271_v19  ;;  %v3988_v41 = vmul.f32 0.5, %v3986_v16 }
0x22c0   :  { %v3987_v29 = vmul.f32 0.5, %v3985_v33  ;;  %v3990_v31 = vmul.f32 %v3988_v41, %v3970_v3 }
0x22c2   :  { %v3989_v7 = vmul.f32 %v3987_v29, %v3965_v25 }
0x22c4   :  { %5038 = vmatprep.mubr.msk.f32.mxu0 %vm955_vm3, %v3989_v7 }
0x22c5   :  { %5039 = vmatmul.mubr.msk.f32.vlgmr.msra.gmra.mxu0 %vm955_vm3, %v3990_v31 }
0x2385   :  { %v5040_v42 = vpop.f32.mrf.mxu0 }
0x2386   :  { %v4080_v52 = vadd.f32 %v5040_v42, %v4442_v30 }
0x2387   :  { %v4074_v36 = vpop.f32.mrf.mxu0 }
0x2388   :  { %v4084_v43 = vadd.f32 %v4080_v52, %v3880_v10  ;;  %v4075_v45 = vadd.f32 %v4442_v30, %v4074_v36 }
0x238a   :  { %v4083_v18 = vadd.f32 %v4075_v45, %v3879_v5  ;;  %v4090_v39 = vsel %vm955_vm3, %v4084_v43, 0.0 }
0x238b   :  { %4091 = vadd.xlane.f32.xlu0 %v4090_v39 }
0x238c   :  { %v4087_v46 = vsel %vm955_vm3, %v4083_v18, 0.0 }
0x238d   :  { %4088 = vadd.xlane.f32.xlu1 %v4087_v46 }
0x2414   :  { %v4092_v13 = vpop.xlane.xlu0 %4091 }
0x2415   :  { %v4094_v49 = vmul.f32 0.03125, %v4092_v13 }
0x2416   :  { %v4089_v4 = vpop.xlane.xlu1 %4088 }
0x2417   :  { %v4096_v53 = vsub.f32 %v4084_v43, %v4094_v49  ;;  %v4093_v40 = vmul.f32 0.03125, %v4089_v4 }
0x2419   :  { %v4095_v44 = vsub.f32 %v4083_v18, %v4093_v40  ;;  %v4098_v22 = vmul.f32 %v4096_v53, %v4096_v53 }
0x241b   :  { %v4102_v27 = vsel %vm955_vm3, %v4098_v22, 0.0  ;;  %v4097_v51 = vmul.f32 %v4095_v44, %v4095_v44 }
0x241c   :  { %4103 = vadd.xlane.f32.xlu0 %v4102_v27 }
0x241d   :  { %v4099_v50 = vsel %vm955_vm3, %v4097_v51, 0.0 }
0x241e   :  { %4100 = vadd.xlane.f32.xlu1 %v4099_v50 }
0x242f   :  { %4133 = vperm.xlu1 %5119, %v4130_v54  }
0x24a5   :  { %v4104_v56 = vpop.xlane.xlu0 %4103 }
0x24a6   :  { %v4106_v58 = vmul.f32 0.03125, %v4104_v56 }
0x24a7   :  { %v4101_v59 = vpop.xlane.xlu1 %4100 }
0x24a8   :  { %v4108_v35 = vadd.f32 1e-12, %v4106_v58  ;;  %v4105_v61 = vmul.f32 0.03125, %v4101_v59 }
0x24aa   :  { %5272 = vrsqrt.f32 %v4108_v35  ;;  %v4107_v63 = vadd.f32 1e-12, %v4105_v61 }
0x24ab   :  { %v4134_v14 = vpop.permute.xlu1 %4133 }
0x24ac   :  { %5274 = vrsqrt.f32 %v4107_v63  ;;  %v4139_v3 = vrot.slane %v4134_v14, %v3142_v20 }
0x24b7   :  { %v5273_v1 = vpop.eup %5272 }
0x24b8   :  { %v4112_v47 = vmul.f32 %v5273_v1, %v4096_v53 }
0x24b9   :  { %v5275_v2 = vpop.eup %5274 }
0x24ba   :  { %v4111_v23 = vmul.f32 %v5275_v2, %v4095_v44  ;;  %v4120_v48 = vmul.f32 %v4445_v57, %v4112_v47 }
0x24bc   :  { %v4119_v5 = vmul.f32 %v4445_v57, %v4111_v23  ;;  %v4128_v37 = vadd.f32 %v4446_v8, %v4120_v48 }
0x24be   :  { %v4127_v10 = vadd.f32 %v4446_v8, %v4119_v5 }
0x24c0   :  { %5042 = vmatpush3.xpose.msk.msra.mxu1 %vm955_vm3, %v4127_v10 }
0x24c1   :  { %5046 = vmatprep.subr.mxu1 %v5808_v21 }
0x24c3   :  { %5044 = vmatmul.mubr.msk.f32.vlgmr.msra.gmra.mxu1 %vm955_vm3, %v4129_v11 }
0x24c4   :  { %5047 = vmatpush3.xpose.msk.msra.mxu1 %vm955_vm3, %v4128_v37  ;;  %5048 = vmatprep.mubr.msk.f32.mxu1 %vm5810_vm2, %v5808_v21 }
0x24c7   :  { %5049 = vmatmul.mubr.msk.f32.vlgmr.msra.gmra.mxu1 %vm955_vm3, %v4129_v11 }
0x2583   :  { %v4212_v17 = vpop.f32.mrf.mxu1 }
0x2584   :  { %v4213_v26 = vadd.f32 %v4212_v17, %v4139_v3 }
0x2585   :  { %v5045_v55 = vpop.f32.mrf.mxu1 }
0x2587   :  { %v4285_v24 = vpop.f32.mrf.mxu1 }
0x2588   :  { %v4286_v60 = vadd.f32 %v4285_v24, %v4139_v3 }
0x2589   :  { %v5050_v25 = vpop.f32.mrf.mxu1 }
0x258a   :  { %v4290_v6 = vrot.slane %v4286_v60, 7 }
0x258c   :  { %v4293_v28 = vsel %vm4292_vm6, %v4213_v26, %v4290_v6 }
0x258d   :  { %4295 = vst.msk [vmem:[#allocation38] sm:$0x3] %vm4294_vm7, %v4293_v28 }
0x258e   :  { %5716 = shalt.err (!%p5713_p11)
}
0x258f   :  { %4305 = dma.vmem_to_hbm [thread:$0]  %s4303_s4, 32, %s5997_s17, [#allocation7]  }
0x2590   :  { %5747 = dma.done.wait [#allocation7], 32  }
0x2591   :  { %5748 = vsyncadd [#allocation7], 4294967264 }
0x2592   :  { %4309 = vsyncpa [#allocation6], 1 }
0x2593   :  { %4310 = vsyncpa [#allocation9], 1 }
0x2594   :  { %4311 = vsyncpa [#allocation12], 1 }
0x2595   :  { %4312 = vsyncpa [#allocation15], 1 }
0x2596   :  { %4313 = vsyncpa [#allocation18], 1 }
0x2597   :  { %4314 = vsyncpa [#allocation21], 1 }
0x2598   :  { %4315 = vsyncpa [#allocation24], 1 }
0x2599   :  { %4316 = vsyncpa [#allocation27], 1 }
0x259a   :  { %4317 = vsyncpa [#allocation30], 1 }
0x259b   :  { %4318 = vsyncpa [#allocation33], 1 }
0x259c   :  { %4319 = vsyncpa [#allocation36], 1 }
0x259d   :  { %4320 = vsyncpa [#allocation7], 1 }

</bundles_post_ra>
